<compile_context>
chip_gen: v5e
topology: v5e:2x2
jax: 0.10.0
libtpu: 0.0.40
codegen_flags: <defaults>
</compile_context>

<pallas_src>
import functools
import math

import jax
import jax.numpy as jnp
from jax.experimental import pallas as pl
from jax.experimental.pallas import tpu as pltpu


def center_intersection_kernel(emb_ref, w1_ref, b1_ref, w2_ref, b2_ref, out_ref,
                               *, n_valid):
    """One grid step = TB independent intersections.

    emb: (TB, Np, D) f32, Np = N padded to a multiple of 8 (padded rows are 0)
    w1/w2: (D, D) input-major (y = x @ W + b)    b1/b2: (1, D)    out: (TB, D)
    """
    emb = emb_ref[...]
    tb, n, d = emb.shape

    # Flatten the batch of conjunct sets into one big MXU LHS (Np is always a
    # multiple of 8, so this is a pure sublane relabel) -> one systolic pass
    # per layer instead of TB tiny (<=8 x D) matmuls.
    x = emb.reshape(tb * n, d)
    h = jnp.maximum(
        jnp.dot(x, w1_ref[...], preferred_element_type=jnp.float32) + b1_ref[...],
        0.0,
    )
    logits = (
        jnp.dot(h, w2_ref[...], preferred_element_type=jnp.float32) + b2_ref[...]
    ).reshape(tb, n, d)

    if n_valid < n:
        # Static branch: mask the zero-padded conjuncts out of the softmax.
        conj = jax.lax.broadcasted_iota(jnp.int32, (tb, n, d), 1)
        logits = jnp.where(conj < n_valid, logits, jnp.float32(-1e30))

    # Softmax over the N conjuncts (== torch softmax(dim=0)), normalization
    # deferred past the N-reduction: out = (sum_n e_n * emb_n) / (sum_n e_n).
    # Exact division keeps the attention weights summing to 1 in f32.
    m = jnp.max(logits, axis=1, keepdims=True)               # (TB, 1, D)
    e = jnp.exp(logits - m)                                   # (TB, Np, D)
    denom = jnp.sum(e, axis=1)                                # (TB, D)
    acc = jnp.sum(e * emb, axis=1)                            # (TB, D); pads add 0
    out_ref[...] = (acc / denom).astype(out_ref.dtype)


def _multi_tensorcore():
    """True on chips where the 'parallel' grid axis is sharded over 2 TCs."""
    try:
        kind = jax.devices()[0].device_kind.lower()
    except Exception:
        return False
    return any(t in kind for t in ("v3", "v4", "v7"))


def _auto_block_b(B, Np, D, itemsize):
    # Cap the per-step emb tile at ~1 MiB: with double-buffering plus ~4
    # same-size f32 temporaries (h / logits / e) and the output tile, the
    # footprint stays comfortably under v5e's 16 MiB scoped-VMEM default
    # (the tightest generation), while 0.5-1 MiB tiles are already past the
    # ~0.35 us per-grid-step overhead amortization knee.
    cap = max(8, (1 << 20) // max(1, Np * D * itemsize))
    block_b = B
    for cand in range(min(B, cap), 7, -1):
        if B % cand == 0 and cand % 8 == 0:
            block_b = cand
            break
    # On 2-TensorCore chips, make the grid length even (>= 2) so both cores
    # get work; on 1-TC chips keep the single/odd grid (one fewer ~0.35 us step).
    if _multi_tensorcore() and (B // block_b) % 2 == 1 and block_b % 16 == 0:
        block_b //= 2
    return block_b


def center_intersection_batched(embeddings, w1, b1, w2, b2, *, block_b=None):
    """embeddings: (B, N, D). w1/w2: (D, D) input-major. b1/b2: (D,). -> (B, D)."""
    B, N, D = embeddings.shape
    dtype = embeddings.dtype

    # Pad N up to a multiple of 8 (sublane tiling) so the flattened single-
    # matmul path is always taken; padded conjuncts are masked in the kernel.
    n_pad = (-N) % 8
    if n_pad:
        embeddings = jnp.pad(embeddings, ((0, 0), (0, n_pad), (0, 0)))
    Np = N + n_pad

    itemsize = jnp.dtype(dtype).itemsize
    if block_b is None:
        block_b = _auto_block_b(B, Np, D, itemsize)
    assert B % block_b == 0, "batch must be divisible by block_b"
    assert block_b % 8 == 0 or block_b == B, (
        "block_b must be a multiple of 8 (sublane tiling) or the full batch"
    )

    # VMEM budget: double-buffered emb tile + ~4 same-size f32 temporaries
    # + double-buffered output tile + resident weights/biases.
    emb_tile = block_b * Np * D * itemsize
    out_tile = block_b * D * itemsize
    vmem_est = 2 * emb_tile + 4 * block_b * Np * D * 4 + 2 * out_tile + 4 * D * D * 4
    vmem_limit = int(min(64 << 20, max(16 << 20, 2 * vmem_est)))

    kernel = functools.partial(center_intersection_kernel, n_valid=N)
    grid = (B // block_b,)
    out = pl.pallas_call(
        kernel,
        out_shape=jax.ShapeDtypeStruct((B, D), dtype),
        grid_spec=pltpu.PrefetchScalarGridSpec(
            num_scalar_prefetch=0,
            grid=grid,
            in_specs=[
                pl.BlockSpec((block_b, Np, D), lambda b: (b, 0, 0)),
                # Constant index_maps: weights/biases stay resident in VMEM
                # across the whole grid (no per-step re-DMA).
                pl.BlockSpec((D, D), lambda b: (0, 0)),
                pl.BlockSpec((1, D), lambda b: (0, 0)),
                pl.BlockSpec((D, D), lambda b: (0, 0)),
                pl.BlockSpec((1, D), lambda b: (0, 0)),
            ],
            out_specs=pl.BlockSpec((block_b, D), lambda b: (b, 0)),
        ),
        compiler_params=pltpu.CompilerParams(
            # Batch steps are independent -> shard across TCs where available.
            dimension_semantics=("parallel",),
            vmem_limit_bytes=vmem_limit,
        ),
    )(embeddings, w1, b1.reshape(1, D), w2, b2.reshape(1, D))
    return out


def reference_forward(embeddings, w1, b1, w2, b2):
    """Pure-JAX reference mirroring the PyTorch forward (weights input-major)."""
    layer1_act = jax.nn.relu(embeddings @ w1 + b1)
    attention = jax.nn.softmax(layer1_act @ w2 + b2, axis=-2)
    return jnp.sum(attention * embeddings, axis=-2)


def center_intersection(embeddings, w1, b1, w2, b2):
    """Module-equivalent forward: embeddings (N, D) -> (D,).

    A single intersection is ~16 KFLOP; pallas_call launch overhead dwarfs the
    work, so this dispatches to plain XLA (per perf review). Batch calls
    through center_intersection_batched to use the kernel.
    """
    return reference_forward(embeddings, w1, b1, w2, b2)


def init_params(key, dim):
    """Init matching nn.Linear + xavier_uniform_; weights stored (D_in, D_out)."""
    k1, k2, k3, k4 = jax.random.split(key, 4)
    a = math.sqrt(6.0 / (dim + dim))          # xavier_uniform_ bound (square layer)
    w1 = jax.random.uniform(k1, (dim, dim), jnp.float32, -a, a)
    w2 = jax.random.uniform(k2, (dim, dim), jnp.float32, -a, a)
    b_bound = 1.0 / math.sqrt(dim)            # nn.Linear default bias init
    b1 = jax.random.uniform(k3, (dim,), jnp.float32, -b_bound, b_bound)
    b2 = jax.random.uniform(k4, (dim,), jnp.float32, -b_bound, b_bound)
    return w1, b1, w2, b2


if __name__ == "__main__":
    key = jax.random.PRNGKey(0)
    dim = 32            # hidden size D
    num_conjuncts = 8   # N embeddings intersected per query
    batch = 64          # B independent intersections

    k_emb, k_param = jax.random.split(key)
    embeddings = jax.random.normal(k_emb, (batch, num_conjuncts, dim), jnp.float32)
    w1, b1, w2, b2 = init_params(k_param, dim)

    # Batched kernel path (auto block_b: single step on 1-TC chips, even grid on 2-TC).
    out = jax.block_until_ready(center_intersection_batched(embeddings, w1, b1, w2, b2))
    ref = reference_forward(embeddings, w1, b1, w2, b2)
    assert out.shape == (batch, dim)
    assert jnp.allclose(out, ref, atol=1e-3, rtol=1e-3), "batched kernel mismatch vs reference"

    # Ragged-N path: exercises the zero-pad + softmax-mask route (N=5 -> padded to 8).
    emb5 = jax.random.normal(jax.random.PRNGKey(1), (16, 5, dim), jnp.float32)
    out5 = jax.block_until_ready(center_intersection_batched(emb5, w1, b1, w2, b2))
    ref5 = reference_forward(emb5, w1, b1, w2, b2)
    assert jnp.allclose(out5, ref5, atol=1e-3, rtol=1e-3), "padded-N kernel mismatch vs reference"

    # Module-style (N, D) -> (D,) call (plain XLA by design for B == 1).
    single = jax.block_until_ready(center_intersection(embeddings[0], w1, b1, w2, b2))
    assert single.shape == (dim,)
    assert jnp.allclose(single, ref[0], atol=1e-3, rtol=1e-3), "single-call mismatch vs reference"

    print("KERNEL_OK")
</pallas_src>

<mosaic_0001>
module attributes {stable_mosaic.version = 11 : i64} {
  func.func @center_intersection_kernel(%arg0: i32, %arg1: memref<64x8x32xf32, #tpu.memory_space<vmem>>, %arg2: memref<32x32xf32, #tpu.memory_space<vmem>>, %arg3: memref<1x32xf32, #tpu.memory_space<vmem>>, %arg4: memref<32x32xf32, #tpu.memory_space<vmem>>, %arg5: memref<1x32xf32, #tpu.memory_space<vmem>>, %arg6: memref<64x32xf32, #tpu.memory_space<vmem>>) attributes {dimension_semantics = [#tpu.dimension_semantics<parallel>], iteration_bounds = array<i64: 1>, scalar_prefetch = 0 : i64, scratch_operands = 0 : i64, tpu.core_type = #tpu.core_type<tc>, window_params = [{transform_indices = @transform_0, window_bounds = array<i64: 64, 8, 32>}, {pipeline_mode = #tpu.pipeline_mode<synchronous>, transform_indices = @transform_1, window_bounds = array<i64: 32, 32>}, {pipeline_mode = #tpu.pipeline_mode<synchronous>, transform_indices = @transform_2, window_bounds = array<i64: 1, 32>}, {pipeline_mode = #tpu.pipeline_mode<synchronous>, transform_indices = @transform_3, window_bounds = array<i64: 32, 32>}, {pipeline_mode = #tpu.pipeline_mode<synchronous>, transform_indices = @transform_4, window_bounds = array<i64: 1, 32>}, {transform_indices = @transform_5, window_bounds = array<i64: 64, 32>}]} {
    %c0 = arith.constant 0 : index
    %c0_0 = arith.constant 0 : index
    %c0_1 = arith.constant 0 : index
    %0 = vector.load %arg1[%c0, %c0_0, %c0_1] : memref<64x8x32xf32, #tpu.memory_space<vmem>>, vector<64x8x32xf32>
    %1 = vector.shape_cast %0 : vector<64x8x32xf32> to vector<512x32xf32>
    %c0_2 = arith.constant 0 : index
    %c0_3 = arith.constant 0 : index
    %2 = vector.load %arg2[%c0_2, %c0_3] : memref<32x32xf32, #tpu.memory_space<vmem>>, vector<32x32xf32>
    %cst = arith.constant dense<0.000000e+00> : vector<512x32xf32>
    %3 = tpu.matmul %1, %2, %cst {dimension_numbers = #tpu.dot_dimension_numbers<[1], [0], [0], [1], [0, 0, 1, 1], [], []>} : vector<512x32xf32>, vector<32x32xf32>, vector<512x32xf32> -> vector<512x32xf32>
    %c0_4 = arith.constant 0 : index
    %c0_5 = arith.constant 0 : index
    %4 = vector.load %arg3[%c0_4, %c0_5] : memref<1x32xf32, #tpu.memory_space<vmem>>, vector<1x32xf32>
    %5 = vector.broadcast %4 : vector<1x32xf32> to vector<512x32xf32>
    %6 = arith.addf %3, %5 : vector<512x32xf32>
    %cst_6 = arith.constant 0.000000e+00 : f32
    %7 = vector.broadcast %cst_6 : f32 to vector<512x32xf32>
    %8 = arith.maximumf %6, %7 : vector<512x32xf32>
    %c0_7 = arith.constant 0 : index
    %c0_8 = arith.constant 0 : index
    %9 = vector.load %arg4[%c0_7, %c0_8] : memref<32x32xf32, #tpu.memory_space<vmem>>, vector<32x32xf32>
    %cst_9 = arith.constant dense<0.000000e+00> : vector<512x32xf32>
    %10 = tpu.matmul %8, %9, %cst_9 {dimension_numbers = #tpu.dot_dimension_numbers<[1], [0], [0], [1], [0, 0, 1, 1], [], []>} : vector<512x32xf32>, vector<32x32xf32>, vector<512x32xf32> -> vector<512x32xf32>
    %c0_10 = arith.constant 0 : index
    %c0_11 = arith.constant 0 : index
    %11 = vector.load %arg5[%c0_10, %c0_11] : memref<1x32xf32, #tpu.memory_space<vmem>>, vector<1x32xf32>
    %12 = vector.broadcast %11 : vector<1x32xf32> to vector<512x32xf32>
    %13 = arith.addf %10, %12 : vector<512x32xf32>
    %14 = vector.shape_cast %13 : vector<512x32xf32> to vector<64x8x32xf32>
    %cst_12 = arith.constant dense<0xFF800000> : vector<64x32xf32>
    %15 = vector.multi_reduction <maximumf>, %14, %cst_12 [1] : vector<64x8x32xf32> to vector<64x32xf32>
    %16 = vector.shape_cast %15 : vector<64x32xf32> to vector<64x1x32xf32>
    %17 = vector.broadcast %16 : vector<64x1x32xf32> to vector<64x8x32xf32>
    %18 = arith.subf %14, %17 : vector<64x8x32xf32>
    %19 = math.exp %18 : vector<64x8x32xf32>
    %cst_13 = arith.constant dense<0.000000e+00> : vector<64x32xf32>
    %20 = vector.multi_reduction <add>, %19, %cst_13 [1] : vector<64x8x32xf32> to vector<64x32xf32>
    %21 = arith.mulf %19, %0 : vector<64x8x32xf32>
    %cst_14 = arith.constant dense<0.000000e+00> : vector<64x32xf32>
    %22 = vector.multi_reduction <add>, %21, %cst_14 [1] : vector<64x8x32xf32> to vector<64x32xf32>
    %23 = arith.divf %22, %20 : vector<64x32xf32>
    %c0_15 = arith.constant 0 : index
    %c0_16 = arith.constant 0 : index
    %24 = vector.load %arg6[%c0_15, %c0_16] : memref<64x32xf32, #tpu.memory_space<vmem>>, vector<64x32xf32>
    tpu.vector_store %arg6[%c0_15, %c0_16], %23 {strides = array<i32>} : memref<64x32xf32, #tpu.memory_space<vmem>>, vector<64x32xf32>,
    return
  }
  func.func @transform_0(%arg0: i32) -> (i32, i32, i32) {
    %c0_i32 = arith.constant 0 : i32
    %c0_i32_0 = arith.constant 0 : i32
    %c0_i32_1 = arith.constant 0 : i32
    return %arg0, %c0_i32, %c0_i32_0 : i32, i32, i32
  }
  func.func @transform_1(%arg0: i32) -> (i32, i32) {
    %c0_i32 = arith.constant 0 : i32
    %c0_i32_0 = arith.constant 0 : i32
    %c0_i32_1 = arith.constant 0 : i32
    return %c0_i32, %c0_i32_0 : i32, i32
  }
  func.func @transform_2(%arg0: i32) -> (i32, i32) {
    %c0_i32 = arith.constant 0 : i32
    %c0_i32_0 = arith.constant 0 : i32
    %c0_i32_1 = arith.constant 0 : i32
    return %c0_i32, %c0_i32_0 : i32, i32
  }
  func.func @transform_3(%arg0: i32) -> (i32, i32) {
    %c0_i32 = arith.constant 0 : i32
    %c0_i32_0 = arith.constant 0 : i32
    %c0_i32_1 = arith.constant 0 : i32
    return %c0_i32, %c0_i32_0 : i32, i32
  }
  func.func @transform_4(%arg0: i32) -> (i32, i32) {
    %c0_i32 = arith.constant 0 : i32
    %c0_i32_0 = arith.constant 0 : i32
    %c0_i32_1 = arith.constant 0 : i32
    return %c0_i32, %c0_i32_0 : i32, i32
  }
  func.func @transform_5(%arg0: i32) -> (i32, i32) {
    %c0_i32 = arith.constant 0 : i32
    %c0_i32_0 = arith.constant 0 : i32
    return %arg0, %c0_i32 : i32, i32
  }
}

</mosaic_0001>

<bundles_post_ra>
// kernel: tpu_custom_call.1
= control target key start
LH: loop header
LB: loop body
LE: loop exit
PB: predicated region body
PF: predicated region fallthrough
CT: control target
= control target key end

     0   :  { %vm92_vm0 = vcmask 261120   ;;  %vm3591_vm9 = vcmask 1041409   ;;  %s7352_s1 = inlined_call_operand.vmem [shape: f32[32,32], index: 1, kind: input, shape index: {}]   ;;  %s7353_s0 = inlined_call_operand.vmem [shape: f32[64,8,32], index: 0, kind: input, shape index: {}]   ;;  %s7354_s2 = inlined_call_operand.vmem [shape: f32[1,32], index: 2, kind: input, shape index: {}]   ;;  %s7355_s3 = inlined_call_operand.vmem [shape: f32[32,32], index: 3, kind: input, shape index: {}]   ;;  %s7356_s4 = inlined_call_operand.vmem [shape: f32[1,32], index: 4, kind: input, shape index: {}]   ;;  %s7357_s5 = inlined_call_operand.vmem [shape: f32[64,32], index: 5, kind: output, shape index: {}]  }
   0x1   :  { %v87_v0 = vld [vmem:[%s7352_s1 + $0x18] sm:$0xff]  ;;  %v86_v1 = vld [vmem:[%s7352_s1 + $0x10] sm:$0xff]  ;;  %v85_v2 = vld [vmem:[%s7352_s1 + $0x8] sm:$0xff] }
   0x2   :  { %297 = vmatpush.msra.mxu0 %v87_v0  ;;  %3802 = vmatpush.msra.mxu2 %v87_v0  ;;  %v84_v3 = vld [vmem:[%s7352_s1] sm:$0xff]  ;;  %v4193_v6 = vld [vmem:[%s7353_s0 + $0x8] sm:$0xff]  ;;  %v4207_v8 = vld [vmem:[%s7353_s0 + $0x10] sm:$0xff] }
   0x3   :  { %v4179_v4 = vld [vmem:[%s7353_s0] sm:$0xff]  ;;  %v4198_v7 = vld [vmem:[%s7353_s0 + $0x108] sm:$0xff]  ;;  %v54_v9 = vld [vmem:[%s7353_s0 + $0x110] sm:$0xff] }
   0x4   :  { %298 = vmatpush.msra.mxu0 %v86_v1  ;;  %3803 = vmatpush.msra.mxu2 %v86_v1  ;;  %v4184_v5 = vld [vmem:[%s7353_s0 + $0x100] sm:$0xff]  ;;  %v23_v10 = vld [vmem:[%s7353_s0 + $0x18] sm:$0xff]  ;;  %v25_v14 = vld [vmem:[%s7353_s0 + $0x28] sm:$0xff] }
   0x5   :  { %v55_v11 = vld [vmem:[%s7353_s0 + $0x118] sm:$0xff]  ;;  %v24_v12 = vld [vmem:[%s7353_s0 + $0x20] sm:$0xff]  ;;  %v57_v15 = vld [vmem:[%s7353_s0 + $0x128] sm:$0xff] }
   0x6   :  { %299 = vmatpush.msra.mxu0 %v85_v2  ;;  %3804 = vmatpush.msra.mxu2 %v85_v2  ;;  %v56_v13 = vld [vmem:[%s7353_s0 + $0x120] sm:$0xff]  ;;  %v26_v16 = vld [vmem:[%s7353_s0 + $0x30] sm:$0xff]  ;;  %v27_v18 = vld [vmem:[%s7353_s0 + $0x38] sm:$0xff] }
   0x7   :  { %v58_v17 = vld [vmem:[%s7353_s0 + $0x130] sm:$0xff]  ;;  %v59_v19 = vld [vmem:[%s7353_s0 + $0x138] sm:$0xff]  ;;  %v28_v20 = vld [vmem:[%s7353_s0 + $0x40] sm:$0xff] }
   0x8   :  { %300 = vmatpush.msra.mxu0 %v84_v3  ;;  %3805 = vmatpush.msra.mxu2 %v84_v3  ;;  %v60_v21 = vld [vmem:[%s7353_s0 + $0x140] sm:$0xff]  ;;  %v29_v22 = vld [vmem:[%s7353_s0 + $0x48] sm:$0xff]  ;;  %v30_v24 = vld [vmem:[%s7353_s0 + $0x50] sm:$0xff] }
   0x9   :  { %3674 = vmatmul.msk.f32.vlgmr.msra.gmra.mxu0 %vm92_vm0, %v4179_v4  ;;  %3706 = vmatmul.msk.f32.vlgmr.msra.gmra.mxu2 %vm92_vm0, %v4184_v5  ;;  %v61_v23 = vld [vmem:[%s7353_s0 + $0x148] sm:$0xff]  ;;  %v62_v25 = vld [vmem:[%s7353_s0 + $0x150] sm:$0xff]  ;;  %v31_v26 = vld [vmem:[%s7353_s0 + $0x58] sm:$0xff] }
   0xa   :  { %v63_v27 = vld [vmem:[%s7353_s0 + $0x158] sm:$0xff]  ;;  %v560_v29 = vld [vmem:[%s7355_s3 + $0x10] sm:$0xff]  ;;  %v32_v30 = vld [vmem:[%s7353_s0 + $0x60] sm:$0xff] }
   0xb   :  { %v561_v28 = vld [vmem:[%s7355_s3 + $0x18] sm:$0xff]  ;;  %v64_v31 = vld [vmem:[%s7353_s0 + $0x160] sm:$0xff]  ;;  %v559_v32 = vld [vmem:[%s7355_s3 + $0x8] sm:$0xff] }
   0xc   :  { %770 = vmatpush.msra.mxu1 %v561_v28  ;;  %3806 = vmatpush.msra.mxu3 %v561_v28  ;;  %v558_v33 = vld [vmem:[%s7355_s3] sm:$0xff]  ;;  %v33_v34 = vld [vmem:[%s7353_s0 + $0x68] sm:$0xff]  ;;  %v34_v36 = vld [vmem:[%s7353_s0 + $0x70] sm:$0xff] }
   0xd   :  { %v65_v35 = vld [vmem:[%s7353_s0 + $0x168] sm:$0xff]  ;;  %v66_v37 = vld [vmem:[%s7353_s0 + $0x170] sm:$0xff]  ;;  %v35_v38 = vld [vmem:[%s7353_s0 + $0x78] sm:$0xff] }
   0xe   :  { %771 = vmatpush.msra.mxu1 %v560_v29  ;;  %3807 = vmatpush.msra.mxu3 %v560_v29  ;;  %v67_v39 = vld [vmem:[%s7353_s0 + $0x178] sm:$0xff]  ;;  %v4334_v40 = vld [vmem:[%s7354_s2] ss:$0 sm:$0xff]  ;;  %v37_v49 = vld [vmem:[%s7353_s0 + $0x88] sm:$0xff] }
   0xf   :  { %v36_v42 = vld [vmem:[%s7353_s0 + $0x80] sm:$0xff]  ;;  %v69_v50 = vld [vmem:[%s7353_s0 + $0x188] sm:$0xff]  ;;  %v38_v57 = vld [vmem:[%s7353_s0 + $0x90] sm:$0xff] }
  0x10   :  { %772 = vmatpush.msra.mxu1 %v559_v32  ;;  %3808 = vmatpush.msra.mxu3 %v559_v32  ;;  %v68_v43 = vld [vmem:[%s7353_s0 + $0x180] sm:$0xff]  ;;  %v70_v58 = vld [vmem:[%s7353_s0 + $0x190] sm:$0xff]  ;;  %v39_v1 = vld [vmem:[%s7353_s0 + $0x98] sm:$0xff] }
  0x11   :  { %3675 = vmatmul.msk.f32.gmra.mxu0 %vm92_vm0, %v4193_v6  ;;  %3707 = vmatmul.msk.f32.gmra.mxu2 %vm92_vm0, %v4198_v7  ;;  %v71_v2 = vld [vmem:[%s7353_s0 + $0x198] sm:$0xff] }
  0x12   :  { %773 = vmatpush.msra.mxu1 %v558_v33  ;;  %3809 = vmatpush.msra.mxu3 %v558_v33 }
  0x19   :  { %3676 = vmatmul.msk.f32.gmra.mxu0 %vm92_vm0, %v4207_v8  ;;  %3708 = vmatmul.msk.f32.gmra.mxu2 %vm92_vm0, %v54_v9 }
  0x21   :  { %3677 = vmatmul.msk.f32.gmra.mxu0 %vm92_vm0, %v23_v10  ;;  %3709 = vmatmul.msk.f32.gmra.mxu2 %vm92_vm0, %v55_v11 }
  0x29   :  { %3678 = vmatmul.msk.f32.gmra.mxu0 %vm92_vm0, %v24_v12  ;;  %3710 = vmatmul.msk.f32.gmra.mxu2 %vm92_vm0, %v56_v13 }
  0x31   :  { %3679 = vmatmul.msk.f32.gmra.mxu0 %vm92_vm0, %v25_v14  ;;  %3711 = vmatmul.msk.f32.gmra.mxu2 %vm92_vm0, %v57_v15  ;;  %v40_v14 = vld [vmem:[%s7353_s0 + $0xa0] sm:$0xff] }
  0x32   :  { %v72_v15 = vld [vmem:[%s7353_s0 + $0x1a0] sm:$0xff] }
  0x39   :  { %3680 = vmatmul.msk.f32.gmra.mxu0 %vm92_vm0, %v26_v16  ;;  %3712 = vmatmul.msk.f32.gmra.mxu2 %vm92_vm0, %v58_v17 }
  0x41   :  { %3681 = vmatmul.msk.f32.gmra.mxu0 %vm92_vm0, %v27_v18  ;;  %3713 = vmatmul.msk.f32.gmra.mxu2 %vm92_vm0, %v59_v19 }
  0x49   :  { %3682 = vmatmul.msk.f32.gmra.mxu0 %vm92_vm0, %v28_v20  ;;  %3714 = vmatmul.msk.f32.gmra.mxu2 %vm92_vm0, %v60_v21 }
  0x51   :  { %3683 = vmatmul.msk.f32.gmra.mxu0 %vm92_vm0, %v29_v22  ;;  %3715 = vmatmul.msk.f32.gmra.mxu2 %vm92_vm0, %v61_v23  ;;  %v41_v22 = vld [vmem:[%s7353_s0 + $0xa8] sm:$0xff] }
  0x52   :  { %v73_v23 = vld [vmem:[%s7353_s0 + $0x1a8] sm:$0xff] }
  0x59   :  { %3684 = vmatmul.msk.f32.gmra.mxu0 %vm92_vm0, %v30_v24  ;;  %3716 = vmatmul.msk.f32.gmra.mxu2 %vm92_vm0, %v62_v25 }
  0x61   :  { %3685 = vmatmul.msk.f32.gmra.mxu0 %vm92_vm0, %v31_v26  ;;  %3717 = vmatmul.msk.f32.gmra.mxu2 %vm92_vm0, %v63_v27 }
  0x69   :  { %3686 = vmatmul.msk.f32.gmra.mxu0 %vm92_vm0, %v32_v30  ;;  %3718 = vmatmul.msk.f32.gmra.mxu2 %vm92_vm0, %v64_v31  ;;  %v42_v30 = vld [vmem:[%s7353_s0 + $0xb0] sm:$0xff] }
  0x6a   :  { %v74_v31 = vld [vmem:[%s7353_s0 + $0x1b0] sm:$0xff] }
  0x71   :  { %3687 = vmatmul.msk.f32.gmra.mxu0 %vm92_vm0, %v33_v34  ;;  %3719 = vmatmul.msk.f32.gmra.mxu2 %vm92_vm0, %v65_v35 }
  0x79   :  { %3688 = vmatmul.msk.f32.gmra.mxu0 %vm92_vm0, %v34_v36  ;;  %3720 = vmatmul.msk.f32.gmra.mxu2 %vm92_vm0, %v66_v37 }
  0x81   :  { %3689 = vmatmul.msk.f32.gmra.mxu0 %vm92_vm0, %v35_v38  ;;  %3721 = vmatmul.msk.f32.gmra.mxu2 %vm92_vm0, %v67_v39  ;;  %v43_v38 = vld [vmem:[%s7353_s0 + $0xb8] sm:$0xff] }
  0x82   :  { %v75_v39 = vld [vmem:[%s7353_s0 + $0x1b8] sm:$0xff] }
  0x86   :  { %v302_v41 = vpop.f32.mrf.mxu0 }
  0x87   :  { %v303_v44 = vadd.f32 %v4334_v40, %v302_v41 }
  0x89   :  { %v494_v45 = vmax.f32 %v303_v44, 0.0  ;;  %3690 = vmatmul.msk.f32.gmra.mxu0 %vm92_vm0, %v36_v42  ;;  %3722 = vmatmul.msk.f32.gmra.mxu2 %vm92_vm0, %v68_v43 }
  0x8b   :  { %3738 = vmatmul.msk.f32.vlgmr.msra.gmra.mxu1 %vm92_vm0, %v494_v45 }
  0x8c   :  { %v398_v46 = vpop.f32.mrf.mxu2 }
  0x8d   :  { %v399_v47 = vadd.f32 %v4334_v40, %v398_v46 }
  0x8e   :  { %v305_v48 = vpop.f32.mrf.mxu0 }
  0x8f   :  { %v526_v51 = vmax.f32 %v399_v47, 0.0  ;;  %v306_v52 = vadd.f32 %v4334_v40, %v305_v48  ;;  %v44_v47 = vld [vmem:[%s7353_s0 + $0xc0] sm:$0xff] }
  0x90   :  { %v76_v48 = vld [vmem:[%s7353_s0 + $0x1c0] sm:$0xff] }
  0x91   :  { %v495_v53 = vmax.f32 %v306_v52, 0.0  ;;  %3691 = vmatmul.msk.f32.gmra.mxu0 %vm92_vm0, %v37_v49  ;;  %3723 = vmatmul.msk.f32.gmra.mxu2 %vm92_vm0, %v69_v50 }
  0x92   :  { %3770 = vmatmul.msk.f32.vlgmr.msra.gmra.mxu3 %vm92_vm0, %v526_v51 }
  0x93   :  { %3739 = vmatmul.msk.f32.gmra.mxu1 %vm92_vm0, %v495_v53 }
  0x94   :  { %v401_v54 = vpop.f32.mrf.mxu2 }
  0x95   :  { %v402_v55 = vadd.f32 %v4334_v40, %v401_v54 }
  0x96   :  { %v308_v56 = vpop.f32.mrf.mxu0 }
  0x97   :  { %v527_v59 = vmax.f32 %v402_v55, 0.0  ;;  %v309_v60 = vadd.f32 %v4334_v40, %v308_v56  ;;  %v45_v55 = vld [vmem:[%s7353_s0 + $0xc8] sm:$0xff] }
  0x98   :  { %v77_v56 = vld [vmem:[%s7353_s0 + $0x1c8] sm:$0xff] }
  0x99   :  { %v496_v61 = vmax.f32 %v309_v60, 0.0  ;;  %3692 = vmatmul.msk.f32.gmra.mxu0 %vm92_vm0, %v38_v57  ;;  %3724 = vmatmul.msk.f32.gmra.mxu2 %vm92_vm0, %v70_v58 }
  0x9a   :  { %3771 = vmatmul.msk.f32.gmra.mxu3 %vm92_vm0, %v527_v59 }
  0x9b   :  { %3740 = vmatmul.msk.f32.gmra.mxu1 %vm92_vm0, %v496_v61 }
  0x9c   :  { %v404_v62 = vpop.f32.mrf.mxu2 }
  0x9d   :  { %v405_v63 = vadd.f32 %v4334_v40, %v404_v62 }
  0x9e   :  { %v311_v0 = vpop.f32.mrf.mxu0 }
  0x9f   :  { %v528_v3 = vmax.f32 %v405_v63, 0.0  ;;  %v312_v9 = vadd.f32 %v4334_v40, %v311_v0  ;;  %v46_v63 = vld [vmem:[%s7353_s0 + $0xd0] sm:$0xff] }
  0xa0   :  { %v78_v0 = vld [vmem:[%s7353_s0 + $0x1d0] sm:$0xff] }
  0xa1   :  { %v497_v10 = vmax.f32 %v312_v9, 0.0  ;;  %3693 = vmatmul.msk.f32.gmra.mxu0 %vm92_vm0, %v39_v1  ;;  %3725 = vmatmul.msk.f32.gmra.mxu2 %vm92_vm0, %v71_v2 }
  0xa2   :  { %3772 = vmatmul.msk.f32.gmra.mxu3 %vm92_vm0, %v528_v3 }
  0xa3   :  { %3741 = vmatmul.msk.f32.gmra.mxu1 %vm92_vm0, %v497_v10 }
  0xa4   :  { %v407_v11 = vpop.f32.mrf.mxu2 }
  0xa5   :  { %v408_v12 = vadd.f32 %v4334_v40, %v407_v11 }
  0xa6   :  { %v314_v13 = vpop.f32.mrf.mxu0 }
  0xa7   :  { %v529_v16 = vmax.f32 %v408_v12, 0.0  ;;  %v315_v17 = vadd.f32 %v4334_v40, %v314_v13  ;;  %v47_v12 = vld [vmem:[%s7353_s0 + $0xd8] sm:$0xff] }
  0xa8   :  { %v79_v13 = vld [vmem:[%s7353_s0 + $0x1d8] sm:$0xff] }
  0xa9   :  { %v498_v18 = vmax.f32 %v315_v17, 0.0  ;;  %3694 = vmatmul.msk.f32.gmra.mxu0 %vm92_vm0, %v40_v14  ;;  %3726 = vmatmul.msk.f32.gmra.mxu2 %vm92_vm0, %v72_v15 }
  0xaa   :  { %3773 = vmatmul.msk.f32.gmra.mxu3 %vm92_vm0, %v529_v16 }
  0xab   :  { %3742 = vmatmul.msk.f32.gmra.mxu1 %vm92_vm0, %v498_v18 }
  0xac   :  { %v410_v19 = vpop.f32.mrf.mxu2 }
  0xad   :  { %v411_v20 = vadd.f32 %v4334_v40, %v410_v19 }
  0xae   :  { %v317_v21 = vpop.f32.mrf.mxu0 }
  0xaf   :  { %v530_v24 = vmax.f32 %v411_v20, 0.0  ;;  %v318_v25 = vadd.f32 %v4334_v40, %v317_v21  ;;  %v48_v20 = vld [vmem:[%s7353_s0 + $0xe0] sm:$0xff] }
  0xb0   :  { %v80_v21 = vld [vmem:[%s7353_s0 + $0x1e0] sm:$0xff] }
  0xb1   :  { %v499_v26 = vmax.f32 %v318_v25, 0.0  ;;  %3695 = vmatmul.msk.f32.gmra.mxu0 %vm92_vm0, %v41_v22  ;;  %3727 = vmatmul.msk.f32.gmra.mxu2 %vm92_vm0, %v73_v23 }
  0xb2   :  { %3774 = vmatmul.msk.f32.gmra.mxu3 %vm92_vm0, %v530_v24 }
  0xb3   :  { %3743 = vmatmul.msk.f32.gmra.mxu1 %vm92_vm0, %v499_v26 }
  0xb4   :  { %v413_v27 = vpop.f32.mrf.mxu2 }
  0xb5   :  { %v414_v28 = vadd.f32 %v4334_v40, %v413_v27 }
  0xb6   :  { %v320_v29 = vpop.f32.mrf.mxu0 }
  0xb7   :  { %v531_v32 = vmax.f32 %v414_v28, 0.0  ;;  %v321_v33 = vadd.f32 %v4334_v40, %v320_v29  ;;  %v49_v28 = vld [vmem:[%s7353_s0 + $0xe8] sm:$0xff] }
  0xb8   :  { %v81_v29 = vld [vmem:[%s7353_s0 + $0x1e8] sm:$0xff] }
  0xb9   :  { %v500_v34 = vmax.f32 %v321_v33, 0.0  ;;  %3696 = vmatmul.msk.f32.gmra.mxu0 %vm92_vm0, %v42_v30  ;;  %3728 = vmatmul.msk.f32.gmra.mxu2 %vm92_vm0, %v74_v31 }
  0xba   :  { %3775 = vmatmul.msk.f32.gmra.mxu3 %vm92_vm0, %v531_v32 }
  0xbb   :  { %3744 = vmatmul.msk.f32.gmra.mxu1 %vm92_vm0, %v500_v34 }
  0xbc   :  { %v416_v35 = vpop.f32.mrf.mxu2 }
  0xbd   :  { %v417_v36 = vadd.f32 %v4334_v40, %v416_v35 }
  0xbe   :  { %v323_v37 = vpop.f32.mrf.mxu0 }
  0xbf   :  { %v532_v41 = vmax.f32 %v417_v36, 0.0  ;;  %v324_v42 = vadd.f32 %v4334_v40, %v323_v37  ;;  %v50_v36 = vld [vmem:[%s7353_s0 + $0xf0] sm:$0xff] }
  0xc0   :  { %v82_v37 = vld [vmem:[%s7353_s0 + $0x1f0] sm:$0xff] }
  0xc1   :  { %v501_v43 = vmax.f32 %v324_v42, 0.0  ;;  %3697 = vmatmul.msk.f32.gmra.mxu0 %vm92_vm0, %v43_v38  ;;  %3729 = vmatmul.msk.f32.gmra.mxu2 %vm92_vm0, %v75_v39 }
  0xc2   :  { %3776 = vmatmul.msk.f32.gmra.mxu3 %vm92_vm0, %v532_v41 }
  0xc3   :  { %3745 = vmatmul.msk.f32.gmra.mxu1 %vm92_vm0, %v501_v43 }
  0xc4   :  { %v419_v44 = vpop.f32.mrf.mxu2 }
  0xc5   :  { %v420_v45 = vadd.f32 %v4334_v40, %v419_v44 }
  0xc6   :  { %v326_v46 = vpop.f32.mrf.mxu0 }
  0xc7   :  { %v533_v49 = vmax.f32 %v420_v45, 0.0  ;;  %v327_v50 = vadd.f32 %v4334_v40, %v326_v46  ;;  %v51_v45 = vld [vmem:[%s7353_s0 + $0xf8] sm:$0xff] }
  0xc8   :  { %v83_v46 = vld [vmem:[%s7353_s0 + $0x1f8] sm:$0xff] }
  0xc9   :  { %v502_v51 = vmax.f32 %v327_v50, 0.0  ;;  %3698 = vmatmul.msk.f32.gmra.mxu0 %vm92_vm0, %v44_v47  ;;  %3730 = vmatmul.msk.f32.gmra.mxu2 %vm92_vm0, %v76_v48 }
  0xca   :  { %3777 = vmatmul.msk.f32.gmra.mxu3 %vm92_vm0, %v533_v49 }
  0xcb   :  { %3746 = vmatmul.msk.f32.gmra.mxu1 %vm92_vm0, %v502_v51 }
  0xcc   :  { %v422_v52 = vpop.f32.mrf.mxu2 }
  0xcd   :  { %v423_v53 = vadd.f32 %v4334_v40, %v422_v52  ;;  %v4530_v52 = vld [vmem:[%s7356_s4] ss:$0 sm:$0xff] }
  0xce   :  { %v329_v54 = vpop.f32.mrf.mxu0 }
  0xcf   :  { %v534_v57 = vmax.f32 %v423_v53, 0.0  ;;  %v330_v58 = vadd.f32 %v4334_v40, %v329_v54 }
  0xd1   :  { %v503_v59 = vmax.f32 %v330_v58, 0.0  ;;  %3699 = vmatmul.msk.f32.gmra.mxu0 %vm92_vm0, %v45_v55  ;;  %3731 = vmatmul.msk.f32.gmra.mxu2 %vm92_vm0, %v77_v56 }
  0xd2   :  { %3778 = vmatmul.msk.f32.gmra.mxu3 %vm92_vm0, %v534_v57 }
  0xd3   :  { %3747 = vmatmul.msk.f32.gmra.mxu1 %vm92_vm0, %v503_v59 }
  0xd4   :  { %v425_v60 = vpop.f32.mrf.mxu2 }
  0xd5   :  { %v426_v61 = vadd.f32 %v4334_v40, %v425_v60 }
  0xd6   :  { %v332_v62 = vpop.f32.mrf.mxu0 }
  0xd7   :  { %v535_v1 = vmax.f32 %v426_v61, 0.0  ;;  %v333_v2 = vadd.f32 %v4334_v40, %v332_v62 }
  0xd9   :  { %v504_v3 = vmax.f32 %v333_v2, 0.0  ;;  %3700 = vmatmul.msk.f32.gmra.mxu0 %vm92_vm0, %v46_v63  ;;  %3732 = vmatmul.msk.f32.gmra.mxu2 %vm92_vm0, %v78_v0 }
  0xda   :  { %3779 = vmatmul.msk.f32.gmra.mxu3 %vm92_vm0, %v535_v1 }
  0xdb   :  { %3748 = vmatmul.msk.f32.gmra.mxu1 %vm92_vm0, %v504_v3 }
  0xdc   :  { %v428_v9 = vpop.f32.mrf.mxu2 }
  0xdd   :  { %v429_v10 = vadd.f32 %v4334_v40, %v428_v9 }
  0xde   :  { %v335_v11 = vpop.f32.mrf.mxu0 }
  0xdf   :  { %v536_v14 = vmax.f32 %v429_v10, 0.0  ;;  %v336_v15 = vadd.f32 %v4334_v40, %v335_v11 }
  0xe1   :  { %v505_v16 = vmax.f32 %v336_v15, 0.0  ;;  %3701 = vmatmul.msk.f32.gmra.mxu0 %vm92_vm0, %v47_v12  ;;  %3733 = vmatmul.msk.f32.gmra.mxu2 %vm92_vm0, %v79_v13 }
  0xe2   :  { %3780 = vmatmul.msk.f32.gmra.mxu3 %vm92_vm0, %v536_v14 }
  0xe3   :  { %3749 = vmatmul.msk.f32.gmra.mxu1 %vm92_vm0, %v505_v16 }
  0xe4   :  { %v431_v17 = vpop.f32.mrf.mxu2 }
  0xe5   :  { %v432_v18 = vadd.f32 %v4334_v40, %v431_v17 }
  0xe6   :  { %v338_v19 = vpop.f32.mrf.mxu0 }
  0xe7   :  { %v537_v22 = vmax.f32 %v432_v18, 0.0  ;;  %v339_v23 = vadd.f32 %v4334_v40, %v338_v19 }
  0xe9   :  { %v506_v24 = vmax.f32 %v339_v23, 0.0  ;;  %3702 = vmatmul.msk.f32.gmra.mxu0 %vm92_vm0, %v48_v20  ;;  %3734 = vmatmul.msk.f32.gmra.mxu2 %vm92_vm0, %v80_v21 }
  0xea   :  { %3781 = vmatmul.msk.f32.gmra.mxu3 %vm92_vm0, %v537_v22 }
  0xeb   :  { %3750 = vmatmul.msk.f32.gmra.mxu1 %vm92_vm0, %v506_v24 }
  0xec   :  { %v434_v25 = vpop.f32.mrf.mxu2 }
  0xed   :  { %v435_v26 = vadd.f32 %v4334_v40, %v434_v25 }
  0xee   :  { %v341_v27 = vpop.f32.mrf.mxu0 }
  0xef   :  { %v538_v30 = vmax.f32 %v435_v26, 0.0  ;;  %v342_v31 = vadd.f32 %v4334_v40, %v341_v27 }
  0xf1   :  { %v507_v32 = vmax.f32 %v342_v31, 0.0  ;;  %3703 = vmatmul.msk.f32.gmra.mxu0 %vm92_vm0, %v49_v28  ;;  %3735 = vmatmul.msk.f32.gmra.mxu2 %vm92_vm0, %v81_v29 }
  0xf2   :  { %3782 = vmatmul.msk.f32.gmra.mxu3 %vm92_vm0, %v538_v30 }
  0xf3   :  { %3751 = vmatmul.msk.f32.gmra.mxu1 %vm92_vm0, %v507_v32 }
  0xf4   :  { %v437_v33 = vpop.f32.mrf.mxu2 }
  0xf5   :  { %v438_v34 = vadd.f32 %v4334_v40, %v437_v33 }
  0xf6   :  { %v344_v35 = vpop.f32.mrf.mxu0 }
  0xf7   :  { %v539_v38 = vmax.f32 %v438_v34, 0.0  ;;  %v345_v39 = vadd.f32 %v4334_v40, %v344_v35 }
  0xf9   :  { %v508_v41 = vmax.f32 %v345_v39, 0.0  ;;  %3704 = vmatmul.msk.f32.gmra.mxu0 %vm92_vm0, %v50_v36  ;;  %3736 = vmatmul.msk.f32.gmra.mxu2 %vm92_vm0, %v82_v37 }
  0xfa   :  { %3783 = vmatmul.msk.f32.gmra.mxu3 %vm92_vm0, %v539_v38 }
  0xfb   :  { %3752 = vmatmul.msk.f32.gmra.mxu1 %vm92_vm0, %v508_v41 }
  0xfc   :  { %v440_v42 = vpop.f32.mrf.mxu2 }
  0xfd   :  { %v441_v43 = vadd.f32 %v4334_v40, %v440_v42 }
  0xfe   :  { %v347_v44 = vpop.f32.mrf.mxu0 }
  0xff   :  { %v540_v47 = vmax.f32 %v441_v43, 0.0  ;;  %v348_v48 = vadd.f32 %v4334_v40, %v347_v44 }
 0x101   :  { %v509_v49 = vmax.f32 %v348_v48, 0.0  ;;  %3705 = vmatmul.msk.f32.gmra.mxu0 %vm92_vm0, %v51_v45  ;;  %3737 = vmatmul.msk.f32.gmra.mxu2 %vm92_vm0, %v83_v46 }
 0x102   :  { %3784 = vmatmul.msk.f32.gmra.mxu3 %vm92_vm0, %v540_v47 }
 0x103   :  { %3753 = vmatmul.msk.f32.gmra.mxu1 %vm92_vm0, %v509_v49 }
 0x104   :  { %v443_v50 = vpop.f32.mrf.mxu2 }
 0x105   :  { %v444_v51 = vadd.f32 %v4334_v40, %v443_v50 }
 0x106   :  { %v350_v53 = vpop.f32.mrf.mxu0 }
 0x107   :  { %v541_v54 = vmax.f32 %v444_v51, 0.0  ;;  %v351_v55 = vadd.f32 %v4334_v40, %v350_v53 }
 0x108   :  { %v775_v56 = vpop.f32.mrf.mxu1 }
 0x109   :  { %v510_v57 = vmax.f32 %v351_v55, 0.0  ;;  %v776_v58 = vadd.f32 %v4530_v52, %v775_v56 }
 0x10a   :  { %3785 = vmatmul.msk.f32.gmra.mxu3 %vm92_vm0, %v541_v54 }
 0x10b   :  { %v967_v59 = vsel %vm92_vm0, %v776_v58, -inf  ;;  %3754 = vmatmul.msk.f32.gmra.mxu1 %vm92_vm0, %v510_v57 }
 0x10c   :  { %v968_v60 = vrot.slane %v967_v59, 4  ;;  %v446_v61 = vpop.f32.mrf.mxu2 }
 0x10d   :  { %v447_v62 = vadd.f32 %v4334_v40, %v446_v61 }
 0x10e   :  { %v969_v63 = vmax.f32 %v967_v59, %v968_v60  ;;  %v353_v0 = vpop.f32.mrf.mxu0 }
 0x10f   :  { %v542_v1 = vmax.f32 %v447_v62, 0.0  ;;  %v354_v2 = vadd.f32 %v4334_v40, %v353_v0 }
 0x110   :  { %v970_v3 = vrot.slane %v969_v63, 2  ;;  %v778_v9 = vpop.f32.mrf.mxu1 }
 0x111   :  { %v511_v10 = vmax.f32 %v354_v2, 0.0  ;;  %v779_v11 = vadd.f32 %v4530_v52, %v778_v9 }
 0x112   :  { %v971_v12 = vmax.f32 %v969_v63, %v970_v3  ;;  %3786 = vmatmul.msk.f32.gmra.mxu3 %vm92_vm0, %v542_v1 }
 0x113   :  { %v974_v13 = vsel %vm92_vm0, %v779_v11, -inf  ;;  %3755 = vmatmul.msk.f32.gmra.mxu1 %vm92_vm0, %v511_v10 }
 0x114   :  { %v972_v14 = vrot.slane %v971_v12, 1  ;;  %v975_v15 = vrot.slane %v974_v13, 4  ;;  %v449_v16 = vpop.f32.mrf.mxu2 }
 0x115   :  { %v450_v17 = vadd.f32 %v4334_v40, %v449_v16  ;;  %v871_v18 = vpop.f32.mrf.mxu3 }
 0x116   :  { %v973_v19 = vmax.f32 %v971_v12, %v972_v14  ;;  %v976_v20 = vmax.f32 %v974_v13, %v975_v15  ;;  %v872_v21 = vadd.f32 %v4530_v52, %v871_v18  ;;  %v356_v22 = vpop.f32.mrf.mxu0 }
 0x117   :  { %v543_v23 = vmax.f32 %v450_v17, 0.0  ;;  %v357_v24 = vadd.f32 %v4334_v40, %v356_v22 }
 0x118   :  { %v1415_v25 = vsub.f32 %v776_v58, %v973_v19  ;;  %v977_v26 = vrot.slane %v976_v20, 2  ;;  %v1191_v27 = vsel %vm92_vm0, %v872_v21, -inf  ;;  %v781_v28 = vpop.f32.mrf.mxu1 }
 0x119   :  { %v1192_v29 = vrot.slane %v1191_v27, 4  ;;  %v512_v30 = vmax.f32 %v357_v24, 0.0  ;;  %v782_v31 = vadd.f32 %v4530_v52, %v781_v28 }
 0x11a   :  { %v1479_v32 = vmul.f32 1.442695, %v1415_v25  ;;  %v978_v33 = vmax.f32 %v976_v20, %v977_v26  ;;  %3787 = vmatmul.msk.f32.gmra.mxu3 %vm92_vm0, %v543_v23 }
 0x11b   :  { %v1193_v34 = vmax.f32 %v1191_v27, %v1192_v29  ;;  %v981_v35 = vsel %vm92_vm0, %v782_v31, -inf  ;;  %3756 = vmatmul.msk.f32.gmra.mxu1 %vm92_vm0, %v512_v30 }
 0x11c   :  { %3812 = vpow2.f32 %v1479_v32  ;;  %v979_v36 = vrot.slane %v978_v33, 1  ;;  %v982_v37 = vrot.slane %v981_v35, 4  ;;  %v452_v38 = vpop.f32.mrf.mxu2 }
 0x11d   :  { %v1194_v39 = vrot.slane %v1193_v34, 2  ;;  %v453_v41 = vadd.f32 %v4334_v40, %v452_v38  ;;  %v874_v42 = vpop.f32.mrf.mxu3 }
 0x11e   :  { %v980_v43 = vmax.f32 %v978_v33, %v979_v36  ;;  %v983_v44 = vmax.f32 %v981_v35, %v982_v37  ;;  %v4553_v45 = vadd.f32 %v4530_v52, %v874_v42  ;;  %v359_v46 = vpop.f32.mrf.mxu0 }
 0x11f   :  { %v1195_v47 = vmax.f32 %v1193_v34, %v1194_v39  ;;  %v544_v48 = vmax.f32 %v453_v41, 0.0  ;;  %v360_v49 = vadd.f32 %v4334_v40, %v359_v46 }
 0x120   :  { %v1416_v50 = vsub.f32 %v779_v11, %v980_v43  ;;  %v984_v51 = vrot.slane %v983_v44, 2  ;;  %v1198_v53 = vsel %vm92_vm0, %v4553_v45, -inf  ;;  %v784_v54 = vpop.f32.mrf.mxu1 }
 0x121   :  { %v1196_v55 = vrot.slane %v1195_v47, 1  ;;  %v1199_v56 = vrot.slane %v1198_v53, 4  ;;  %v513_v57 = vmax.f32 %v360_v49, 0.0  ;;  %v4559_v58 = vadd.f32 %v4530_v52, %v784_v54 }
 0x122   :  { %v3813_v59 = vpop.eup %3812  ;;  %v1481_v60 = vmul.f32 1.442695, %v1416_v50  ;;  %v985_v61 = vmax.f32 %v983_v44, %v984_v51  ;;  %3788 = vmatmul.msk.f32.gmra.mxu3 %vm92_vm0, %v544_v48 }
 0x123   :  { %v1607_v62 = vsel %vm92_vm0, %v3813_v59, 0.0  ;;  %v1197_v63 = vmax.f32 %v1195_v47, %v1196_v55  ;;  %v1200_v0 = vmax.f32 %v1198_v53, %v1199_v56  ;;  %3757 = vmatmul.msk.f32.gmra.mxu1 %vm92_vm0, %v513_v57  ;;  %v988_v11 = vsel %vm92_vm0, %v4559_v58, -inf }
 0x124   :  { %v1608_v1 = vrot.slane %v1607_v62, 4  ;;  %3814 = vpow2.f32 %v1481_v60  ;;  %v986_v2 = vrot.slane %v985_v61, 1  ;;  %v455_v3 = vpop.f32.mrf.mxu2  ;;  %v989_v17 = vrot.slane %v988_v11, 4 }
 0x125   :  { %v1447_v9 = vsub.f32 %v872_v21, %v1197_v63  ;;  %v1201_v10 = vrot.slane %v1200_v0, 2  ;;  %v456_v14 = vadd.f32 %v4334_v40, %v455_v3  ;;  %v2055_v23 = vmul.f32 %v3813_v59, %v4179_v4  ;;  %v877_v36 = vpop.f32.mrf.mxu3 }
 0x126   :  { %v1609_v12 = vadd.f32 %v1608_v1, %v1607_v62  ;;  %v987_v13 = vmax.f32 %v985_v61, %v986_v2  ;;  %v990_v26 = vmax.f32 %v988_v11, %v989_v17  ;;  %v4577_v43 = vadd.f32 %v4530_v52, %v877_v36  ;;  %v362_v11 = vpop.f32.mrf.mxu0 }
 0x127   :  { %v1543_v15 = vmul.f32 1.442695, %v1447_v9  ;;  %v1202_v16 = vmax.f32 %v1200_v0, %v1201_v10  ;;  %v545_v18 = vmax.f32 %v456_v14, 0.0  ;;  %v2119_v30 = vsel %vm92_vm0, %v2055_v23, 0.0 }
 0x128   :  { %v1610_v19 = vrot.slane %v1609_v12, 2  ;;  %v1417_v20 = vsub.f32 %v782_v31, %v987_v13  ;;  %v991_v33 = vrot.slane %v990_v26, 2  ;;  %v2120_v37 = vrot.slane %v2119_v30, 4 }
 0x129   :  { %3816 = vpow2.f32 %v1543_v15  ;;  %v1203_v25 = vrot.slane %v1202_v16, 1  ;;  %v363_v17 = vadd.f32 %v4334_v40, %v362_v11 }
 0x12a   :  { %v3815_v22 = vpop.eup %3814  ;;  %3789 = vmatmul.msk.f32.gmra.mxu3 %vm92_vm0, %v545_v18  ;;  %v1611_v27 = vadd.f32 %v1610_v19, %v1609_v12  ;;  %v1483_v28 = vmul.f32 1.442695, %v1417_v20  ;;  %v992_v39 = vmax.f32 %v990_v26, %v991_v33  ;;  %v2121_v47 = vadd.f32 %v2120_v37, %v2119_v30  ;;  %v787_v30 = vpop.f32.mrf.mxu1 }
 0x12b   :  { %v1614_v21 = vsel %vm92_vm0, %v3815_v22, 0.0  ;;  %v1204_v32 = vmax.f32 %v1202_v16, %v1203_v25  ;;  %v2056_v4 = vmul.f32 %v3815_v22, %v4193_v6  ;;  %v1205_v6 = vsel %vm92_vm0, %v4577_v43, -inf }
 0x12c   :  { %v1615_v24 = vrot.slane %v1614_v21, 4  ;;  %v1612_v34 = vrot.slane %v1611_v27, 1  ;;  %3818 = vpow2.f32 %v1483_v28  ;;  %v993_v51 = vrot.slane %v992_v39, 1  ;;  %v458_v25 = vpop.f32.mrf.mxu2 }
 0x12d   :  { %v1448_v38 = vsub.f32 %v4553_v45, %v1204_v32  ;;  %v2126_v48 = vsel %vm92_vm0, %v2056_v4, 0.0  ;;  %v2122_v55 = vrot.slane %v2121_v47, 2  ;;  %v1206_v60 = vrot.slane %v1205_v6, 4 }
 0x12e   :  { %v1616_v29 = vadd.f32 %v1615_v24, %v1614_v21  ;;  %v4573_v41 = vadd.f32 %v1612_v34, %v1611_v27  ;;  %v2127_v56 = vrot.slane %v2126_v48, 4  ;;  %v994_v59 = vmax.f32 %v992_v39, %v993_v51 }
 0x12f   :  { %v3817_v31 = vpop.eup %3816  ;;  %v1545_v50 = vmul.f32 1.442695, %v1448_v38  ;;  %v2123_v3 = vadd.f32 %v2122_v55, %v2121_v47  ;;  %v1207_v10 = vmax.f32 %v1205_v6, %v1206_v60 }
 0x130   :  { %v1617_v35 = vrot.slane %v1616_v29, 2  ;;  %v1831_v42 = vsel %vm92_vm0, %v3817_v31, 0.0  ;;  %3820 = vrcp.f32 %v4573_v41  ;;  %v2087_v53 = vmul.f32 %v3817_v31, %v4184_v5 }
 0x131   :  { %v1832_v49 = vrot.slane %v1831_v42, 4  ;;  %3822 = vpow2.f32 %v1545_v50  ;;  %v2128_v2 = vadd.f32 %v2127_v56, %v2126_v48  ;;  %v1418_v9 = vsub.f32 %v4559_v58, %v994_v59 }
 0x132   :  { %v1618_v44 = vadd.f32 %v1617_v35, %v1616_v29  ;;  %v3819_v46 = vpop.eup %3818  ;;  %v2343_v63 = vsel %vm92_vm0, %v2087_v53, 0.0  ;;  %v2124_v18 = vrot.slane %v2123_v3, 1  ;;  %v1208_v58 = vrot.slane %v1207_v10, 2 }
 0x133   :  { %v1621_v54 = vsel %vm92_vm0, %v3819_v46, 0.0  ;;  %v1833_v57 = vadd.f32 %v1832_v49, %v1831_v42  ;;  %v2057_v0 = vmul.f32 %v3819_v46, %v4207_v8  ;;  %v2344_v12 = vrot.slane %v2343_v63, 4 }
 0x134   :  { %v1619_v45 = vrot.slane %v1618_v44, 1  ;;  %v1622_v61 = vrot.slane %v1621_v54, 4  ;;  %v2129_v16 = vrot.slane %v2128_v2, 2  ;;  %v1485_v20 = vmul.f32 1.442695, %v1418_v9 }
 0x135   :  { %v1834_v5 = vrot.slane %v1833_v57, 2  ;;  %v2133_v8 = vsel %vm92_vm0, %v2057_v0, 0.0  ;;  %v2345_v22 = vadd.f32 %v2344_v12, %v2343_v63  ;;  %v1209_v27 = vmax.f32 %v1207_v10, %v1208_v58 }
 0x136   :  { %v4585_v62 = vadd.f32 %v1619_v45, %v1618_v44  ;;  %v4589_v1 = vpop.eup %3820  ;;  %v1623_v13 = vadd.f32 %v1622_v61, %v1621_v54  ;;  %v2134_v21 = vrot.slane %v2133_v8, 4  ;;  %v2130_v28 = vadd.f32 %v2129_v16, %v2128_v2  ;;  %v365_v16 = vpop.f32.mrf.mxu0 }
 0x137   :  { %v4592_v14 = vpop.eup %3822  ;;  %v2568_v15 = vmul.f32 %v4589_v1, %v4573_v41  ;;  %v1835_v19 = vadd.f32 %v1834_v5, %v1833_v57  ;;  %v514_v29 = vmax.f32 %v363_v17, 0.0  ;;  %v1210_v31 = vrot.slane %v1209_v27, 1  ;;  %v880_v5 = vpop.f32.mrf.mxu3 }
 0x138   :  { %3824 = vrcp.f32 %v4585_v62  ;;  %v1624_v23 = vrot.slane %v1623_v13, 2  ;;  %v1838_v24 = vsel %vm92_vm0, %v4592_v14, 0.0  ;;  %v459_v35 = vadd.f32 %v4334_v40, %v458_v25  ;;  %v790_v17 = vpop.f32.mrf.mxu1 }
 0x139   :  { %v2569_v26 = vsub.f32 1.0, %v2568_v15  ;;  %3826 = vpow2.f32 %v1485_v20  ;;  %v1836_v33 = vrot.slane %v1835_v19, 1  ;;  %v1839_v34 = vrot.slane %v1838_v24, 4  ;;  %3758 = vmatmul.msk.f32.gmra.mxu1 %vm92_vm0, %v514_v29  ;;  %v461_v29 = vpop.f32.mrf.mxu2 }
 0x13a   :  { %v4604_v36 = vadd.f32 %v2124_v18, %v2123_v3  ;;  %v2346_v37 = vrot.slane %v2345_v22, 2  ;;  %v1625_v4 = vadd.f32 %v1624_v23, %v1623_v13  ;;  %v2135_v38 = vadd.f32 %v2134_v21, %v2133_v8 }
 0x13b   :  { %v2570_v39 = vmul.f32 %v4589_v1, %v2569_v26  ;;  %vm2572_vm1 = vweird.f32 %v4573_v41  ;;  %v2576_v42 = vand.u32 2147483647, %v4573_v41  ;;  %v1211_v44 = vmax.f32 %v1209_v27, %v1210_v31 }
 0x13c   :  { %v2578_v46 = vand.u32 2147483648, %v4573_v41  ;;  %v2131_v47 = vrot.slane %v2130_v28, 1  ;;  %v546_v49 = vmax.f32 %v459_v35, 0.0  ;;  %v2593_v51 = vand.u32 2147483648, %v4585_v62 }
 0x13d   :  { %v4616_v6 = vadd.f32 %v1836_v33, %v1835_v19  ;;  %v1840_v45 = vadd.f32 %v1839_v34, %v1838_v24  ;;  %v4619_v53 = vadd.f32 %v4530_v52, %v787_v30  ;;  %v2347_v54 = vadd.f32 %v2346_v37, %v2345_v22 }
 0x13e   :  { %v4601_v32 = vpop.eup %3824  ;;  %v1626_v55 = vrot.slane %v1625_v4, 1  ;;  %v2136_v56 = vrot.slane %v2135_v38, 2  ;;  %3790 = vmatmul.msk.f32.gmra.mxu3 %vm92_vm0, %v546_v49  ;;  %v2571_v59 = vadd.f32 %v4589_v1, %v2570_v39  ;;  %vm2573_vm2 = vweird.f32 %v4589_v1 }
 0x13f   :  { %v2583_v48 = vmul.f32 %v4601_v32, %v4585_v62  ;;  %v4613_v50 = vpop.eup %3826  ;;  %vm4626_vm3 = vcmp.eq.f32.partialorder %v2576_v42, 8.507059e+37  ;;  %v1449_v61 = vsub.f32 %v4577_v43, %v1211_v44  ;;  %v2579_v63 = vor.u32 1.1754944e-38, %v2578_v46  ;;  %vm4640_vm4 = vmor %vm2572_vm1, %vm2573_vm2 }
 0x140   :  { %v1628_v57 = vsel %vm92_vm0, %v4613_v50, 0.0  ;;  %v4631_v0 = vadd.f32 %v2131_v47, %v2130_v28  ;;  %v2591_v3 = vand.u32 2147483647, %v4585_v62  ;;  %v4634_v9 = vor.u32 1.1754944e-38, %v2593_v51 }
 0x141   :  { %v2584_v2 = vsub.f32 1.0, %v2583_v48  ;;  %v1841_v10 = vrot.slane %v1840_v45, 2  ;;  %v1629_v11 = vrot.slane %v1628_v57, 4  ;;  %v995_v12 = vsel %vm92_vm0, %v4619_v53, -inf }
 0x142   :  { %vm2587_vm5 = vweird.f32 %v4585_v62  ;;  %v2348_v43 = vrot.slane %v2347_v54, 1  ;;  %3828 = vrcp.f32 %v4616_v6  ;;  %v4646_v15 = vadd.f32 %v1626_v55, %v1625_v4 }
 0x143   :  { %v2137_v8 = vadd.f32 %v2136_v56, %v2135_v38  ;;  %v2575_v18 = vsel %vm4640_vm4, %v4589_v1, %v2571_v59  ;;  %v3056_v41 = vand.u32 2147483647, %v4616_v6  ;;  %v1630_v19 = vadd.f32 %v1629_v11, %v1628_v57 }
 0x144   :  { %v1547_v20 = vmul.f32 1.442695, %v1449_v61  ;;  %v2585_v58 = vmul.f32 %v4601_v32, %v2584_v2  ;;  %v3058_v22 = vand.u32 2147483648, %v4616_v6  ;;  %v996_v23 = vrot.slane %v995_v12, 4 }
 0x145   :  { %v4655_v21 = vadd.f32 %v4530_v52, %v880_v5  ;;  %v1842_v24 = vadd.f32 %v1841_v10, %v1840_v45  ;;  %v366_v25 = vadd.f32 %v4334_v40, %v365_v16  ;;  %v4659_v26 = vadd.f32 %v4530_v52, %v790_v17 }
 0x146   :  { %3830 = vpow2.f32 %v1547_v20  ;;  %v2580_v1 = vsel %vm4626_vm3, %v2579_v63, %v2575_v18  ;;  %vm2588_vm6 = vweird.f32 %v4601_v32  ;;  %vm4664_vm7 = vcmp.eq.f32.partialorder %v2591_v3, 8.507059e+37 }
 0x147   :  { %v2138_v28 = vrot.slane %v2137_v8, 1  ;;  %3832 = vrcp.f32 %v4646_v15  ;;  %v1631_v30 = vrot.slane %v1630_v19, 2  ;;  %v997_v33 = vmax.f32 %v995_v12, %v996_v23  ;;  %vm4694_vm8 = vmor %vm2587_vm5, %vm2588_vm6 }
 0x148   :  { %v1212_v34 = vsel %vm92_vm0, %v4655_v21, -inf  ;;  %v515_v31 = vmax.f32 %v366_v25, 0.0  ;;  %v4671_v35 = vpop.eup %3828  ;;  %v2586_v37 = vadd.f32 %v4601_v32, %v2585_v58  ;;  %v2088_v4 = vmul.f32 %v4592_v14, %v4198_v7  ;;  %v883_v14 = vpop.f32.mrf.mxu3 }
 0x149   :  { %v1213_v38 = vrot.slane %v1212_v34, 4  ;;  %v1002_v39 = vsel %vm92_vm0, %v4659_v26, -inf  ;;  %v1843_v42 = vrot.slane %v1842_v24, 1  ;;  %v998_v44 = vrot.slane %v997_v33, 2 }
 0x14a   :  { %v1003_v46 = vrot.slane %v1002_v39, 4  ;;  %3759 = vmatmul.msk.f32.gmra.mxu1 %vm92_vm0, %v515_v31  ;;  %v462_v47 = vadd.f32 %v4334_v40, %v461_v29  ;;  %v4681_v48 = vmul.f32 %v2580_v1, %v4604_v36  ;;  %v4683_v49 = vadd.f32 %v2348_v43, %v2347_v54 }
 0x14b   :  { %v4685_v51 = vor.u32 1.1754944e-38, %v3058_v22  ;;  %v2606_v7 = vand.u32 2147483647, %v4646_v15  ;;  %v3048_v36 = vmul.f32 %v4671_v35, %v4616_v6  ;;  %v1632_v54 = vadd.f32 %v1631_v30, %v1630_v19 }
 0x14c   :  { %v4688_v45 = vpop.eup %3830  ;;  %v999_v56 = vmax.f32 %v997_v33, %v998_v44  ;;  %v547_v57 = vmax.f32 %v462_v47, 0.0  ;;  %v2590_v60 = vsel %vm4694_vm8, %v4601_v32, %v2586_v37  ;;  %v2350_v61 = vsel %vm92_vm0, %v2088_v4, 0.0  ;;  %v4068_v32 = vld [vmem:[%s7353_s0 + $0x18] sm:$0xff] }
 0x14d   :  { %v4700_v59 = vpop.eup %3832  ;;  %v1845_v62 = vsel %vm92_vm0, %v4688_v45, 0.0  ;;  %v1214_v63 = vmax.f32 %v1212_v34, %v1213_v38  ;;  %v4708_v2 = vadd.f32 %v2138_v28, %v2137_v8  ;;  %v4710_v3 = vadd.f32 %v1843_v42, %v1842_v24  ;;  %v368_v8 = vpop.f32.mrf.mxu0 }
 0x14e   :  { %v1004_v5 = vmax.f32 %v1002_v39, %v1003_v46  ;;  %v4713_v10 = vadd.f32 %v4530_v52, %v883_v14  ;;  %3791 = vmatmul.msk.f32.gmra.mxu3 %vm92_vm0, %v547_v57  ;;  %v2608_v11 = vand.u32 2147483648, %v4646_v15  ;;  %v2058_v12 = vmul.f32 %v4068_v32, %v4613_v50  ;;  %v793_v46 = vpop.f32.mrf.mxu1 }
 0x14f   :  { %v1846_v13 = vrot.slane %v1845_v62, 4  ;;  %v1000_v43 = vrot.slane %v999_v56, 1  ;;  %v2595_v16 = vsel %vm4664_vm7, %v4634_v9, %v2590_v60  ;;  %v3049_v17 = vsub.f32 1.0, %v3048_v36 }
 0x150   :  { %v2351_v18 = vrot.slane %v2350_v61, 4  ;;  %v1633_v19 = vrot.slane %v1632_v54, 1  ;;  %vm3053_vm10 = vweird.f32 %v4671_v35  ;;  %v2598_v20 = vmul.f32 %v4700_v59, %v4646_v15 }
 0x151   :  { %v1847_v58 = vadd.f32 %v1846_v13, %v1845_v62  ;;  %v1001_v22 = vmax.f32 %v999_v56, %v1000_v43  ;;  %v1215_v23 = vrot.slane %v1214_v63, 2  ;;  %3834 = vrcp.f32 %v4710_v3 }
 0x152   :  { %v1005_v50 = vrot.slane %v1004_v5, 2  ;;  %v1219_v24 = vsel %vm92_vm0, %v4713_v10, -inf  ;;  %v369_v9 = vadd.f32 %v4334_v40, %v368_v8  ;;  %vm3052_vm11 = vweird.f32 %v4616_v6 }
 0x153   :  { %v2140_v25 = vsel %vm92_vm0, %v2058_v12, 0.0  ;;  %v1848_v1 = vrot.slane %v1847_v58, 2  ;;  %v1419_v27 = vsub.f32 %v4619_v53, %v1001_v22  ;;  %v1216_v28 = vmax.f32 %v1214_v63, %v1215_v23  ;;  %vm4769_vm15 = vmor %vm3052_vm11, %vm3053_vm10 }
 0x154   :  { %v4734_v29 = vadd.f32 %v1633_v19, %v1632_v54  ;;  %v1006_v30 = vmax.f32 %v1004_v5, %v1005_v50  ;;  %v1220_v33 = vrot.slane %v1219_v24, 4  ;;  %v516_v34 = vmax.f32 %v369_v9, 0.0  ;;  %v4070_v50 = vld [vmem:[%s7353_s0 + $0x110] sm:$0xff] }
 0x155   :  { %v3050_v31 = vmul.f32 %v4671_v35, %v3049_v17  ;;  %v2599_v37 = vsub.f32 1.0, %v2598_v20  ;;  %v1849_v4 = vadd.f32 %v1848_v1, %v1847_v58  ;;  %v1487_v38 = vmul.f32 1.442695, %v1419_v27  ;;  %v4782_v17 = vld [vmem:[%s7354_s2] ss:$0 sm:$0xff] }
 0x156   :  { %v2141_v39 = vrot.slane %v2140_v25, 4  ;;  %v1217_v40 = vrot.slane %v1216_v28, 1  ;;  %v1007_v42 = vrot.slane %v1006_v30, 1  ;;  %v1221_v44 = vmax.f32 %v1219_v24, %v1220_v33  ;;  %3760 = vmatmul.msk.f32.gmra.mxu1 %vm92_vm0, %v516_v34 }
 0x157   :  { %v2596_v53 = vmul.f32 %v2595_v16, %v4631_v0  ;;  %vm4741_vm12 = vcmp.eq.f32.partialorder %v3056_v41, 8.507059e+37  ;;  %v2352_v14 = vadd.f32 %v2351_v18, %v2350_v61  ;;  %v1850_v55 = vrot.slane %v1849_v4, 1  ;;  %v4745_v36 = vpop.eup %3834  ;;  %v464_v61 = vpop.f32.mrf.mxu2 }
 0x158   :  { %3836 = vpow2.f32 %v1487_v38  ;;  %vm2602_vm13 = vweird.f32 %v4646_v15  ;;  %v1218_v54 = vmax.f32 %v1216_v28, %v1217_v40  ;;  %v1008_v56 = vmax.f32 %v1006_v30, %v1007_v42  ;;  %v4071_v15 = vld [vmem:[%s7353_s0 + $0x20] sm:$0xff] }
 0x159   :  { %3838 = vrcp.f32 %v4734_v29  ;;  %v1222_v57 = vrot.slane %v1221_v44, 2  ;;  %v3051_v0 = vadd.f32 %v4671_v35, %v3050_v31  ;;  %v2600_v60 = vmul.f32 %v4700_v59, %v2599_v37 }
 0x15a   :  { %v4751_v41 = vadd.f32 %v1850_v55, %v1849_v4  ;;  %v4754_v62 = vadd.f32 %v4530_v52, %v793_v46  ;;  %v2142_v63 = vadd.f32 %v2141_v39, %v2140_v25  ;;  %v1450_v5 = vsub.f32 %v4655_v21, %v1218_v54 }
 0x15b   :  { %v1420_v32 = vsub.f32 %v4659_v26, %v1008_v56  ;;  %v1223_v12 = vmax.f32 %v1221_v44, %v1222_v57  ;;  %v4760_v13 = vsel %vm3591_vm9, %v2596_v53, %v4681_v48  ;;  %vm2603_vm14 = vweird.f32 %v4700_v59 }
 0x15c   :  { %v2609_v43 = vor.u32 1.1754944e-38, %v2608_v11  ;;  %v3063_v8 = vmul.f32 %v4745_v36, %v4710_v3  ;;  %vm4775_vm1 = vcmp.eq.f32.partialorder %v2606_v7, 8.507059e+37  ;;  %v2353_v26 = vrot.slane %v2352_v14, 2  ;;  %vm4806_vm2 = vmor %vm2602_vm13, %vm2603_vm14 }
 0x15d   :  { %v1549_v48 = vmul.f32 1.442695, %v1450_v5  ;;  %v1489_v11 = vmul.f32 1.442695, %v1420_v32  ;;  %v465_v6 = vadd.f32 %v4782_v17, %v464_v61  ;;  %v3055_v19 = vsel %vm4769_vm15, %v4671_v35, %v3051_v0 }
 0x15e   :  { %v3837_v18 = vpop.eup %3836  ;;  %3840 = vrcp.f32 %v4751_v41  ;;  %v1224_v7 = vrot.slane %v1223_v12, 1  ;;  %v1009_v20 = vsel %vm92_vm0, %v4754_v62, -inf  ;;  %v2601_v22 = vadd.f32 %v4700_v59, %v2600_v60 }
 0x15f   :  { %v4791_v58 = vpop.eup %3838  ;;  %v2143_v23 = vrot.slane %v2142_v63, 2  ;;  %v2089_v24 = vmul.f32 %v4070_v50, %v4688_v45  ;;  %v1635_v9 = vsel %vm92_vm0, %v3837_v18, 0.0  ;;  %v3064_v35 = vsub.f32 1.0, %v3063_v8 }
 0x160   :  { %v1636_v25 = vrot.slane %v1635_v9, 4  ;;  %3842 = vpow2.f32 %v1549_v48  ;;  %v1225_v1 = vmax.f32 %v1223_v12, %v1224_v7  ;;  %v3060_v27 = vsel %vm4741_vm12, %v4685_v51, %v3055_v19 }
 0x161   :  { %3844 = vpow2.f32 %v1489_v11  ;;  %v1010_v28 = vrot.slane %v1009_v20, 4  ;;  %v548_v30 = vmax.f32 %v465_v6, 0.0  ;;  %v2354_v45 = vadd.f32 %v2353_v26, %v2352_v14  ;;  %v886_v6 = vpop.f32.mrf.mxu3 }
 0x162   :  { %v2613_v34 = vmul.f32 %v4791_v58, %v4734_v29  ;;  %v1637_v31 = vadd.f32 %v1636_v25, %v1635_v9  ;;  %v1451_v37 = vsub.f32 %v4713_v10, %v1225_v1  ;;  %v2605_v51 = vsel %vm4806_vm2, %v4700_v59, %v2601_v22 }
 0x163   :  { %v2144_v4 = vadd.f32 %v2143_v23, %v2142_v63  ;;  %v2357_v38 = vsel %vm92_vm0, %v2089_v24, 0.0  ;;  %v2059_v39 = vmul.f32 %v4071_v15, %v3837_v18  ;;  %3792 = vmatmul.msk.f32.gmra.mxu3 %vm92_vm0, %v548_v30  ;;  %v3065_v42 = vmul.f32 %v4745_v36, %v3064_v35 }
 0x164   :  { %v4821_v40 = vpop.eup %3840  ;;  %vm3067_vm3 = vweird.f32 %v4710_v3  ;;  %v1638_v10 = vrot.slane %v1637_v31, 2  ;;  %v1551_v44 = vmul.f32 1.442695, %v1451_v37  ;;  %v4826_v59 = vmul.f32 %v3060_v27, %v4683_v49 }
 0x165   :  { %v3071_v46 = vand.u32 2147483647, %v4710_v3  ;;  %v3073_v53 = vand.u32 2147483648, %v4710_v3  ;;  %v1011_v47 = vmax.f32 %v1009_v20, %v1010_v28  ;;  %v2610_v55 = vsel %vm4775_vm1, %v2609_v43, %v2605_v51 }
 0x166   :  { %v3843_v14 = vpop.eup %3842  ;;  %v2355_v54 = vrot.slane %v2354_v45, 1  ;;  %v2614_v56 = vsub.f32 1.0, %v2613_v34  ;;  %v2358_v57 = vrot.slane %v2357_v38, 4  ;;  %v2145_v60 = vrot.slane %v2144_v4, 1 }
 0x167   :  { %v3845_v0 = vpop.eup %3844  ;;  %v3078_v61 = vmul.f32 %v4821_v40, %v4751_v41  ;;  %v2147_v49 = vsel %vm92_vm0, %v2059_v39, 0.0  ;;  %3846 = vpow2.f32 %v1551_v44  ;;  %v3066_v63 = vadd.f32 %v4745_v36, %v3065_v42 }
 0x168   :  { %vm3068_vm4 = vweird.f32 %v4745_v36  ;;  %v1639_v5 = vadd.f32 %v1638_v10, %v1637_v31  ;;  %v1852_v32 = vsel %vm92_vm0, %v3843_v14, 0.0  ;;  %vm4838_vm5 = vcmp.eq.f32.partialorder %v3071_v46, 8.507059e+37 }
 0x169   :  { %v3074_v43 = vor.u32 1.1754944e-38, %v3073_v53  ;;  %v1642_v8 = vsel %vm92_vm0, %v3845_v0, 0.0  ;;  %v1012_v16 = vrot.slane %v1011_v47, 2  ;;  %v2356_v21 = vadd.f32 %v2355_v54, %v2354_v45  ;;  %vm4849_vm6 = vmor %vm3067_vm3, %vm3068_vm4  ;;  %v4073_v53 = vld [vmem:[%s7353_s0 + $0x28] sm:$0xff] }
 0x16a   :  { %v2615_v26 = vmul.f32 %v4791_v58, %v2614_v56  ;;  %v2359_v48 = vadd.f32 %v2358_v57, %v2357_v38  ;;  %v2148_v11 = vrot.slane %v2147_v49, 4  ;;  %v4845_v18 = vmul.f32 %v2610_v55, %v4708_v2  ;;  %v4072_v2 = vld [vmem:[%s7353_s0 + $0x118] sm:$0xff]  ;;  %v371_v56 = vpop.f32.mrf.mxu0 }
 0x16b   :  { %v4853_v7 = vadd.f32 %v2145_v60, %v2144_v4  ;;  %v3079_v20 = vsub.f32 1.0, %v3078_v61  ;;  %v1853_v22 = vrot.slane %v1852_v32, 4  ;;  %v3070_v23 = vsel %vm4849_vm6, %v4745_v36, %v3066_v63 }
 0x16c   :  { %v1640_v50 = vrot.slane %v1639_v5, 1  ;;  %v2090_v24 = vmul.f32 %v4072_v2, %v3843_v14  ;;  %v1643_v9 = vrot.slane %v1642_v8, 4  ;;  %v2621_v35 = vand.u32 2147483647, %v4734_v29 }
 0x16d   :  { %v4861_v3 = vpop.eup %3846  ;;  %v2623_v25 = vand.u32 2147483648, %v4734_v29  ;;  %v1013_v1 = vmax.f32 %v1011_v47, %v1012_v16  ;;  %v4866_v27 = vadd.f32 %v4530_v52, %v886_v6  ;;  %v2616_v28 = vadd.f32 %v4791_v58, %v2615_v26 }
 0x16e   :  { %vm2618_vm7 = vweird.f32 %v4791_v58  ;;  %v2360_v36 = vrot.slane %v2359_v48, 2  ;;  %v2149_v30 = vadd.f32 %v2148_v11, %v2147_v49  ;;  %v3075_v33 = vsel %vm4838_vm5, %v3074_v43, %v3070_v23 }
 0x16f   :  { %vm2617_vm8 = vweird.f32 %v4734_v29  ;;  %v3080_v45 = vmul.f32 %v4821_v40, %v3079_v20  ;;  %v1854_v34 = vadd.f32 %v1853_v22, %v1852_v32  ;;  %v4874_v31 = vadd.f32 %v1640_v50, %v1639_v5 }
 0x170   :  { %v2364_v37 = vsel %vm92_vm0, %v2090_v24, 0.0  ;;  %v1644_v51 = vadd.f32 %v1643_v9, %v1642_v8  ;;  %v1859_v4 = vsel %vm92_vm0, %v4861_v3, 0.0  ;;  %vm4879_vm10 = vmor %vm2617_vm8, %vm2618_vm7  ;;  %vm4883_vm11 = vcmp.eq.f32.partialorder %v2621_v35, 8.507059e+37 }
 0x171   :  { %v2624_v29 = vor.u32 1.1754944e-38, %v2623_v25  ;;  %v1014_v39 = vrot.slane %v1013_v1, 1  ;;  %v1226_v42 = vsel %vm92_vm0, %v4866_v27, -inf  ;;  %vm3593_vm12 = vcmask 1042434  }
 0x172   :  { %v2620_v10 = vsel %vm4879_vm10, %v4791_v58, %v2616_v28  ;;  %v2361_v44 = vadd.f32 %v2360_v36, %v2359_v48  ;;  %v2150_v46 = vrot.slane %v2149_v30, 2  ;;  %v2060_v47 = vmul.f32 %v4073_v53, %v3845_v0  ;;  %v796_v48 = vpop.f32.mrf.mxu1 }
 0x173   :  { %vm3595_vm13 = vcmask 1043459   ;;  %vm3083_vm14 = vweird.f32 %v4821_v40  ;;  %v1855_v14 = vrot.slane %v1854_v34, 2  ;;  %v2365_v55 = vrot.slane %v2364_v37, 4 }
 0x174   :  { %v1860_v54 = vrot.slane %v1859_v4, 4  ;;  %v3081_v57 = vadd.f32 %v4821_v40, %v3080_v45  ;;  %3848 = vrcp.f32 %v4874_v31  ;;  %v1645_v60 = vrot.slane %v1644_v51, 2 }
 0x175   :  { %v1227_v58 = vrot.slane %v1226_v42, 4  ;;  %v3076_v61 = vmul.f32 %v3075_v33, %v2356_v21  ;;  %v3086_v49 = vand.u32 2147483647, %v4751_v41  ;;  %v3088_v63 = vand.u32 2147483648, %v4751_v41 }
 0x176   :  { %v1015_v5 = vmax.f32 %v1013_v1, %v1014_v39  ;;  %vm3082_vm15 = vweird.f32 %v4751_v41  ;;  %v2151_v0 = vadd.f32 %v2150_v46, %v2149_v30  ;;  %v2154_v32 = vsel %vm92_vm0, %v2060_v47, 0.0 }
 0x177   :  { %v372_v12 = vadd.f32 %v4782_v17, %v371_v56  ;;  %v2625_v43 = vsel %vm4883_vm11, %v2624_v29, %v2620_v10  ;;  %vm4907_vm1 = vmor %vm3082_vm15, %vm3083_vm14  ;;  %v1856_v16 = vadd.f32 %v1855_v14, %v1854_v34  ;;  %v2366_v21 = vadd.f32 %v2365_v55, %v2364_v37  ;;  %v889_v10 = vpop.f32.mrf.mxu3 }
 0x178   :  { %v1861_v26 = vadd.f32 %v1860_v54, %v1859_v4  ;;  %v2362_v11 = vrot.slane %v2361_v44, 1  ;;  %v3085_v41 = vsel %vm4907_vm1, %v4821_v40, %v3081_v57  ;;  %v1646_v6 = vadd.f32 %v1645_v60, %v1644_v51 }
 0x179   :  { %v1228_v19 = vmax.f32 %v1226_v42, %v1227_v58  ;;  %vm3087_vm2 = vcmp.eq.f32.partialorder %v3086_v49, 8.507059e+37  ;;  %v3089_v20 = vor.u32 1.1754944e-38, %v3088_v63  ;;  %v2155_v22 = vrot.slane %v2154_v32, 4  ;;  %v467_v42 = vpop.f32.mrf.mxu2 }
 0x17a   :  { %v1421_v23 = vsub.f32 %v4754_v62, %v1015_v5  ;;  %v4915_v50 = vpop.eup %3848  ;;  %v2626_v2 = vmul.f32 %v2625_v43, %v4853_v7  ;;  %v2152_v24 = vrot.slane %v2151_v0, 1  ;;  %v517_v9 = vmax.f32 %v372_v12, 0.0 }
 0x17b   :  { %v4919_v35 = vadd.f32 %v4530_v52, %v796_v48  ;;  %v3090_v25 = vsel %vm3087_vm2, %v3089_v20, %v3085_v41  ;;  %v1857_v1 = vrot.slane %v1856_v16, 1  ;;  %v2367_v28 = vrot.slane %v2366_v21, 2 }
 0x17c   :  { %v1862_v40 = vrot.slane %v1861_v26, 2  ;;  %v2363_v36 = vadd.f32 %v2362_v11, %v2361_v44  ;;  %v1647_v30 = vrot.slane %v1646_v6, 1  ;;  %v1491_v33 = vmul.f32 1.442695, %v1421_v23  ;;  %3761 = vmatmul.msk.f32.gmra.mxu1 %vm92_vm0, %v517_v9 }
 0x17d   :  { %v1229_v45 = vrot.slane %v1228_v19, 2  ;;  %v3594_v62 = vsel %vm3593_vm12, %v4845_v18, %v4760_v13  ;;  %v3626_v7 = vsel %vm3591_vm9, %v3076_v61, %v4826_v59  ;;  %v2628_v34 = vmul.f32 %v4915_v50, %v4874_v31  ;;  %v4074_v59 = vld [vmem:[%s7353_s0 + $0x120] sm:$0xff] }
 0x17e   :  { %v2156_v37 = vadd.f32 %v2155_v22, %v2154_v32  ;;  %v4930_v51 = vsel %vm3595_vm13, %v2626_v2, %v3594_v62  ;;  %v3091_v4 = vmul.f32 %v3090_v25, %v2363_v36  ;;  %v4932_v38 = vadd.f32 %v2152_v24, %v2151_v0  ;;  %v374_v32 = vpop.f32.mrf.mxu0 }
 0x17f   :  { %v1016_v15 = vsel %vm92_vm0, %v4919_v35, -inf  ;;  %v4936_v29 = vadd.f32 %v1857_v1, %v1856_v16  ;;  %v2368_v39 = vadd.f32 %v2367_v28, %v2366_v21  ;;  %v1863_v13 = vadd.f32 %v1862_v40, %v1861_v26 }
 0x180   :  { %v2091_v18 = vmul.f32 %v4074_v59, %v4861_v3  ;;  %v2636_v44 = vand.u32 2147483647, %v4874_v31  ;;  %v4943_v46 = vadd.f32 %v1647_v30, %v1646_v6  ;;  %3850 = vpow2.f32 %v1491_v33 }
 0x181   :  { %v1230_v53 = vmax.f32 %v1228_v19, %v1229_v45  ;;  %v2629_v47 = vsub.f32 1.0, %v2628_v34  ;;  %v2638_v14 = vand.u32 2147483648, %v4874_v31  ;;  %v2157_v55 = vrot.slane %v2156_v37, 2  ;;  %v470_v40 = vpop.f32.mrf.mxu2 }
 0x182   :  { %v1017_v54 = vrot.slane %v1016_v15, 4  ;;  %v4947_v56 = vsel %vm3593_vm12, %v3091_v4, %v3626_v7  ;;  %v468_v60 = vadd.f32 %v4782_v17, %v467_v42  ;;  %v4951_v3 = vadd.f32 %v4530_v52, %v889_v10  ;;  %v892_v7 = vpop.f32.mrf.mxu3  ;;  %v4990_v4 = vld [vmem:[%s7356_s4] ss:$0 sm:$0xff] }
 0x183   :  { %v1231_v57 = vrot.slane %v1230_v53, 1  ;;  %v2369_v58 = vrot.slane %v2368_v39, 1  ;;  %3852 = vrcp.f32 %v4936_v29  ;;  %v1864_v61 = vrot.slane %v1863_v13, 1 }
 0x184   :  { %v2371_v49 = vsel %vm92_vm0, %v2091_v18, 0.0  ;;  %vm2632_vm3 = vweird.f32 %v4874_v31  ;;  %3854 = vrcp.f32 %v4943_v46  ;;  %v1018_v5 = vmax.f32 %v1016_v15, %v1017_v54 }
 0x185   :  { %v1232_v63 = vmax.f32 %v1230_v53, %v1231_v57  ;;  %v549_v0 = vmax.f32 %v468_v60, 0.0  ;;  %v2630_v12 = vmul.f32 %v4915_v50, %v2629_v47  ;;  %vm2633_vm4 = vweird.f32 %v4915_v50 }
 0x186   :  { %v4959_v52 = vor.u32 1.1754944e-38, %v2638_v14  ;;  %v2158_v43 = vadd.f32 %v2157_v55, %v2156_v37  ;;  %v4961_v8 = vpop.eup %3850  ;;  %v3101_v16 = vand.u32 2147483647, %v4936_v29  ;;  %v2372_v21 = vrot.slane %v2371_v49, 4  ;;  %vm5002_vm6 = vmor %vm2632_vm3, %vm2633_vm4 }
 0x187   :  { %v1452_v26 = vsub.f32 %v4866_v27, %v1232_v63  ;;  %v1233_v48 = vsel %vm92_vm0, %v4951_v3, -inf  ;;  %3793 = vmatmul.msk.f32.gmra.mxu3 %vm92_vm0, %v549_v0  ;;  %v4968_v11 = vadd.f32 %v2369_v58, %v2368_v39  ;;  %v4970_v41 = vadd.f32 %v1864_v61, %v1863_v13  ;;  %v799_v27 = vpop.f32.mrf.mxu1 }
 0x188   :  { %v1649_v6 = vsel %vm92_vm0, %v4961_v8, 0.0  ;;  %v375_v19 = vadd.f32 %v4782_v17, %v374_v32  ;;  %v3103_v20 = vand.u32 2147483648, %v4936_v29  ;;  %v1019_v2 = vrot.slane %v1018_v5, 2 }
 0x189   :  { %v1650_v22 = vrot.slane %v1649_v6, 4  ;;  %v1553_v23 = vmul.f32 1.442695, %v1452_v26  ;;  %v4976_v24 = vpop.eup %3852  ;;  %v2631_v9 = vadd.f32 %v4915_v50, %v2630_v12  ;;  %v2159_v25 = vrot.slane %v2158_v43, 1 }
 0x18a   :  { %v2651_v1 = vand.u32 2147483647, %v4943_v46  ;;  %v1234_v28 = vrot.slane %v1233_v48, 4  ;;  %v4980_v36 = vpop.eup %3854  ;;  %vm4982_vm5 = vcmp.eq.f32.partialorder %v2636_v44, 8.507059e+37  ;;  %v2373_v33 = vadd.f32 %v2372_v21, %v2371_v49 }
 0x18b   :  { %v1651_v45 = vadd.f32 %v1650_v22, %v1649_v6  ;;  %3856 = vpow2.f32 %v1553_v23  ;;  %v1020_v62 = vmax.f32 %v1018_v5, %v1019_v2  ;;  %v518_v37 = vmax.f32 %v375_v19, 0.0 }
 0x18c   :  { %3858 = vrcp.f32 %v4970_v41  ;;  %v1235_v34 = vmax.f32 %v1233_v48, %v1234_v28  ;;  %v4993_v15 = vadd.f32 %v4990_v4, %v799_v27  ;;  %v3093_v39 = vmul.f32 %v4976_v24, %v4936_v29  ;;  %v377_v28 = vpop.f32.mrf.mxu0 }
 0x18d   :  { %v1652_v13 = vrot.slane %v1651_v45, 2  ;;  %v1021_v59 = vrot.slane %v1020_v62, 1  ;;  %v471_v18 = vadd.f32 %v4782_v17, %v470_v40  ;;  %v5006_v10 = vor.u32 1.1754944e-38, %v3103_v20  ;;  %3762 = vmatmul.msk.f32.gmra.mxu1 %vm92_vm0, %v518_v37 }
 0x18e   :  { %v2643_v44 = vmul.f32 %v4980_v36, %v4943_v46  ;;  %v1236_v53 = vrot.slane %v1235_v34, 2  ;;  %v5012_v47 = vadd.f32 %v4990_v4, %v892_v7  ;;  %v2635_v14 = vsel %vm5002_vm6, %v4915_v50, %v2631_v9 }
 0x18f   :  { %v2653_v31 = vand.u32 2147483648, %v4943_v46  ;;  %v1653_v55 = vadd.f32 %v1652_v13, %v1651_v45  ;;  %v1022_v54 = vmax.f32 %v1020_v62, %v1021_v59  ;;  %v2374_v57 = vrot.slane %v2373_v33, 2  ;;  %v802_v42 = vpop.f32.mrf.mxu1 }
 0x190   :  { %v1237_v60 = vmax.f32 %v1235_v34, %v1236_v53  ;;  %v1023_v58 = vsel %vm92_vm0, %v4993_v15, -inf  ;;  %v550_v61 = vmax.f32 %v471_v18, 0.0  ;;  %vm3597_vm7 = vcmask 1044484  }
 0x191   :  { %v3857_v49 = vpop.eup %3856  ;;  %v3094_v63 = vsub.f32 1.0, %v3093_v39  ;;  %v1654_v5 = vrot.slane %v1653_v55, 1  ;;  %v1422_v0 = vsub.f32 %v4919_v35, %v1022_v54  ;;  %v1240_v32 = vsel %vm92_vm0, %v5012_v47, -inf }
 0x192   :  { %v5023_v50 = vpop.eup %3858  ;;  %v5025_v12 = vadd.f32 %v2159_v25, %v2158_v43  ;;  %v2644_v21 = vsub.f32 1.0, %v2643_v44  ;;  %v1866_v26 = vsel %vm92_vm0, %v3857_v49, 0.0  ;;  %v1238_v48 = vrot.slane %v1237_v60, 1  ;;  %3794 = vmatmul.msk.f32.gmra.mxu3 %vm92_vm0, %v550_v61 }
 0x193   :  { %vm3097_vm8 = vweird.f32 %v4936_v29  ;;  %v5030_v6 = vadd.f32 %v1654_v5, %v1653_v55  ;;  %v1867_v19 = vrot.slane %v1866_v26, 4  ;;  %v1493_v20 = vmul.f32 1.442695, %v1422_v0 }
 0x194   :  { %v1024_v35 = vrot.slane %v1023_v58, 4  ;;  %v2640_v22 = vsel %vm4982_vm5, %v4959_v52, %v2635_v14  ;;  %v5035_v23 = vor.u32 1.1754944e-38, %v2653_v31  ;;  %v1239_v43 = vmax.f32 %v1237_v60, %v1238_v48  ;;  %v4076_v52 = vld [vmem:[%s7353_s0 + $0x30] sm:$0xff] }
 0x195   :  { %v1241_v2 = vrot.slane %v1240_v32, 4  ;;  %v3095_v27 = vmul.f32 %v4976_v24, %v3094_v63  ;;  %vm3098_vm10 = vweird.f32 %v4976_v24  ;;  %vm2647_vm11 = vweird.f32 %v4943_v46 }
 0x196   :  { %v2375_v9 = vadd.f32 %v2374_v57, %v2373_v33  ;;  %v3108_v25 = vmul.f32 %v5023_v50, %v4970_v41  ;;  %v2645_v40 = vmul.f32 %v4980_v36, %v2644_v21  ;;  %v2061_v30 = vmul.f32 %v4076_v52, %v4961_v8  ;;  %vm5080_vm3 = vmor %vm3097_vm8, %vm3098_vm10 }
 0x197   :  { %v1868_v45 = vadd.f32 %v1867_v19, %v1866_v26  ;;  %3860 = vpow2.f32 %v1493_v20  ;;  %vm5049_vm14 = vcmp.eq.f32.partialorder %v3101_v16, 8.507059e+37  ;;  %v1453_v33 = vsub.f32 %v4951_v3, %v1239_v43 }
 0x198   :  { %3862 = vrcp.f32 %v5030_v6  ;;  %v1025_v7 = vmax.f32 %v1023_v58, %v1024_v35  ;;  %v1242_v34 = vmax.f32 %v1240_v32, %v1241_v2  ;;  %v2641_v37 = vmul.f32 %v2640_v22, %v4932_v38  ;;  %v4078_v22 = vld [vmem:[%s7353_s0 + $0x38] sm:$0xff] }
 0x199   :  { %vm2648_vm15 = vweird.f32 %v4980_v36  ;;  %v1869_v39 = vrot.slane %v1868_v45, 2  ;;  %v378_v8 = vadd.f32 %v4782_v17, %v377_v28  ;;  %v3096_v13 = vadd.f32 %v4976_v24, %v3095_v27 }
 0x19a   :  { %vm5061_vm1 = vcmp.eq.f32.partialorder %v2651_v1, 8.507059e+37  ;;  %v3109_v59 = vsub.f32 1.0, %v3108_v25  ;;  %v3118_v3 = vand.u32 2147483648, %v4970_v41  ;;  %v1555_v18 = vmul.f32 1.442695, %v1453_v33  ;;  %v4077_v1 = vld [vmem:[%s7353_s0 + $0x128] sm:$0xff]  ;;  %vm5100_vm4 = vmor %vm2647_vm11, %vm2648_vm15 }
 0x19b   :  { %v2376_v44 = vrot.slane %v2375_v9, 1  ;;  %v2161_v38 = vsel %vm92_vm0, %v2061_v30, 0.0  ;;  %v1243_v53 = vrot.slane %v1242_v34, 2  ;;  %v519_v14 = vmax.f32 %v378_v8, 0.0  ;;  %v473_v8 = vpop.f32.mrf.mxu2 }
 0x19c   :  { %v2646_v31 = vadd.f32 %v4980_v36, %v2645_v40  ;;  %vm3112_vm2 = vweird.f32 %v4970_v41  ;;  %v2092_v55 = vmul.f32 %v4077_v1, %v3857_v49  ;;  %3864 = vpow2.f32 %v1555_v18 }
 0x19d   :  { %v1026_v54 = vrot.slane %v1025_v7, 2  ;;  %v3861_v57 = vpop.eup %3860  ;;  %v5074_v60 = vsel %vm3597_vm7, %v2641_v37, %v4930_v51  ;;  %v3116_v61 = vand.u32 2147483647, %v4970_v41  ;;  %v1870_v63 = vadd.f32 %v1869_v39, %v1868_v45  ;;  %3763 = vmatmul.msk.f32.gmra.mxu1 %vm92_vm0, %v519_v14 }
 0x19e   :  { %v5086_v49 = vadd.f32 %v4990_v4, %v802_v42  ;;  %v5089_v5 = vpop.eup %3862  ;;  %v3100_v51 = vsel %vm5080_vm3, %v4976_v24, %v3096_v13  ;;  %v3110_v29 = vmul.f32 %v5023_v50, %v3109_v59  ;;  %v2162_v0 = vrot.slane %v2161_v38, 4 }
 0x19f   :  { %v1656_v32 = vsel %vm92_vm0, %v3861_v57, 0.0  ;;  %v5104_v26 = vadd.f32 %v2376_v44, %v2375_v9  ;;  %v3119_v48 = vor.u32 1.1754944e-38, %v3118_v3  ;;  %v1244_v20 = vmax.f32 %v1242_v34, %v1243_v53 }
 0x1a0   :  { %v1657_v19 = vrot.slane %v1656_v32, 4  ;;  %v2650_v24 = vsel %vm5100_vm4, %v4980_v36, %v2646_v31  ;;  %v2378_v35 = vsel %vm92_vm0, %v2092_v55, 0.0  ;;  %v2062_v46 = vmul.f32 %v4078_v22, %v3861_v57 }
 0x1a1   :  { %v1027_v43 = vmax.f32 %v1025_v7, %v1026_v54  ;;  %v3105_v2 = vsel %vm5049_vm14, %v5006_v10, %v3100_v51  ;;  %vm5116_vm5 = vcmp.eq.f32.partialorder %v3116_v61, 8.507059e+37  ;;  %v2658_v9 = vmul.f32 %v5089_v5, %v5030_v6  ;;  %v4079_v51 = vld [vmem:[%s7353_s0 + $0x130] sm:$0xff] }
 0x1a2   :  { %v1871_v36 = vrot.slane %v1870_v63, 1  ;;  %v1030_v25 = vsel %vm92_vm0, %v5086_v49, -inf  ;;  %v3865_v28 = vpop.eup %3864  ;;  %v3111_v40 = vadd.f32 %v5023_v50, %v3110_v29  ;;  %vm3113_vm6 = vweird.f32 %v5023_v50 }
 0x1a3   :  { %v2163_v52 = vadd.f32 %v2162_v0, %v2161_v38  ;;  %v1658_v30 = vadd.f32 %v1657_v19, %v1656_v32  ;;  %v2655_v10 = vsel %vm5061_vm1, %v5035_v23, %v2650_v24  ;;  %v2379_v45 = vrot.slane %v2378_v35, 4  ;;  %vm5134_vm8 = vmor %vm3112_vm2, %vm3113_vm6 }
 0x1a4   :  { %v1873_v62 = vsel %vm92_vm0, %v3865_v28, 0.0  ;;  %v1245_v33 = vrot.slane %v1244_v20, 1  ;;  %v2168_v34 = vsel %vm92_vm0, %v2062_v46, 0.0  ;;  %v1028_v37 = vrot.slane %v1027_v43, 1 }
 0x1a5   :  { %v1659_v7 = vrot.slane %v1658_v30, 2  ;;  %v1031_v39 = vrot.slane %v1030_v25, 4  ;;  %v3106_v13 = vmul.f32 %v3105_v2, %v4968_v11  ;;  %v2659_v16 = vsub.f32 1.0, %v2658_v9 }
 0x1a6   :  { %v5138_v23 = vadd.f32 %v1871_v36, %v1870_v63  ;;  %v1874_v3 = vrot.slane %v1873_v62, 4  ;;  %v2656_v18 = vmul.f32 %v2655_v10, %v5025_v12  ;;  %vm3599_vm10 = vcmask 1045509  }
 0x1a7   :  { %v3115_v42 = vsel %vm5134_vm8, %v5023_v50, %v3111_v40  ;;  %v2164_v44 = vrot.slane %v2163_v52, 2  ;;  %v1660_v38 = vadd.f32 %v1659_v7, %v1658_v30  ;;  %v2169_v11 = vrot.slane %v2168_v34, 4 }
 0x1a8   :  { %v1875_v53 = vadd.f32 %v1874_v3, %v1873_v62  ;;  %v1246_v41 = vmax.f32 %v1244_v20, %v1245_v33  ;;  %v474_v14 = vadd.f32 %v4782_v17, %v473_v8  ;;  %v2380_v31 = vadd.f32 %v2379_v45, %v2378_v35 }
 0x1a9   :  { %v1661_v1 = vrot.slane %v1660_v38, 1  ;;  %v1029_v55 = vmax.f32 %v1027_v43, %v1028_v37  ;;  %v1032_v54 = vmax.f32 %v1030_v25, %v1031_v39  ;;  %v2660_v57 = vmul.f32 %v5089_v5, %v2659_v16  ;;  %v805_v25 = vpop.f32.mrf.mxu1 }
 0x1aa   :  { %3866 = vrcp.f32 %v5138_v23  ;;  %v1876_v12 = vrot.slane %v1875_v53, 2  ;;  %v1454_v58 = vsub.f32 %v5012_v47, %v1246_v41  ;;  %v3120_v50 = vsel %vm5116_vm5, %v3119_v48, %v3115_v42 }
 0x1ab   :  { %v2165_v61 = vadd.f32 %v2164_v44, %v2163_v52  ;;  %v5150_v63 = vadd.f32 %v1661_v1, %v1660_v38  ;;  %v2093_v29 = vmul.f32 %v4079_v51, %v3865_v28  ;;  %v2170_v0 = vadd.f32 %v2169_v11, %v2168_v34  ;;  %v895_v44 = vpop.f32.mrf.mxu3 }
 0x1ac   :  { %v1877_v32 = vadd.f32 %v1876_v12, %v1875_v53  ;;  %v1557_v21 = vmul.f32 1.442695, %v1454_v58  ;;  %v551_v19 = vmax.f32 %v474_v14, 0.0  ;;  %v2381_v20 = vrot.slane %v2380_v31, 2 }
 0x1ad   :  { %3868 = vrcp.f32 %v5150_v63  ;;  %v1423_v47 = vsub.f32 %v4993_v15, %v1029_v55  ;;  %v1033_v24 = vrot.slane %v1032_v54, 2  ;;  %v3121_v48 = vmul.f32 %v3120_v50, %v5104_v26 }
 0x1ae   :  { %v2661_v35 = vadd.f32 %v5089_v5, %v2660_v57  ;;  %vm2663_vm11 = vweird.f32 %v5089_v5  ;;  %v1878_v22 = vrot.slane %v1877_v32, 1  ;;  %3795 = vmatmul.msk.f32.gmra.mxu3 %vm92_vm0, %v551_v19  ;;  %v2166_v46 = vrot.slane %v2165_v61, 1 }
 0x1af   :  { %v2668_v43 = vand.u32 2147483648, %v5030_v6  ;;  %v2385_v2 = vsel %vm92_vm0, %v2093_v29, 0.0  ;;  %3870 = vpow2.f32 %v1557_v21  ;;  %vm2662_vm14 = vweird.f32 %v5030_v6  ;;  %v380_v29 = vpop.f32.mrf.mxu0 }
 0x1b0   :  { %v5163_v27 = vpop.eup %3866  ;;  %v2666_v15 = vand.u32 2147483647, %v5030_v6  ;;  %v2171_v26 = vrot.slane %v2170_v0, 2  ;;  %v5167_v9 = vadd.f32 %v1878_v22, %v1877_v32  ;;  %v3628_v36 = vsel %vm3595_vm13, %v3106_v13, %v4947_v56  ;;  %vm5171_vm15 = vmor %vm2662_vm14, %vm2663_vm11 }
 0x1b1   :  { %v5175_v28 = vadd.f32 %v2381_v20, %v2380_v31  ;;  %v1495_v40 = vmul.f32 1.442695, %v1423_v47  ;;  %v1034_v52 = vmax.f32 %v1032_v54, %v1033_v24  ;;  %v5179_v30 = vsel %vm3599_vm10, %v2656_v18, %v5074_v60  ;;  %v4080_v18 = vld [vmem:[%s7353_s0 + $0x138] sm:$0xff] }
 0x1b2   :  { %v2665_v6 = vsel %vm5171_vm15, %v5089_v5, %v2661_v35  ;;  %v2386_v10 = vrot.slane %v2385_v2, 4  ;;  %3872 = vrcp.f32 %v5167_v9  ;;  %v5186_v45 = vsel %vm3597_vm7, %v3121_v48, %v3628_v36 }
 0x1b3   :  { %v3869_v56 = vpop.eup %3868  ;;  %v2167_v62 = vadd.f32 %v2166_v46, %v2165_v61  ;;  %v2669_v33 = vor.u32 1.1754944e-38, %v2668_v43  ;;  %v3123_v7 = vmul.f32 %v5163_v27, %v5138_v23  ;;  %vm2667_vm1 = vcmp.eq.f32.partialorder %v2666_v15, 8.507059e+37 }
 0x1b4   :  { %vm3601_vm2 = vcmask 1046534   ;;  %v2172_v60 = vadd.f32 %v2171_v26, %v2170_v0  ;;  %v2673_v34 = vmul.f32 %v3869_v56, %v5150_v63  ;;  %v1035_v37 = vrot.slane %v1034_v52, 1 }
 0x1b5   :  { %v3871_v39 = vpop.eup %3870  ;;  %v2670_v5 = vsel %vm2667_vm1, %v2669_v33, %v2665_v6  ;;  %v2383_v8 = vrot.slane %v5175_v28, 1  ;;  %v3131_v13 = vand.u32 2147483647, %v5138_v23  ;;  %vm3603_vm3 = vcmask 1047559   ;;  %v476_v33 = vpop.f32.mrf.mxu2 }
 0x1b6   :  { %3874 = vpow2.f32 %v1495_v40  ;;  %v2674_v59 = vsub.f32 1.0, %v2673_v34  ;;  %v2387_v16 = vadd.f32 %v2386_v10, %v2385_v2  ;;  %v1880_v3 = vsel %vm92_vm0, %v3871_v39, 0.0 }
 0x1b7   :  { %v2094_v42 = vmul.f32 %v4080_v18, %v3871_v39  ;;  %v3124_v38 = vsub.f32 1.0, %v3123_v7  ;;  %v2683_v11 = vand.u32 2147483648, %v5150_v63  ;;  %v1881_v53 = vrot.slane %v1880_v3, 4 }
 0x1b8   :  { %v1036_v41 = vmax.f32 %v1034_v52, %v1035_v37  ;;  %v5198_v14 = vpop.eup %3872  ;;  %v2173_v31 = vrot.slane %v2172_v60, 1  ;;  %v2675_v1 = vmul.f32 %v3869_v56, %v2674_v59  ;;  %vm2678_vm4 = vweird.f32 %v3869_v56 }
 0x1b9   :  { %v2681_v55 = vand.u32 2147483647, %v5150_v63  ;;  %v2671_v54 = vmul.f32 %v2670_v5, %v2167_v62  ;;  %vm2677_vm5 = vweird.f32 %v5150_v63  ;;  %v1882_v57 = vadd.f32 %v1881_v53, %v1880_v3 }
 0x1ba   :  { %v5203_v12 = vadd.f32 %v4990_v4, %v895_v44  ;;  %v2676_v58 = vadd.f32 %v3869_v56, %v2675_v1  ;;  %v3138_v50 = vmul.f32 %v5198_v14, %v5167_v9  ;;  %v2392_v61 = vsel %vm92_vm0, %v2094_v42, 0.0  ;;  %vm2679_vm6 = vmor %vm2677_vm5, %vm2678_vm4 }
 0x1bb   :  { %v1424_v51 = vsub.f32 %v5086_v49, %v1036_v41  ;;  %v3125_v32 = vmul.f32 %v5163_v27, %v3124_v38  ;;  %v2684_v21 = vor.u32 1.1754944e-38, %v2683_v11  ;;  %v2388_v63 = vrot.slane %v2387_v16, 2 }
 0x1bc   :  { %v5209_v0 = vpop.eup %3874  ;;  %v1883_v19 = vrot.slane %v1882_v57, 2  ;;  %v2174_v20 = vadd.f32 %v2173_v31, %v2172_v60  ;;  %v2680_v47 = vsel %vm2679_vm6, %v3869_v56, %v2676_v58  ;;  %vm2682_vm8 = vcmp.eq.f32.partialorder %v2681_v55, 8.507059e+37 }
 0x1bd   :  { %v1497_v24 = vmul.f32 1.442695, %v1424_v51  ;;  %v2685_v48 = vsel %vm2682_vm8, %v2684_v21, %v2680_v47  ;;  %v2393_v35 = vrot.slane %v2392_v61, 4  ;;  %v1247_v22 = vsel %vm92_vm0, %v5203_v12, -inf }
 0x1be   :  { %v381_v49 = vadd.f32 %v4782_v17, %v380_v29  ;;  %vm3128_vm11 = vweird.f32 %v5163_v27  ;;  %v3133_v46 = vand.u32 2147483648, %v5138_v23  ;;  %v2686_v43 = vmul.f32 %v2685_v48, %v2174_v20 }
 0x1bf   :  { %v3139_v2 = vsub.f32 1.0, %v3138_v50  ;;  %v3602_v15 = vsel %vm3601_vm2, %v2671_v54, %v5179_v30  ;;  %v3126_v26 = vadd.f32 %v5163_v27, %v3125_v32  ;;  %v1884_v36 = vadd.f32 %v1883_v19, %v1882_v57 }
 0x1c0   :  { %3876 = vpow2.f32 %v1497_v24  ;;  %vm3127_vm14 = vweird.f32 %v5138_v23  ;;  %v3604_v40 = vsel %vm3603_vm3, %v2686_v43, %v3602_v15  ;;  %v2389_v52 = vadd.f32 %v2388_v63, %v2387_v16  ;;  %v898_v16 = vpop.f32.mrf.mxu3 }
 0x1c1   :  { %v1248_v6 = vrot.slane %v1247_v22, 4  ;;  %3662 = vst.msk [vmem:[%s7357_s5] sm:$0xff] %vm92_vm0, %v3604_v40  ;;  %v1663_v10 = vsel %vm92_vm0, %v5209_v0, 0.0  ;;  %v1885_v30 = vrot.slane %v1884_v36, 1  ;;  %v2394_v56 = vadd.f32 %v2393_v35, %v2392_v61  ;;  %vm5231_vm15 = vmor %vm3127_vm14, %vm3128_vm11  ;;  %v383_v61 = vpop.f32.mrf.mxu0 }
 0x1c2   :  { %v520_v62 = vmax.f32 %v381_v49, 0.0  ;;  %v2384_v7 = vadd.f32 %v2383_v8, %v5175_v28  ;;  %v3140_v34 = vmul.f32 %v5198_v14, %v3139_v2  ;;  %v5237_v39 = vadd.f32 %v4990_v4, %v805_v25  ;;  %v808_v25 = vpop.f32.mrf.mxu1 }
 0x1c3   :  { %v1249_v37 = vmax.f32 %v1247_v22, %v1248_v6  ;;  %v3130_v5 = vsel %vm5231_vm15, %v5163_v27, %v3126_v26  ;;  %vm5244_vm1 = vcmp.eq.f32.partialorder %v3131_v13, 8.507059e+37  ;;  %v3134_v8 = vor.u32 1.1754944e-38, %v3133_v46 }
 0x1c4   :  { %v5248_v59 = vadd.f32 %v1885_v30, %v1884_v36  ;;  %3764 = vmatmul.msk.f32.gmra.mxu1 %vm92_vm0, %v520_v62  ;;  %v1664_v3 = vrot.slane %v1663_v10, 4  ;;  %v1037_v42 = vsel %vm92_vm0, %v5237_v39, -inf  ;;  %v477_v44 = vadd.f32 %v4782_v17, %v476_v33  ;;  %v479_v33 = vpop.f32.mrf.mxu2 }
 0x1c5   :  { %v1250_v18 = vrot.slane %v1249_v37, 2  ;;  %v2390_v23 = vrot.slane %v2389_v52, 1  ;;  %v3148_v13 = vand.u32 2147483648, %v5167_v9  ;;  %v2395_v38 = vrot.slane %v2394_v56, 2 }
 0x1c6   :  { %v5254_v27 = vpop.eup %3876  ;;  %3878 = vrcp.f32 %v5248_v59  ;;  %v3141_v11 = vadd.f32 %v5198_v14, %v3140_v34  ;;  %vm3143_vm4 = vweird.f32 %v5198_v14  ;;  %v5263_v41 = vadd.f32 %v4990_v4, %v898_v16  ;;  %v5294_v16 = vld [vmem:[%s7354_s2] ss:$0 sm:$0xff] }
 0x1c7   :  { %v1670_v53 = vsel %vm92_vm0, %v5254_v27, 0.0  ;;  %v3135_v31 = vsel %vm5244_vm1, %v3134_v8, %v3130_v5  ;;  %v1251_v55 = vmax.f32 %v1249_v37, %v1250_v18  ;;  %v1038_v54 = vrot.slane %v1037_v42, 4 }
 0x1c8   :  { %v1671_v1 = vrot.slane %v1670_v53, 4  ;;  %vm3142_vm5 = vweird.f32 %v5167_v9  ;;  %v3146_v57 = vand.u32 2147483647, %v5167_v9  ;;  %v1665_v58 = vadd.f32 %v1664_v3, %v1663_v10 }
 0x1c9   :  { %v552_v50 = vmax.f32 %v477_v44, 0.0  ;;  %v2391_v51 = vadd.f32 %v2390_v23, %v2389_v52  ;;  %vm5269_vm6 = vmor %vm3142_vm5, %vm3143_vm4  ;;  %v2396_v32 = vadd.f32 %v2395_v38, %v2394_v56  ;;  %v1252_v21 = vrot.slane %v1251_v55, 1 }
 0x1ca   :  { %v1039_v63 = vmax.f32 %v1037_v42, %v1038_v54  ;;  %v3145_v19 = vsel %vm5269_vm6, %v5198_v14, %v3141_v11  ;;  %v3149_v20 = vor.u32 1.1754944e-38, %v3148_v13  ;;  %v1672_v47 = vadd.f32 %v1671_v1, %v1670_v53  ;;  %v901_v11 = vpop.f32.mrf.mxu3  ;;  %v386_v54 = vpop.f32.mrf.mxu0 }
 0x1cb   :  { %v1254_v9 = vsel %vm92_vm0, %v5263_v41, -inf  ;;  %3796 = vmatmul.msk.f32.gmra.mxu3 %vm92_vm0, %v552_v50  ;;  %v1253_v48 = vmax.f32 %v1251_v55, %v1252_v21  ;;  %v384_v49 = vadd.f32 %v4782_v17, %v383_v61  ;;  %v3136_v46 = vmul.f32 %v3135_v31, %v2384_v7 }
 0x1cc   :  { %v3879_v24 = vpop.eup %3878  ;;  %v1040_v35 = vrot.slane %v1039_v63, 2  ;;  %v1255_v22 = vrot.slane %v1254_v9, 4  ;;  %vm3147_vm8 = vcmp.eq.f32.partialorder %v3146_v57, 8.507059e+37  ;;  %v1666_v43 = vrot.slane %v1665_v58, 2 }
 0x1cd   :  { %v3153_v2 = vmul.f32 %v3879_v24, %v5248_v59  ;;  %v3150_v15 = vsel %vm3147_vm8, %v3149_v20, %v3145_v19  ;;  %v2397_v14 = vrot.slane %v2396_v32, 1  ;;  %v1455_v26 = vsub.f32 %v5203_v12, %v1253_v48 }
 0x1ce   :  { %v1041_v36 = vmax.f32 %v1039_v63, %v1040_v35  ;;  %v3161_v52 = vand.u32 2147483647, %v5248_v59  ;;  %v3163_v6 = vand.u32 2147483648, %v5248_v59  ;;  %v1256_v10 = vmax.f32 %v1254_v9, %v1255_v22  ;;  %v811_v63 = vpop.f32.mrf.mxu1  ;;  %v4082_v9 = vld [vmem:[%s7353_s0 + $0x40] sm:$0xff] }
 0x1cf   :  { %v3154_v40 = vsub.f32 1.0, %v3153_v2  ;;  %v1673_v30 = vrot.slane %v1672_v47, 2  ;;  %v1559_v56 = vmul.f32 1.442695, %v1455_v26  ;;  %v521_v62 = vmax.f32 %v384_v49, 0.0 }
 0x1d0   :  { %v1042_v17 = vrot.slane %v1041_v36, 1  ;;  %vm3158_vm11 = vweird.f32 %v3879_v24  ;;  %v1257_v60 = vrot.slane %v1256_v10, 2  ;;  %v5285_v34 = vadd.f32 %v4990_v4, %v808_v25 }
 0x1d1   :  { %v3155_v7 = vmul.f32 %v3879_v24, %v3154_v40  ;;  %v1667_v12 = vadd.f32 %v1666_v43, %v1665_v58  ;;  %vm3157_vm14 = vweird.f32 %v5248_v59  ;;  %3880 = vpow2.f32 %v1559_v56  ;;  %3765 = vmatmul.msk.f32.gmra.mxu1 %vm92_vm0, %v521_v62 }
 0x1d2   :  { %v1043_v37 = vmax.f32 %v1041_v36, %v1042_v17  ;;  %v1258_v28 = vmax.f32 %v1256_v10, %v1257_v60  ;;  %v1044_v8 = vsel %vm92_vm0, %v5285_v34, -inf  ;;  %v480_v3 = vadd.f32 %v5294_v16, %v479_v33  ;;  %vm3159_vm15 = vmor %vm3157_vm14, %vm3158_vm11 }
 0x1d3   :  { %v3156_v5 = vadd.f32 %v3879_v24, %v3155_v7  ;;  %v3151_v18 = vmul.f32 %v3150_v15, %v2391_v51  ;;  %v2398_v42 = vadd.f32 %v2397_v14, %v2396_v32  ;;  %v3164_v59 = vor.u32 1.1754944e-38, %v3163_v6  ;;  %v4083_v6 = vld [vmem:[%s7353_s0 + $0x48] sm:$0xff] }
 0x1d4   :  { %v1674_v44 = vadd.f32 %v1673_v30, %v1672_v47  ;;  %vm3162_vm1 = vcmp.eq.f32.partialorder %v3161_v52, 8.507059e+37  ;;  %v1425_v13 = vsub.f32 %v5237_v39, %v1043_v37  ;;  %v1259_v38 = vrot.slane %v1258_v28, 1 }
 0x1d5   :  { %v3160_v23 = vsel %vm3159_vm15, %v3879_v24, %v3156_v5  ;;  %v3630_v53 = vsel %vm3599_vm10, %v3136_v46, %v5186_v45  ;;  %v1668_v31 = vrot.slane %v1667_v12, 1  ;;  %v1045_v55 = vrot.slane %v1044_v8, 4  ;;  %v482_v5 = vpop.f32.mrf.mxu2 }
 0x1d6   :  { %v3165_v1 = vsel %vm3162_vm1, %v3164_v59, %v3160_v23  ;;  %v1499_v58 = vmul.f32 1.442695, %v1425_v13  ;;  %v1260_v50 = vmax.f32 %v1258_v28, %v1259_v38  ;;  %v553_v61 = vmax.f32 %v480_v3, 0.0 }
 0x1d7   :  { %v3166_v57 = vmul.f32 %v3165_v1, %v2398_v42  ;;  %v3881_v51 = vpop.eup %3880  ;;  %v3631_v29 = vsel %vm3601_vm2, %v3151_v18, %v3630_v53  ;;  %v1675_v32 = vrot.slane %v1674_v44, 1  ;;  %v1046_v21 = vmax.f32 %v1044_v8, %v1045_v55 }
 0x1d8   :  { %v5303_v39 = vadd.f32 %v4990_v4, %v901_v11  ;;  %v1887_v45 = vsel %vm92_vm0, %v3881_v51, 0.0  ;;  %3882 = vpow2.f32 %v1499_v58  ;;  %v387_v20 = vadd.f32 %v5294_v16, %v386_v54  ;;  %3797 = vmatmul.msk.f32.gmra.mxu3 %vm92_vm0, %v553_v61 }
 0x1d9   :  { %v3632_v19 = vsel %vm3603_vm3, %v3166_v57, %v3631_v29  ;;  %v5309_v47 = vadd.f32 %v1668_v31, %v1667_v12  ;;  %v2063_v24 = vmul.f32 %v4082_v9, %v5209_v0  ;;  %v1888_v48 = vrot.slane %v1887_v45, 4  ;;  %v904_v9 = vpop.f32.mrf.mxu3 }
 0x1da   :  { %3666 = vst.msk [vmem:[%s7357_s5 + $0x20] sm:$0xff] %vm92_vm0, %v3632_v19  ;;  %v1261_v35 = vsel %vm92_vm0, %v5303_v39, -inf  ;;  %v1456_v22 = vsub.f32 %v5263_v41, %v1260_v50  ;;  %v1047_v49 = vrot.slane %v1046_v21, 2  ;;  %v5323_v43 = vadd.f32 %v4990_v4, %v811_v63  ;;  %v4085_v50 = vld [vmem:[%s7353_s0 + $0x50] sm:$0xff] }
 0x1db   :  { %v1262_v46 = vrot.slane %v1261_v35, 4  ;;  %v5325_v2 = vadd.f32 %v1675_v32, %v1674_v44  ;;  %v522_v15 = vmax.f32 %v387_v20, 0.0  ;;  %v2175_v0 = vsel %vm92_vm0, %v2063_v24, 0.0 }
 0x1dc   :  { %3884 = vrcp.f32 %v5309_v47  ;;  %v1889_v14 = vadd.f32 %v1888_v48, %v1887_v45  ;;  %v1561_v25 = vmul.f32 1.442695, %v1456_v22  ;;  %v1048_v40 = vmax.f32 %v1046_v21, %v1047_v49 }
 0x1dd   :  { %v1263_v26 = vmax.f32 %v1261_v35, %v1262_v46  ;;  %v1051_v41 = vsel %vm92_vm0, %v5323_v43, -inf  ;;  %3766 = vmatmul.msk.f32.gmra.mxu1 %vm92_vm0, %v522_v15  ;;  %3886 = vrcp.f32 %v5325_v2  ;;  %v2176_v52 = vrot.slane %v2175_v0, 4 }
 0x1de   :  { %v3883_v36 = vpop.eup %3882  ;;  %v2064_v10 = vmul.f32 %v4083_v6, %v5254_v27  ;;  %v1890_v56 = vrot.slane %v1889_v14, 2  ;;  %v1052_v62 = vrot.slane %v1051_v41, 4  ;;  %3888 = vpow2.f32 %v1561_v25  ;;  %v4084_v27 = vld [vmem:[%s7353_s0 + $0x140] sm:$0xff] }
 0x1df   :  { %v1677_v30 = vsel %vm92_vm0, %v3883_v36, 0.0  ;;  %v1264_v17 = vrot.slane %v1263_v26, 2  ;;  %v1049_v33 = vrot.slane %v1048_v40, 1  ;;  %v2177_v12 = vadd.f32 %v2176_v52, %v2175_v0 }
 0x1e0   :  { %v1678_v60 = vrot.slane %v1677_v30, 4  ;;  %v2182_v37 = vsel %vm92_vm0, %v2064_v10, 0.0  ;;  %v1891_v8 = vadd.f32 %v1890_v56, %v1889_v14  ;;  %v2095_v3 = vmul.f32 %v4084_v27, %v3881_v51 }
 0x1e1   :  { %v1265_v18 = vmax.f32 %v1263_v26, %v1264_v17  ;;  %v1053_v42 = vmax.f32 %v1051_v41, %v1052_v62  ;;  %v1050_v44 = vmax.f32 %v1048_v40, %v1049_v33  ;;  %v483_v13 = vadd.f32 %v5294_v16, %v482_v5 }
 0x1e2   :  { %v5338_v7 = vpop.eup %3884  ;;  %v1679_v23 = vadd.f32 %v1678_v60, %v1677_v30  ;;  %v2178_v11 = vrot.slane %v2177_v12, 2  ;;  %v2183_v53 = vrot.slane %v2182_v37, 4  ;;  %v1892_v1 = vrot.slane %v1891_v8, 1 }
 0x1e3   :  { %v5341_v28 = vpop.eup %3886  ;;  %v2688_v59 = vmul.f32 %v5338_v7, %v5309_v47  ;;  %v2399_v55 = vsel %vm92_vm0, %v2095_v3, 0.0  ;;  %v1266_v54 = vrot.slane %v1265_v18, 1  ;;  %v1054_v57 = vrot.slane %v1053_v42, 2 }
 0x1e4   :  { %v3889_v38 = vpop.eup %3888  ;;  %v2703_v31 = vmul.f32 %v5341_v28, %v5325_v2  ;;  %v2065_v61 = vmul.f32 %v4085_v50, %v3883_v36  ;;  %v1426_v51 = vsub.f32 %v5285_v34, %v1050_v44  ;;  %v1680_v29 = vrot.slane %v1679_v23, 2 }
 0x1e5   :  { %v2689_v58 = vsub.f32 1.0, %v2688_v59  ;;  %v1894_v32 = vsel %vm92_vm0, %v3889_v38, 0.0  ;;  %v1055_v21 = vmax.f32 %v1053_v42, %v1054_v57  ;;  %v554_v63 = vmax.f32 %v483_v13, 0.0 }
 0x1e6   :  { %v5357_v19 = vadd.f32 %v2178_v11, %v2177_v12  ;;  %v2184_v45 = vadd.f32 %v2183_v53, %v2182_v37  ;;  %v2400_v20 = vrot.slane %v2399_v55, 4  ;;  %v2704_v24 = vsub.f32 1.0, %v2703_v31  ;;  %v389_v53 = vpop.f32.mrf.mxu0 }
 0x1e7   :  { %v5359_v48 = vadd.f32 %v1892_v1, %v1891_v8  ;;  %v1267_v35 = vmax.f32 %v1265_v18, %v1266_v54  ;;  %3798 = vmatmul.msk.f32.gmra.mxu3 %vm92_vm0, %v554_v63  ;;  %v2189_v22 = vsel %vm92_vm0, %v2065_v61, 0.0  ;;  %v1895_v49 = vrot.slane %v1894_v32, 4 }
 0x1e8   :  { %v1501_v34 = vmul.f32 1.442695, %v1426_v51  ;;  %v2690_v46 = vmul.f32 %v5338_v7, %v2689_v58  ;;  %v1681_v15 = vadd.f32 %v1680_v29, %v1679_v23  ;;  %v1056_v0 = vrot.slane %v1055_v21, 1 }
 0x1e9   :  { %v5365_v14 = vadd.f32 %v4990_v4, %v904_v9  ;;  %v2180_v26 = vrot.slane %v5357_v19, 1  ;;  %vm2692_vm4 = vweird.f32 %v5309_v47  ;;  %v2185_v36 = vrot.slane %v2184_v45, 2 }
 0x1ea   :  { %v2401_v25 = vadd.f32 %v2400_v20, %v2399_v55  ;;  %v2705_v40 = vmul.f32 %v5341_v28, %v2704_v24  ;;  %3890 = vrcp.f32 %v5359_v48  ;;  %v2190_v41 = vrot.slane %v2189_v22, 4 }
 0x1eb   :  { %v1457_v52 = vsub.f32 %v5303_v39, %v1267_v35  ;;  %vm2693_vm5 = vweird.f32 %v5338_v7  ;;  %v2698_v6 = vand.u32 2147483648, %v5309_v47  ;;  %v1896_v10 = vadd.f32 %v1895_v49, %v1894_v32  ;;  %v4086_v39 = vld [vmem:[%s7353_s0 + $0x148] sm:$0xff] }
 0x1ec   :  { %3892 = vpow2.f32 %v1501_v34  ;;  %v2691_v30 = vadd.f32 %v5338_v7, %v2690_v46  ;;  %v1682_v56 = vrot.slane %v1681_v15, 1  ;;  %v1057_v17 = vmax.f32 %v1055_v21, %v1056_v0  ;;  %vm5387_vm8 = vmor %vm2692_vm4, %vm2693_vm5  ;;  %v485_v34 = vpop.f32.mrf.mxu2 }
 0x1ed   :  { %v1268_v62 = vsel %vm92_vm0, %v5365_v14, -inf  ;;  %v2186_v33 = vadd.f32 %v2185_v36, %v2184_v45  ;;  %v2713_v60 = vand.u32 2147483648, %v5325_v2  ;;  %v2402_v12 = vrot.slane %v2401_v25, 2 }
 0x1ee   :  { %v2096_v37 = vmul.f32 %v4086_v39, %v3889_v38  ;;  %v2706_v5 = vadd.f32 %v5341_v28, %v2705_v40  ;;  %vm2708_vm6 = vweird.f32 %v5341_v28  ;;  %v2191_v8 = vadd.f32 %v2190_v41, %v2189_v22 }
 0x1ef   :  { %v1563_v27 = vmul.f32 1.442695, %v1457_v52  ;;  %v2696_v18 = vand.u32 2147483647, %v5309_v47  ;;  %v2699_v42 = vor.u32 1.1754944e-38, %v2698_v6  ;;  %v1897_v59 = vrot.slane %v1896_v10, 2 }
 0x1f0   :  { %v1269_v44 = vrot.slane %v1268_v62, 4  ;;  %v5392_v23 = vpop.eup %3890  ;;  %v2695_v13 = vsel %vm5387_vm8, %v5338_v7, %v2691_v30  ;;  %vm2707_vm11 = vweird.f32 %v5325_v2  ;;  %v5398_v38 = vadd.f32 %v1682_v56, %v1681_v15 }
 0x1f1   :  { %v1427_v11 = vsub.f32 %v5323_v43, %v1057_v17  ;;  %v2187_v1 = vrot.slane %v2186_v33, 1  ;;  %vm5403_vm14 = vmor %vm2707_vm11, %vm2708_vm6  ;;  %v2711_v55 = vand.u32 2147483647, %v5325_v2  ;;  %v2403_v54 = vadd.f32 %v2402_v12, %v2401_v25  ;;  %v814_v25 = vpop.f32.mrf.mxu1 }
 0x1f2   :  { %v3893_v31 = vpop.eup %3892  ;;  %v2406_v7 = vsel %vm92_vm0, %v2096_v37, 0.0  ;;  %v2710_v57 = vsel %vm5403_vm14, %v5341_v28, %v2706_v5  ;;  %v2714_v58 = vor.u32 1.1754944e-38, %v2713_v60  ;;  %v2192_v43 = vrot.slane %v2191_v8, 2 }
 0x1f3   :  { %3894 = vpow2.f32 %v1563_v27  ;;  %v1898_v50 = vadd.f32 %v1897_v59, %v1896_v10  ;;  %v1503_v61 = vmul.f32 1.442695, %v1427_v11  ;;  %v1270_v51 = vmax.f32 %v1268_v62, %v1269_v44 }
 0x1f4   :  { %v390_v29 = vadd.f32 %v5294_v16, %v389_v53  ;;  %v3168_v32 = vmul.f32 %v5392_v23, %v5359_v48  ;;  %3896 = vrcp.f32 %v5398_v38  ;;  %v2407_v2 = vrot.slane %v2406_v7, 4 }
 0x1f5   :  { %v1684_v21 = vsel %vm92_vm0, %v3893_v31, 0.0  ;;  %vm2697_vm15 = vcmp.eq.f32.partialorder %v2696_v18, 8.507059e+37  ;;  %vm2712_vm1 = vcmp.eq.f32.partialorder %v2711_v55, 8.507059e+37  ;;  %v2404_v63 = vrot.slane %v2403_v54, 1  ;;  %v907_v55 = vpop.f32.mrf.mxu3 }
 0x1f6   :  { %3898 = vpow2.f32 %v1503_v61  ;;  %v2181_v28 = vadd.f32 %v2180_v26, %v5357_v19  ;;  %v2700_v45 = vsel %vm2697_vm15, %v2699_v42, %v2695_v13  ;;  %v2188_v20 = vadd.f32 %v2187_v1, %v2186_v33 }
 0x1f7   :  { %v2715_v9 = vsel %vm2712_vm1, %v2714_v58, %v2710_v57  ;;  %v1899_v24 = vrot.slane %v1898_v50, 1  ;;  %v1685_v35 = vrot.slane %v1684_v21, 4  ;;  %v1271_v22 = vrot.slane %v1270_v51, 2 }
 0x1f8   :  { %v523_v49 = vmax.f32 %v390_v29, 0.0  ;;  %v3169_v15 = vsub.f32 1.0, %v3168_v32  ;;  %v2193_v0 = vadd.f32 %v2192_v43, %v2191_v8  ;;  %v2408_v36 = vadd.f32 %v2407_v2, %v2406_v7  ;;  %v5469_v32 = vld [vmem:[%s7356_s4] ss:$0 sm:$0xff] }
 0x1f9   :  { %v5418_v46 = vpop.eup %3894  ;;  %v2701_v40 = vmul.f32 %v2700_v45, %v2181_v28  ;;  %v2716_v41 = vmul.f32 %v2715_v9, %v2188_v20  ;;  %v5420_v52 = vadd.f32 %v2404_v63, %v2403_v54  ;;  %vm3172_vm4 = vweird.f32 %v5359_v48  ;;  %v817_v9 = vpop.f32.mrf.mxu1 }
 0x1fa   :  { %3767 = vmatmul.msk.f32.gmra.mxu1 %vm92_vm0, %v523_v49  ;;  %v5423_v19 = vpop.eup %3896  ;;  %v3176_v26 = vand.u32 2147483647, %v5359_v48  ;;  %v3178_v6 = vand.u32 2147483648, %v5359_v48  ;;  %v1272_v10 = vmax.f32 %v1270_v51, %v1271_v22  ;;  %v486_v30 = vadd.f32 %v5294_v16, %v485_v34 }
 0x1fb   :  { %v5431_v17 = vadd.f32 %v1899_v24, %v1898_v50  ;;  %v1686_v62 = vadd.f32 %v1685_v35, %v1684_v21  ;;  %v1901_v33 = vsel %vm92_vm0, %v5418_v46, 0.0  ;;  %v5436_v60 = vadd.f32 %v4990_v4, %v814_v25  ;;  %v4087_v4 = vld [vmem:[%s7353_s0 + $0x58] sm:$0xff]  ;;  %v392_v21 = vpop.f32.mrf.mxu0 }
 0x1fc   :  { %v5429_v56 = vpop.eup %3898  ;;  %v3170_v12 = vmul.f32 %v5392_v23, %v3169_v15  ;;  %v2194_v39 = vrot.slane %v2193_v0, 1  ;;  %v2409_v37 = vrot.slane %v2408_v36, 2  ;;  %v5442_v8 = vsel %vm3591_vm9, %v2716_v41, %v2701_v40 }
 0x1fd   :  { %v1691_v5 = vsel %vm92_vm0, %v5429_v56, 0.0  ;;  %v2718_v27 = vmul.f32 %v5423_v19, %v5398_v38  ;;  %v2728_v3 = vand.u32 2147483648, %v5398_v38  ;;  %v1273_v18 = vrot.slane %v1272_v10, 1 }
 0x1fe   :  { %v3179_v42 = vor.u32 1.1754944e-38, %v3178_v6  ;;  %v2066_v59 = vmul.f32 %v4087_v4, %v3893_v31  ;;  %v1902_v44 = vrot.slane %v1901_v33, 4  ;;  %v555_v13 = vmax.f32 %v486_v30, 0.0 }
 0x1ff   :  { %vm5450_vm5 = vcmp.eq.f32.partialorder %v3176_v26, 8.507059e+37  ;;  %3900 = vrcp.f32 %v5431_v17  ;;  %v1687_v53 = vrot.slane %v1686_v62, 2  ;;  %v1692_v1 = vrot.slane %v1691_v5, 4 }
 0x200   :  { %v1058_v47 = vsel %vm92_vm0, %v5436_v60, -inf  ;;  %v3171_v54 = vadd.f32 %v5392_v23, %v3170_v12  ;;  %vm3173_vm6 = vweird.f32 %v5392_v23  ;;  %v5459_v7 = vadd.f32 %v2194_v39, %v2193_v0  ;;  %3799 = vmatmul.msk.f32.gmra.mxu3 %vm92_vm0, %v555_v13 }
 0x201   :  { %v2410_v31 = vadd.f32 %v2409_v37, %v2408_v36  ;;  %v2719_v57 = vsub.f32 1.0, %v2718_v27  ;;  %v2726_v58 = vand.u32 2147483647, %v5398_v38  ;;  %v5463_v43 = vor.u32 1.1754944e-38, %v2728_v3  ;;  %vm5476_vm8 = vmor %vm3172_vm4, %vm3173_vm6 }
 0x202   :  { %v1274_v50 = vmax.f32 %v1272_v10, %v1273_v18  ;;  %v2196_v61 = vsel %vm92_vm0, %v2066_v59, 0.0  ;;  %v1903_v51 = vadd.f32 %v1902_v44, %v1901_v33  ;;  %v1059_v29 = vrot.slane %v1058_v47, 4  ;;  %v488_v59 = vpop.f32.mrf.mxu2  ;;  %v910_v44 = vpop.f32.mrf.mxu3 }
 0x203   :  { %v5472_v2 = vadd.f32 %v5469_v32, %v907_v55  ;;  %vm2723_vm11 = vweird.f32 %v5423_v19  ;;  %v1688_v28 = vadd.f32 %v1687_v53, %v1686_v62  ;;  %v1693_v45 = vadd.f32 %v1692_v1, %v1691_v5  ;;  %v4089_v53 = vld [vmem:[%s7353_s0 + $0x150] sm:$0xff] }
 0x204   :  { %v1458_v20 = vsub.f32 %v5365_v14, %v1274_v50  ;;  %v3175_v24 = vsel %vm5476_vm8, %v5392_v23, %v3171_v54  ;;  %vm2722_vm14 = vweird.f32 %v5398_v38  ;;  %v2411_v35 = vrot.slane %v2410_v31, 1 }
 0x205   :  { %v1060_v22 = vmax.f32 %v1058_v47, %v1059_v29  ;;  %v1275_v48 = vsel %vm92_vm0, %v5472_v2, -inf  ;;  %v5488_v49 = vpop.eup %3900  ;;  %v2720_v34 = vmul.f32 %v5423_v19, %v2719_v57  ;;  %v2197_v15 = vrot.slane %v2196_v61, 4  ;;  %vm5528_vm1 = vmor %vm2722_vm14, %vm2723_vm11 }
 0x206   :  { %v1565_v0 = vmul.f32 1.442695, %v1458_v20  ;;  %v393_v14 = vadd.f32 %v5294_v16, %v392_v21  ;;  %v1904_v36 = vrot.slane %v1903_v51, 2  ;;  %v1276_v40 = vrot.slane %v1275_v48, 4 }
 0x207   :  { %v1061_v25 = vrot.slane %v1060_v22, 2  ;;  %v5493_v23 = vadd.f32 %v5469_v32, %v817_v9  ;;  %v3193_v41 = vand.u32 2147483648, %v5431_v17  ;;  %v1689_v26 = vrot.slane %v1688_v28, 1 }
 0x208   :  { %v1694_v6 = vrot.slane %v1693_v45, 2  ;;  %3902 = vpow2.f32 %v1565_v0  ;;  %v3180_v10 = vsel %vm5450_vm5, %v3179_v42, %v3175_v24  ;;  %vm5498_vm15 = vcmp.eq.f32.partialorder %v2726_v58, 8.507059e+37  ;;  %v395_v0 = vpop.f32.mrf.mxu0 }
 0x209   :  { %v3183_v62 = vmul.f32 %v5488_v49, %v5431_v17  ;;  %v1062_v33 = vmax.f32 %v1060_v22, %v1061_v25  ;;  %v1277_v12 = vmax.f32 %v1275_v48, %v1276_v40  ;;  %v2721_v39 = vadd.f32 %v5423_v19, %v2720_v34  ;;  %v820_v40 = vpop.f32.mrf.mxu1 }
 0x20a   :  { %v3191_v37 = vand.u32 2147483647, %v5431_v17  ;;  %v2198_v5 = vadd.f32 %v2197_v15, %v2196_v61  ;;  %v524_v27 = vmax.f32 %v393_v14, 0.0  ;;  %v1905_v3 = vadd.f32 %v1904_v36, %v1903_v51 }
 0x20b   :  { %v1063_v18 = vrot.slane %v1062_v33, 1  ;;  %v1278_v4 = vrot.slane %v1277_v12, 2  ;;  %v1065_v42 = vsel %vm92_vm0, %v5493_v23, -inf  ;;  %v5509_v13 = vmul.f32 %v3180_v10, %v5420_v52 }
 0x20c   :  { %v5511_v11 = vadd.f32 %v1689_v26, %v1688_v28  ;;  %v2097_v1 = vmul.f32 %v4089_v53, %v5418_v46  ;;  %v1695_v47 = vadd.f32 %v1694_v6, %v1693_v45  ;;  %3768 = vmatmul.msk.f32.gmra.mxu1 %vm92_vm0, %v524_v27  ;;  %v5518_v55 = vadd.f32 %v2411_v35, %v2410_v31 }
 0x20d   :  { %v3184_v54 = vsub.f32 1.0, %v3183_v62  ;;  %v5520_v57 = vor.u32 1.1754944e-38, %v3193_v41  ;;  %v1064_v58 = vmax.f32 %v1062_v33, %v1063_v18  ;;  %v1279_v46 = vmax.f32 %v1277_v12, %v1278_v4 }
 0x20e   :  { %v5522_v50 = vpop.eup %3902  ;;  %v1066_v61 = vrot.slane %v1065_v42, 4  ;;  %v489_v51 = vadd.f32 %v5294_v16, %v488_v59  ;;  %v5534_v31 = vadd.f32 %v5469_v32, %v910_v44  ;;  %v2725_v29 = vsel %vm5528_vm1, %v5423_v19, %v2721_v39 }
 0x20f   :  { %vm3187_vm4 = vweird.f32 %v5431_v17  ;;  %v2199_v21 = vrot.slane %v2198_v5, 2  ;;  %v1906_v63 = vrot.slane %v1905_v3, 1  ;;  %v1908_v38 = vsel %vm92_vm0, %v5522_v50, 0.0 }
 0x210   :  { %3904 = vrcp.f32 %v5511_v11  ;;  %v2413_v28 = vsel %vm92_vm0, %v2097_v1, 0.0  ;;  %v1696_v45 = vrot.slane %v1695_v47, 1  ;;  %v1428_v20 = vsub.f32 %v5436_v60, %v1064_v58 }
 0x211   :  { %v3185_v9 = vmul.f32 %v5488_v49, %v3184_v54  ;;  %v1280_v24 = vrot.slane %v1279_v46, 1  ;;  %v1067_v35 = vmax.f32 %v1065_v42, %v1066_v61  ;;  %v556_v22 = vmax.f32 %v489_v51, 0.0 }
 0x212   :  { %v2730_v19 = vsel %vm5498_vm15, %v5463_v43, %v2725_v29  ;;  %v1909_v48 = vrot.slane %v1908_v38, 4  ;;  %v1505_v34 = vmul.f32 1.442695, %v1428_v20  ;;  %v1282_v15 = vsel %vm92_vm0, %v5534_v31, -inf }
 0x213   :  { %vm3188_vm5 = vweird.f32 %v5488_v49  ;;  %vm5552_vm6 = vcmp.eq.f32.partialorder %v3191_v37, 8.507059e+37  ;;  %v2200_v60 = vadd.f32 %v2199_v21, %v2198_v5  ;;  %v5556_v36 = vadd.f32 %v1906_v63, %v1905_v3  ;;  %3800 = vmatmul.msk.f32.gmra.mxu3 %vm92_vm0, %v556_v22 }
 0x214   :  { %v2414_v25 = vrot.slane %v2413_v28, 4  ;;  %v5559_v43 = vadd.f32 %v1696_v45, %v1695_v47  ;;  %3906 = vpow2.f32 %v1505_v34  ;;  %v1281_v41 = vmax.f32 %v1279_v46, %v1280_v24  ;;  %vm5575_vm8 = vmor %vm3187_vm4, %vm3188_vm5  ;;  %v491_v47 = vpop.f32.mrf.mxu2 }
 0x215   :  { %v1068_v26 = vrot.slane %v1067_v35, 2  ;;  %v2731_v6 = vmul.f32 %v2730_v19, %v5459_v7  ;;  %v3186_v10 = vadd.f32 %v5488_v49, %v3185_v9  ;;  %v1283_v30 = vrot.slane %v1282_v15, 4 }
 0x216   :  { %v396_v62 = vadd.f32 %v5294_v16, %v395_v0  ;;  %v5564_v33 = vpop.eup %3904  ;;  %v1910_v12 = vadd.f32 %v1909_v48, %v1908_v38  ;;  %v1459_v39 = vsub.f32 %v5472_v2, %v1281_v41  ;;  %v5568_v5 = vadd.f32 %v5469_v32, %v820_v40  ;;  %v4090_v2 = vld [vmem:[%s7353_s0 + $0x60] sm:$0xff] }
 0x217   :  { %v1069_v37 = vmax.f32 %v1067_v35, %v1068_v26  ;;  %v2415_v27 = vadd.f32 %v2414_v25, %v2413_v28  ;;  %3908 = vrcp.f32 %v5556_v36  ;;  %v1284_v3 = vmax.f32 %v1282_v15, %v1283_v30 }
 0x218   :  { %v525_v18 = vmax.f32 %v396_v62, 0.0  ;;  %v2067_v4 = vmul.f32 %v4090_v2, %v5429_v56  ;;  %3910 = vrcp.f32 %v5559_v43  ;;  %v1567_v42 = vmul.f32 1.442695, %v1459_v39 }
 0x219   :  { %v1070_v59 = vrot.slane %v1069_v37, 1  ;;  %v3190_v44 = vsel %vm5575_vm8, %v5488_v49, %v3186_v10  ;;  %v2201_v53 = vrot.slane %v2200_v60, 1  ;;  %v2733_v17 = vmul.f32 %v5564_v33, %v5511_v11 }
 0x21a   :  { %v1072_v1 = vsel %vm92_vm0, %v5568_v5, -inf  ;;  %3769 = vmatmul.msk.f32.gmra.mxu1 %vm92_vm0, %v525_v18  ;;  %v3907_v54 = vpop.eup %3906  ;;  %v2743_v56 = vand.u32 2147483648, %v5511_v11  ;;  %v1911_v58 = vrot.slane %v1910_v12, 2  ;;  %v1285_v46 = vrot.slane %v1284_v3, 2 }
 0x21b   :  { %v1071_v52 = vmax.f32 %v1069_v37, %v1070_v59  ;;  %v5595_v61 = vsel %vm3593_vm12, %v2731_v6, %v5442_v8  ;;  %v2416_v49 = vrot.slane %v2415_v27, 2  ;;  %v1698_v51 = vsel %vm92_vm0, %v3907_v54, 0.0 }
 0x21c   :  { %3912 = vpow2.f32 %v1567_v42  ;;  %v3195_v29 = vsel %vm5552_vm6, %v5520_v57, %v3190_v44  ;;  %v2203_v21 = vsel %vm92_vm0, %v2067_v4, 0.0  ;;  %v1073_v63 = vrot.slane %v1072_v1, 4  ;;  %v4091_v42 = vld [vmem:[%s7353_s0 + $0x158] sm:$0xff] }
 0x21d   :  { %v492_v38 = vadd.f32 %v5294_v16, %v491_v47  ;;  %v5603_v28 = vpop.eup %3908  ;;  %v5605_v45 = vadd.f32 %v2201_v53, %v2200_v60  ;;  %v2734_v20 = vsub.f32 1.0, %v2733_v17  ;;  %v2741_v8 = vand.u32 2147483647, %v5511_v11 }
 0x21e   :  { %v1699_v9 = vrot.slane %v1698_v51, 4  ;;  %v5608_v24 = vpop.eup %3910  ;;  %v5610_v35 = vor.u32 1.1754944e-38, %v2743_v56  ;;  %v1912_v22 = vadd.f32 %v1911_v58, %v1910_v12  ;;  %v1429_v57 = vsub.f32 %v5493_v23, %v1071_v52 }
 0x21f   :  { %v1286_v19 = vmax.f32 %v1284_v3, %v1285_v46  ;;  %v3196_v48 = vmul.f32 %v3195_v29, %v5518_v55  ;;  %vm2737_vm11 = vweird.f32 %v5511_v11  ;;  %v2417_v16 = vadd.f32 %v2416_v49, %v2415_v27 }
 0x220   :  { %v2204_v34 = vrot.slane %v2203_v21, 4  ;;  %v1700_v15 = vadd.f32 %v1699_v9, %v1698_v51  ;;  %v1507_v0 = vmul.f32 1.442695, %v1429_v57  ;;  %v1074_v60 = vmax.f32 %v1072_v1, %v1073_v63  ;;  %v4092_v1 = vld [vmem:[%s7353_s0 + $0x68] sm:$0xff] }
 0x221   :  { %v1287_v14 = vrot.slane %v1286_v19, 1  ;;  %v557_v25 = vmax.f32 %v492_v38, 0.0  ;;  %v2735_v41 = vmul.f32 %v5564_v33, %v2734_v20  ;;  %v3198_v26 = vmul.f32 %v5603_v28, %v5556_v36  ;;  %v913_v38 = vpop.f32.mrf.mxu3 }
 0x222   :  { %v5615_v40 = vpop.eup %3912  ;;  %v2748_v23 = vmul.f32 %v5608_v24, %v5559_v43  ;;  %v1701_v55 = vrot.slane %v1700_v15, 2  ;;  %v1913_v6 = vrot.slane %v1912_v22, 1  ;;  %3914 = vpow2.f32 %v1507_v0 }
 0x223   :  { %v1288_v10 = vmax.f32 %v1286_v19, %v1287_v14  ;;  %v1075_v30 = vrot.slane %v1074_v60, 2  ;;  %3801 = vmatmul.msk.f32.gmra.mxu3 %vm92_vm0, %v557_v25  ;;  %vm2738_vm14 = vweird.f32 %v5564_v33  ;;  %vm5624_vm15 = vcmp.eq.f32.partialorder %v2741_v8, 8.507059e+37  ;;  %v4093_v14 = vld [vmem:[%s7353_s0 + $0x70] sm:$0xff] }
 0x224   :  { %v2418_v12 = vrot.slane %v2417_v16, 1  ;;  %v2205_v39 = vadd.f32 %v2204_v34, %v2203_v21  ;;  %v1702_v37 = vadd.f32 %v1701_v55, %v1700_v15  ;;  %v3208_v27 = vand.u32 2147483648, %v5556_v36  ;;  %vm5652_vm1 = vmor %vm2737_vm11, %vm2738_vm14 }
 0x225   :  { %v1915_v3 = vsel %vm92_vm0, %v5615_v40, 0.0  ;;  %v1460_v18 = vsub.f32 %v5534_v31, %v1288_v10  ;;  %v1076_v7 = vmax.f32 %v1074_v60, %v1075_v30  ;;  %v2736_v2 = vadd.f32 %v5564_v33, %v2735_v41  ;;  %v4095_v30 = vld [vmem:[%s7353_s0 + $0x78] sm:$0xff] }
 0x226   :  { %v3199_v4 = vsub.f32 1.0, %v3198_v26  ;;  %v2098_v59 = vmul.f32 %v4091_v42, %v5522_v50  ;;  %v1703_v44 = vrot.slane %v1702_v37, 1  ;;  %v2749_v53 = vsub.f32 1.0, %v2748_v23 }
 0x227   :  { %v5637_v17 = vadd.f32 %v1913_v6, %v1912_v22  ;;  %v2068_v47 = vmul.f32 %v4092_v1, %v3907_v54  ;;  %v1077_v31 = vrot.slane %v1076_v7, 1  ;;  %v5644_v56 = vsel %vm3591_vm9, %v3196_v48, %v5509_v13 }
 0x228   :  { %v5646_v58 = vadd.f32 %v2418_v12, %v2417_v16  ;;  %v2206_v52 = vrot.slane %v2205_v39, 2  ;;  %v1916_v46 = vrot.slane %v1915_v3, 4  ;;  %v3915_v49 = vpop.eup %3914  ;;  %vm3202_vm4 = vweird.f32 %v5556_v36 }
 0x229   :  { %v3206_v54 = vand.u32 2147483647, %v5556_v36  ;;  %v5658_v51 = vor.u32 1.1754944e-38, %v3208_v27  ;;  %v1569_v13 = vmul.f32 1.442695, %v1460_v18  ;;  %v2740_v29 = vsel %vm5652_vm1, %v5564_v33, %v2736_v2 }
 0x22a   :  { %v3200_v21 = vmul.f32 %v5603_v28, %v3199_v4  ;;  %v2420_v63 = vsel %vm92_vm0, %v2098_v59, 0.0  ;;  %v5665_v11 = vadd.f32 %v1703_v44, %v1702_v37  ;;  %v2750_v20 = vmul.f32 %v5608_v24, %v2749_v53 }
 0x22b   :  { %3916 = vrcp.f32 %v5637_v17  ;;  %v2210_v8 = vsel %vm92_vm0, %v2068_v47, 0.0  ;;  %v1078_v9 = vmax.f32 %v1076_v7, %v1077_v31  ;;  %vm3203_vm5 = vweird.f32 %v5603_v28  ;;  %v4094_v7 = vld [vmem:[%s7353_s0 + $0x160] sm:$0xff] }
 0x22c   :  { %v2207_v22 = vadd.f32 %v2206_v52, %v2205_v39  ;;  %v1917_v57 = vadd.f32 %v1916_v46, %v1915_v3  ;;  %v1705_v33 = vsel %vm92_vm0, %v3915_v49, 0.0  ;;  %v2745_v19 = vsel %vm5624_vm15, %v5610_v35, %v2740_v29  ;;  %vm5697_vm11 = vmor %vm3202_vm4, %vm3203_vm5 }
 0x22d   :  { %v2421_v48 = vrot.slane %v2420_v63, 4  ;;  %3918 = vpow2.f32 %v1569_v13  ;;  %v5676_v16 = vadd.f32 %v5469_v32, %v913_v38  ;;  %vm5678_vm6 = vcmp.eq.f32.partialorder %v3206_v54, 8.507059e+37 }
 0x22e   :  { %v2211_v15 = vrot.slane %v2210_v8, 4  ;;  %3920 = vrcp.f32 %v5665_v11  ;;  %v1706_v0 = vrot.slane %v1705_v33, 4  ;;  %v2069_v60 = vmul.f32 %v4093_v14, %v3915_v49 }
 0x22f   :  { %v3201_v35 = vadd.f32 %v5603_v28, %v3200_v21  ;;  %v2751_v25 = vadd.f32 %v5608_v24, %v2750_v20  ;;  %vm2753_vm8 = vweird.f32 %v5608_v24  ;;  %v1430_v41 = vsub.f32 %v5568_v5, %v1078_v9 }
 0x230   :  { %v2746_v26 = vmul.f32 %v2745_v19, %v5605_v45  ;;  %v2208_v23 = vrot.slane %v2207_v22, 1  ;;  %v1918_v55 = vrot.slane %v1917_v57, 2  ;;  %v1707_v6 = vadd.f32 %v1706_v0, %v1705_v33 }
 0x231   :  { %v5691_v10 = vpop.eup %3916  ;;  %vm2752_vm14 = vweird.f32 %v5559_v43  ;;  %v2756_v62 = vand.u32 2147483647, %v5559_v43  ;;  %v2758_v5 = vand.u32 2147483648, %v5559_v43  ;;  %v1289_v45 = vsel %vm92_vm0, %v5676_v16, -inf }
 0x232   :  { %vm5706_vm15 = vmor %vm2752_vm14, %vm2753_vm8  ;;  %v2422_v39 = vadd.f32 %v2421_v48, %v2420_v63  ;;  %v2212_v37 = vadd.f32 %v2211_v15, %v2210_v8  ;;  %v1708_v36 = vrot.slane %v1707_v6, 2  ;;  %v2217_v27 = vsel %vm92_vm0, %v2069_v60, 0.0 }
 0x233   :  { %v5711_v3 = vpop.eup %3918  ;;  %v3205_v18 = vsel %vm5697_vm11, %v5603_v28, %v3201_v35  ;;  %v2755_v43 = vsel %vm5706_vm15, %v5608_v24, %v2751_v25  ;;  %v2099_v2 = vmul.f32 %v4094_v7, %v5615_v40  ;;  %v1509_v4 = vmul.f32 1.442695, %v1430_v41  ;;  %v823_v40 = vpop.f32.mrf.mxu1 }
 0x234   :  { %v5723_v42 = vpop.eup %3920  ;;  %v3213_v59 = vmul.f32 %v5691_v10, %v5637_v17  ;;  %v1919_v44 = vadd.f32 %v1918_v55, %v1917_v57  ;;  %v1709_v53 = vadd.f32 %v1708_v36, %v1707_v6  ;;  %v1290_v1 = vrot.slane %v1289_v45, 4 }
 0x235   :  { %vm2757_vm1 = vcmp.eq.f32.partialorder %v2756_v62, 8.507059e+37  ;;  %v2759_v28 = vor.u32 1.1754944e-38, %v2758_v5  ;;  %v2218_v47 = vrot.slane %v2217_v27, 4  ;;  %3922 = vpow2.f32 %v1509_v4 }
 0x236   :  { %v2423_v24 = vrot.slane %v2422_v39, 2  ;;  %v2213_v31 = vrot.slane %v2212_v37, 2  ;;  %v1710_v52 = vrot.slane %v1709_v53, 1  ;;  %v1922_v46 = vsel %vm92_vm0, %v5711_v3, 0.0 }
 0x237   :  { %v3210_v49 = vsel %vm5678_vm6, %v5658_v51, %v3205_v18  ;;  %v2760_v50 = vsel %vm2757_vm1, %v2759_v28, %v2755_v43  ;;  %v2763_v54 = vmul.f32 %v5723_v42, %v5665_v11  ;;  %v2427_v13 = vsel %vm92_vm0, %v2099_v2, 0.0 }
 0x238   :  { %v3214_v29 = vsub.f32 1.0, %v3213_v59  ;;  %v1920_v21 = vrot.slane %v1919_v44, 1  ;;  %v5735_v63 = vadd.f32 %v1710_v52, %v1709_v53  ;;  %v1291_v38 = vmax.f32 %v1289_v45, %v1290_v1 }
 0x239   :  { %v2209_v20 = vadd.f32 %v2208_v23, %v2207_v22  ;;  %v2219_v8 = vadd.f32 %v2218_v47, %v2217_v27  ;;  %v1923_v9 = vrot.slane %v1922_v46, 4  ;;  %v5738_v57 = vadd.f32 %v5469_v32, %v823_v40 }
 0x23a   :  { %v3607_v51 = vsel %vm3595_vm13, %v2746_v26, %v5595_v61  ;;  %v5742_v33 = vadd.f32 %v2423_v24, %v2422_v39  ;;  %v2214_v19 = vadd.f32 %v2213_v31, %v2212_v37  ;;  %3924 = vrcp.f32 %v5735_v63  ;;  %v916_v37 = vpop.f32.mrf.mxu3 }
 0x23b   :  { %v3923_v48 = vpop.eup %3922  ;;  %v5746_v34 = vmul.f32 %v3210_v49, %v5646_v58  ;;  %v2761_v15 = vmul.f32 %v2760_v50, %v2209_v20  ;;  %v2764_v0 = vsub.f32 1.0, %v2763_v54  ;;  %v2428_v22 = vrot.slane %v2427_v13, 4  ;;  %v826_v28 = vpop.f32.mrf.mxu1 }
 0x23c   :  { %v3215_v14 = vmul.f32 %v5691_v10, %v3214_v29  ;;  %v5749_v60 = vadd.f32 %v1920_v21, %v1919_v44  ;;  %v1712_v35 = vsel %vm92_vm0, %v3923_v48, 0.0  ;;  %v1292_v25 = vrot.slane %v1291_v38, 2 }
 0x23d   :  { %v2220_v61 = vrot.slane %v2219_v8, 2  ;;  %v1924_v41 = vadd.f32 %v1923_v9, %v1922_v46  ;;  %v1713_v26 = vrot.slane %v1712_v35, 4  ;;  %v1079_v23 = vsel %vm92_vm0, %v5738_v57, -inf }
 0x23e   :  { %v2425_v55 = vrot.slane %v5742_v33, 1  ;;  %v3221_v58 = vand.u32 2147483647, %v5637_v17  ;;  %v2215_v6 = vrot.slane %v2214_v19, 1  ;;  %v2070_v62 = vmul.f32 %v4095_v30, %v3923_v48 }
 0x23f   :  { %v5760_v5 = vsel %vm3597_vm7, %v2761_v15, %v3607_v51  ;;  %v3223_v45 = vand.u32 2147483648, %v5637_v17  ;;  %v2765_v12 = vmul.f32 %v5723_v42, %v2764_v0  ;;  %v1714_v39 = vadd.f32 %v1713_v26, %v1712_v35 }
 0x240   :  { %v5764_v36 = vpop.eup %3924  ;;  %v5767_v27 = vadd.f32 %v5691_v10, %v3215_v14  ;;  %v5769_v18 = vadd.f32 %v2428_v22, %v2427_v13  ;;  %v1293_v43 = vmax.f32 %v1291_v38, %v1292_v25  ;;  %v1080_v7 = vrot.slane %v1079_v23, 4 }
 0x241   :  { %3926 = vrcp.f32 %v5749_v60  ;;  %v2221_v2 = vadd.f32 %v2220_v61, %v2219_v8  ;;  %v2778_v4 = vmul.f32 %v5764_v36, %v5735_v63  ;;  %v1925_v59 = vrot.slane %v1924_v41, 2  ;;  %v4096_v61 = vld [vmem:[%s7353_s0 + $0x168] sm:$0xff] }
 0x242   :  { %v2216_v44 = vadd.f32 %v2215_v6, %v2214_v19  ;;  %vm2767_vm4 = vweird.f32 %v5665_v11  ;;  %v1715_v53 = vrot.slane %v1714_v39, 2  ;;  %v2224_v1 = vsel %vm92_vm0, %v2070_v62, 0.0  ;;  %v919_v26 = vpop.f32.mrf.mxu3 }
 0x243   :  { %v2766_v47 = vadd.f32 %v5723_v42, %v2765_v12  ;;  %vm2768_vm5 = vweird.f32 %v5723_v42  ;;  %v2773_v24 = vand.u32 2147483648, %v5665_v11  ;;  %v2779_v31 = vsub.f32 1.0, %v2778_v4 }
 0x244   :  { %v1716_v52 = vadd.f32 %v1715_v53, %v1714_v39  ;;  %v1294_v46 = vrot.slane %v1293_v43, 1  ;;  %v1081_v40 = vmax.f32 %v1079_v23, %v1080_v7  ;;  %v5780_v49 = vadd.f32 %v5469_v32, %v916_v37  ;;  %vm5785_vm6 = vmor %vm2767_vm4, %vm2768_vm5  ;;  %v829_v7 = vpop.f32.mrf.mxu1 }
 0x245   :  { %v2771_v50 = vand.u32 2147483647, %v5665_v11  ;;  %v2222_v54 = vrot.slane %v2221_v2, 1  ;;  %v1926_v13 = vadd.f32 %v1925_v59, %v1924_v41  ;;  %v2225_v29 = vrot.slane %v2224_v1, 4 }
 0x246   :  { %v1717_v38 = vrot.slane %v1716_v52, 1  ;;  %v1295_v20 = vmax.f32 %v1293_v43, %v1294_v46  ;;  %v1082_v8 = vrot.slane %v1081_v40, 2  ;;  %v1296_v9 = vsel %vm92_vm0, %v5780_v49, -inf }
 0x247   :  { %v5791_v51 = vpop.eup %3926  ;;  %v2770_v19 = vsel %vm5785_vm6, %v5723_v42, %v2766_v47  ;;  %v2774_v48 = vor.u32 1.1754944e-38, %v2773_v24  ;;  %v2780_v15 = vmul.f32 %v5764_v36, %v2779_v31  ;;  %v5798_v11 = vadd.f32 %v5469_v32, %v826_v28 }
 0x248   :  { %v5800_v0 = vadd.f32 %v1717_v38, %v1716_v52  ;;  %v1461_v22 = vsub.f32 %v5676_v16, %v1295_v20  ;;  %v1083_v14 = vmax.f32 %v1081_v40, %v1082_v8  ;;  %v1297_v35 = vrot.slane %v1296_v9, 4 }
 0x249   :  { %vm2772_vm8 = vcmp.eq.f32.partialorder %v2771_v50, 8.507059e+37  ;;  %v1927_v25 = vrot.slane %v1926_v13, 1  ;;  %v5807_v42 = vmul.f32 %v4096_v61, %v5711_v3  ;;  %v2226_v41 = vadd.f32 %v2225_v29, %v2224_v1 }
 0x24a   :  { %v2775_v23 = vsel %vm2772_vm8, %v2774_v48, %v2770_v19  ;;  %v5811_v6 = vmul.f32 %v5791_v51, %v5749_v60  ;;  %v2223_v30 = vadd.f32 %v2222_v54, %v2221_v2  ;;  %3928 = vrcp.f32 %v5800_v0 }
 0x24b   :  { %v2781_v16 = vadd.f32 %v5764_v36, %v2780_v15  ;;  %vm2783_vm11 = vweird.f32 %v5764_v36  ;;  %v2788_v62 = vand.u32 2147483648, %v5735_v63  ;;  %v1086_v3 = vsel %vm92_vm0, %v5798_v11, -inf }
 0x24c   :  { %v1571_v12 = vmul.f32 1.442695, %v1461_v22  ;;  %v1084_v39 = vrot.slane %v1083_v14, 1  ;;  %v1298_v37 = vmax.f32 %v1296_v9, %v1297_v35  ;;  %v5820_v43 = vadd.f32 %v5469_v32, %v919_v26 }
 0x24d   :  { %vm2782_vm14 = vweird.f32 %v5735_v63  ;;  %v2786_v2 = vand.u32 2147483647, %v5735_v63  ;;  %v5824_v4 = vadd.f32 %v1927_v25, %v1926_v13  ;;  %v2227_v59 = vrot.slane %v2226_v41, 2 }
 0x24e   :  { %vm5826_vm15 = vmor %vm2782_vm14, %vm2783_vm11  ;;  %3930 = vpow2.f32 %v1571_v12  ;;  %v1085_v1 = vmax.f32 %v1083_v14, %v1084_v39  ;;  %v1299_v28 = vrot.slane %v1298_v37, 2  ;;  %v1087_v47 = vrot.slane %v1086_v3, 4 }
 0x24f   :  { %v2776_v24 = vmul.f32 %v2775_v23, %v2216_v44  ;;  %v2785_v31 = vsel %vm5826_vm15, %v5764_v36, %v2781_v16  ;;  %v2789_v52 = vor.u32 1.1754944e-38, %v2788_v62  ;;  %v5834_v46 = vadd.f32 %v5469_v32, %v829_v7 }
 0x250   :  { %v3929_v63 = vpop.eup %3928  ;;  %vm3218_vm1 = vweird.f32 %v5691_v10  ;;  %v1431_v40 = vsub.f32 %v5738_v57, %v1085_v1  ;;  %v1300_v50 = vmax.f32 %v1298_v37, %v1299_v28  ;;  %v1088_v54 = vmax.f32 %v1086_v3, %v1087_v47 }
 0x251   :  { %v1303_v13 = vsel %vm92_vm0, %v5820_v43, -inf  ;;  %vm2787_vm4 = vcmp.eq.f32.partialorder %v2786_v2, 8.507059e+37  ;;  %3932 = vrcp.f32 %v5824_v4  ;;  %v2228_v44 = vadd.f32 %v2227_v59, %v2226_v41 }
 0x252   :  { %v2793_v36 = vmul.f32 %v3929_v63, %v5800_v0  ;;  %vm3217_vm5 = vweird.f32 %v5637_v17  ;;  %v2790_v29 = vsel %vm2787_vm4, %v2789_v52, %v2785_v31  ;;  %v1301_v21 = vrot.slane %v1300_v50, 1  ;;  %v4097_v17 = vld [vmem:[%s7353_s0 + $0x170] sm:$0xff] }
 0x253   :  { %v1089_v38 = vrot.slane %v1088_v54, 2  ;;  %v1093_v20 = vsel %vm92_vm0, %v5834_v46, -inf  ;;  %v2801_v8 = vand.u32 2147483647, %v5800_v0  ;;  %v1304_v9 = vrot.slane %v1303_v13, 4  ;;  %vm5856_vm15 = vmor %vm3217_vm5, %vm3218_vm1 }
 0x254   :  { %v2794_v57 = vsub.f32 1.0, %v2793_v36  ;;  %v1094_v19 = vrot.slane %v1093_v20, 4  ;;  %v3931_v48 = vpop.eup %3930  ;;  %v2803_v15 = vand.u32 2147483648, %v5800_v0  ;;  %v1511_v22 = vmul.f32 1.442695, %v1431_v40 }
 0x255   :  { %v1302_v14 = vmax.f32 %v1300_v50, %v1301_v21  ;;  %v1090_v35 = vmax.f32 %v1088_v54, %v1089_v38  ;;  %v2229_v25 = vrot.slane %v2228_v44, 1  ;;  %vm2798_vm6 = vweird.f32 %v3929_v63 }
 0x256   :  { %v2795_v61 = vmul.f32 %v3929_v63, %v2794_v57  ;;  %v1929_v41 = vsel %vm92_vm0, %v3931_v48, 0.0  ;;  %v1095_v62 = vmax.f32 %v1093_v20, %v1094_v19  ;;  %v2791_v12 = vmul.f32 %v2790_v29, %v2223_v30  ;;  %v922_v19 = vpop.f32.mrf.mxu3 }
 0x257   :  { %v1930_v26 = vrot.slane %v1929_v41, 4  ;;  %v1462_v23 = vsub.f32 %v5780_v49, %v1302_v14  ;;  %v1091_v16 = vrot.slane %v1090_v35, 1  ;;  %v5849_v3 = vpop.eup %3932  ;;  %vm2797_vm8 = vweird.f32 %v5800_v0  ;;  %v4098_v14 = vld [vmem:[%s7353_s0 + $0x178] sm:$0xff] }
 0x258   :  { %v2796_v39 = vadd.f32 %v3929_v63, %v2795_v61  ;;  %v1305_v37 = vmax.f32 %v1303_v13, %v1304_v9  ;;  %vm2799_vm11 = vmor %vm2797_vm8, %vm2798_vm6  ;;  %v2804_v7 = vor.u32 1.1754944e-38, %v2803_v15  ;;  %3934 = vpow2.f32 %v1511_v22 }
 0x259   :  { %v1931_v2 = vadd.f32 %v1930_v26, %v1929_v41  ;;  %v1573_v59 = vmul.f32 1.442695, %v1462_v23  ;;  %v2230_v53 = vadd.f32 %v2229_v25, %v2228_v44  ;;  %vm2802_vm14 = vcmp.eq.f32.partialorder %v2801_v8, 8.507059e+37 }
 0x25a   :  { %v2800_v1 = vsel %vm2799_vm11, %v3929_v63, %v2796_v39  ;;  %v1092_v28 = vmax.f32 %v1090_v35, %v1091_v16  ;;  %v1096_v31 = vrot.slane %v1095_v62, 2  ;;  %vm5862_vm4 = vcmp.eq.f32.partialorder %v3221_v58, 8.507059e+37 }
 0x25b   :  { %v2805_v47 = vsel %vm2802_vm14, %v2804_v7, %v2800_v1  ;;  %v1932_v49 = vrot.slane %v1931_v2, 2  ;;  %3936 = vpow2.f32 %v1573_v59  ;;  %v3609_v52 = vsel %vm3599_vm10, %v2776_v24, %v5760_v5 }
 0x25c   :  { %v2806_v63 = vmul.f32 %v2805_v47, %v2230_v53  ;;  %v1306_v40 = vrot.slane %v1305_v37, 2  ;;  %v3220_v50 = vsel %vm5856_vm15, %v5691_v10, %v5767_v27  ;;  %v2430_v54 = vrot.slane %v5769_v18, 2 }
 0x25d   :  { %v3610_v13 = vsel %vm3601_vm2, %v2791_v12, %v3609_v52  ;;  %v1933_v44 = vadd.f32 %v1932_v49, %v1931_v2  ;;  %v3224_v58 = vor.u32 1.1754944e-38, %v3223_v45  ;;  %v3229_v36 = vsub.f32 1.0, %v5811_v6 }
 0x25e   :  { %v2434_v5 = vsel %vm92_vm0, %v5807_v42, 0.0  ;;  %v3611_v24 = vsel %vm3603_vm3, %v2806_v63, %v3610_v13  ;;  %v5880_v29 = vpop.eup %3934  ;;  %v2101_v45 = vmul.f32 %v4097_v17, %v3931_v48  ;;  %v1432_v27 = vsub.f32 %v5798_v11, %v1092_v28 }
 0x25f   :  { %3663 = vst.msk [vmem:[%s7357_s5 + $0x8] sm:$0xff] %vm92_vm0, %v3611_v24  ;;  %v1934_v10 = vrot.slane %v1933_v44, 1  ;;  %v1097_v6 = vmax.f32 %v1095_v62, %v1096_v31  ;;  %v5893_v42 = vsel %vm3593_vm12, %v5746_v34, %v5644_v56  ;;  %v2426_v21 = vadd.f32 %v2425_v55, %v5742_v33 }
 0x260   :  { %v3225_v38 = vsel %vm5862_vm4, %v3224_v58, %v3220_v50  ;;  %v1307_v20 = vmax.f32 %v1305_v37, %v1306_v40  ;;  %v2431_v8 = vadd.f32 %v2430_v54, %v5769_v18  ;;  %vm3232_vm1 = vweird.f32 %v5749_v60 }
 0x261   :  { %v3937_v57 = vpop.eup %3936  ;;  %v2435_v11 = vrot.slane %v2434_v5, 4  ;;  %v5902_v9 = vadd.f32 %v1934_v10, %v1933_v44  ;;  %v3230_v56 = vmul.f32 %v5791_v51, %v3229_v36  ;;  %v3243_v34 = vmul.f32 %v5849_v3, %v5824_v4 }
 0x262   :  { %v1719_v33 = vsel %vm92_vm0, %v5880_v29, 0.0  ;;  %v1936_v55 = vsel %vm92_vm0, %v3937_v57, 0.0  ;;  %v2441_v48 = vsel %vm92_vm0, %v2101_v45, 0.0  ;;  %v1513_v18 = vmul.f32 1.442695, %v1432_v27 }
 0x263   :  { %3938 = vrcp.f32 %v5902_v9  ;;  %v1098_v15 = vrot.slane %v1097_v6, 1  ;;  %v1937_v22 = vrot.slane %v1936_v55, 4  ;;  %v2102_v35 = vmul.f32 %v4098_v14, %v3937_v57 }
 0x264   :  { %v1308_v25 = vrot.slane %v1307_v20, 1  ;;  %v5916_v61 = vadd.f32 %v5469_v32, %v922_v19  ;;  %vm3233_vm5 = vweird.f32 %v5791_v51  ;;  %v3238_v41 = vand.u32 2147483648, %v5749_v60 }
 0x265   :  { %v2436_v26 = vadd.f32 %v2435_v11, %v2434_v5  ;;  %v1720_v23 = vrot.slane %v1719_v33, 4  ;;  %v3231_v16 = vadd.f32 %v5791_v51, %v3230_v56  ;;  %v3244_v62 = vsub.f32 1.0, %v3243_v34  ;;  %vm5931_vm6 = vmor %vm3232_vm1, %vm3233_vm5 }
 0x266   :  { %v2442_v12 = vrot.slane %v2441_v48, 4  ;;  %v1938_v39 = vadd.f32 %v1937_v22, %v1936_v55  ;;  %v2432_v37 = vrot.slane %v2431_v8, 1  ;;  %v3236_v7 = vand.u32 2147483647, %v5749_v60 }
 0x267   :  { %3940 = vpow2.f32 %v1513_v18  ;;  %v1099_v2 = vmax.f32 %v1097_v6, %v1098_v15  ;;  %v2448_v32 = vsel %vm92_vm0, %v2102_v35, 0.0  ;;  %v1309_v53 = vmax.f32 %v1307_v20, %v1308_v25 }
 0x268   :  { %v1939_v59 = vrot.slane %v1938_v39, 2  ;;  %v1310_v1 = vsel %vm92_vm0, %v5916_v61, -inf  ;;  %v3226_v47 = vmul.f32 %v3225_v38, %v2426_v21  ;;  %v3239_v31 = vor.u32 1.1754944e-38, %v3238_v41 }
 0x269   :  { %v5925_v28 = vpop.eup %3938  ;;  %v2437_v0 = vrot.slane %v2436_v26, 2  ;;  %v1721_v30 = vadd.f32 %v1720_v23, %v1719_v33  ;;  %v3235_v52 = vsel %vm5931_vm6, %v5791_v51, %v3231_v16  ;;  %v3245_v63 = vmul.f32 %v5849_v3, %v3244_v62  ;;  %v832_v23 = vpop.f32.mrf.mxu1 }
 0x26a   :  { %v2443_v40 = vadd.f32 %v2442_v12, %v2441_v48  ;;  %v3258_v50 = vmul.f32 %v5925_v28, %v5902_v9  ;;  %v1940_v54 = vadd.f32 %v1939_v59, %v1938_v39  ;;  %v2449_v13 = vrot.slane %v2448_v32, 4 }
 0x26b   :  { %v1433_v60 = vsub.f32 %v5834_v46, %v1099_v2  ;;  %v1311_v44 = vrot.slane %v1310_v1, 4  ;;  %v2433_v58 = vadd.f32 %v2432_v37, %v2431_v8  ;;  %vm3237_vm8 = vcmp.eq.f32.partialorder %v3236_v7, 8.507059e+37 }
 0x26c   :  { %v3259_v36 = vsub.f32 1.0, %v3258_v50  ;;  %v1463_v5 = vsub.f32 %v5820_v43, %v1309_v53  ;;  %v3240_v10 = vsel %vm3237_vm8, %v3239_v31, %v3235_v52  ;;  %v2438_v51 = vadd.f32 %v2437_v0, %v2436_v26  ;;  %v4099_v26 = vld [vmem:[%s7353_s0 + $0x80] sm:$0xff] }
 0x26d   :  { %v5943_v24 = vpop.eup %3940  ;;  %v1722_v17 = vrot.slane %v1721_v30, 2  ;;  %v1941_v45 = vrot.slane %v1940_v54, 1  ;;  %v3246_v27 = vadd.f32 %v5849_v3, %v3245_v63  ;;  %vm3247_vm11 = vweird.f32 %v5824_v4 }
 0x26e   :  { %vm3248_vm14 = vweird.f32 %v5849_v3  ;;  %v2444_v6 = vrot.slane %v2443_v40, 2  ;;  %v2450_v21 = vadd.f32 %v2449_v13, %v2448_v32  ;;  %v1515_v38 = vmul.f32 1.442695, %v1433_v60 }
 0x26f   :  { %v5948_v46 = vadd.f32 %v1941_v45, %v1940_v54  ;;  %v1312_v20 = vmax.f32 %v1310_v1, %v1311_v44  ;;  %v3253_v43 = vand.u32 2147483648, %v5824_v4  ;;  %v3260_v57 = vmul.f32 %v5925_v28, %v3259_v36  ;;  %vm5956_vm15 = vmor %vm3247_vm11, %vm3248_vm14  ;;  %v925_v36 = vpop.f32.mrf.mxu3 }
 0x270   :  { %v1726_v8 = vsel %vm92_vm0, %v5943_v24, 0.0  ;;  %v1575_v11 = vmul.f32 1.442695, %v1463_v5  ;;  %v3635_v19 = vsel %vm3595_vm13, %v3226_v47, %v5893_v42  ;;  %v3251_v34 = vand.u32 2147483647, %v5824_v4 }
 0x271   :  { %v1723_v33 = vadd.f32 %v1722_v17, %v1721_v30  ;;  %3942 = vrcp.f32 %v5948_v46  ;;  %v3241_v55 = vmul.f32 %v3240_v10, %v2433_v58  ;;  %v2439_v48 = vrot.slane %v2438_v51, 1  ;;  %v4100_v10 = vld [vmem:[%s7353_s0 + $0x88] sm:$0xff] }
 0x272   :  { %v3250_v18 = vsel %vm5956_vm15, %v5849_v3, %v3246_v27  ;;  %v2445_v15 = vadd.f32 %v2444_v6, %v2443_v40  ;;  %v2451_v22 = vrot.slane %v2450_v21, 2  ;;  %v1727_v14 = vrot.slane %v1726_v8, 4 }
 0x273   :  { %3944 = vpow2.f32 %v1515_v38  ;;  %v1313_v42 = vrot.slane %v1312_v20, 2  ;;  %v3254_v35 = vor.u32 1.1754944e-38, %v3253_v43  ;;  %v3261_v25 = vadd.f32 %v5925_v28, %v3260_v57  ;;  %v835_v57 = vpop.f32.mrf.mxu1 }
 0x274   :  { %vm3263_vm4 = vweird.f32 %v5925_v28  ;;  %3946 = vpow2.f32 %v1575_v11  ;;  %vm3252_vm1 = vcmp.eq.f32.partialorder %v3251_v34, 8.507059e+37  ;;  %v3268_v4 = vand.u32 2147483648, %v5902_v9 }
 0x275   :  { %v1724_v41 = vrot.slane %v1723_v33, 1  ;;  %v2071_v3 = vmul.f32 %v4099_v26, %v5880_v29  ;;  %v3255_v16 = vsel %vm3252_vm1, %v3254_v35, %v3250_v18  ;;  %v2446_v62 = vrot.slane %v2445_v15, 1 }
 0x276   :  { %vm3262_vm5 = vweird.f32 %v5902_v9  ;;  %v3266_v12 = vand.u32 2147483647, %v5902_v9  ;;  %v2440_v37 = vadd.f32 %v2439_v48, %v2438_v51  ;;  %v2452_v2 = vadd.f32 %v2451_v22, %v2450_v21 }
 0x277   :  { %v3943_v39 = vpop.eup %3942  ;;  %vm5974_vm6 = vmor %vm3262_vm5, %vm3263_vm4  ;;  %v1728_v59 = vadd.f32 %v1727_v14, %v1726_v8  ;;  %v1314_v32 = vmax.f32 %v1312_v20, %v1313_v42  ;;  %v3636_v53 = vsel %vm3597_vm7, %v3241_v55, %v3635_v19  ;;  %v3269_v49 = vor.u32 1.1754944e-38, %v3268_v4  ;;  %v6005_v20 = vld [vmem:[%s7356_s4] ss:$0 sm:$0xff] }
 0x278   :  { %v3265_v29 = vsel %vm5974_vm6, %v5925_v28, %v3261_v25  ;;  %v3273_v1 = vmul.f32 %v3943_v39, %v5948_v46  ;;  %v3256_v9 = vmul.f32 %v3255_v16, %v2440_v37  ;;  %v5985_v31 = vadd.f32 %v1724_v41, %v1723_v33 }
 0x279   :  { %v5983_v47 = vpop.eup %3944  ;;  %v2231_v0 = vsel %vm92_vm0, %v2071_v3, 0.0  ;;  %v2447_v52 = vadd.f32 %v2446_v62, %v2445_v15  ;;  %vm3267_vm8 = vcmp.eq.f32.partialorder %v3266_v12, 8.507059e+37  ;;  %v3283_v40 = vand.u32 2147483648, %v5948_v46 }
 0x27a   :  { %v5988_v30 = vpop.eup %3946  ;;  %v3274_v63 = vsub.f32 1.0, %v3273_v1  ;;  %v3270_v50 = vsel %vm3267_vm8, %v3269_v49, %v3265_v29  ;;  %v2453_v54 = vrot.slane %v2452_v2, 1  ;;  %v1729_v28 = vrot.slane %v1728_v59, 2 }
 0x27b   :  { %v1315_v13 = vrot.slane %v1314_v32, 1  ;;  %vm3278_vm11 = vweird.f32 %v3943_v39  ;;  %v3281_v44 = vand.u32 2147483647, %v5948_v46  ;;  %v1733_v58 = vsel %vm92_vm0, %v5983_v47, 0.0 }
 0x27c   :  { %v3275_v60 = vmul.f32 %v3943_v39, %v3274_v63  ;;  %v2232_v5 = vrot.slane %v2231_v0, 4  ;;  %3948 = vrcp.f32 %v5985_v31  ;;  %v2072_v51 = vmul.f32 %v4100_v10, %v5943_v24 }
 0x27d   :  { %v1943_v17 = vsel %vm92_vm0, %v5988_v30, 0.0  ;;  %v3271_v45 = vmul.f32 %v3270_v50, %v2447_v52  ;;  %vm3277_vm14 = vweird.f32 %v5948_v46  ;;  %v3284_v6 = vor.u32 1.1754944e-38, %v3283_v40 }
 0x27e   :  { %v3276_v27 = vadd.f32 %v3943_v39, %v3275_v60  ;;  %vm3279_vm15 = vmor %vm3277_vm14, %vm3278_vm11  ;;  %v1734_v21 = vrot.slane %v1733_v58, 4  ;;  %v1316_v38 = vmax.f32 %v1314_v32, %v1315_v13  ;;  %v6008_v43 = vadd.f32 %v6005_v20, %v832_v23  ;;  %v928_v32 = vpop.f32.mrf.mxu3 }
 0x27f   :  { %v6011_v24 = vadd.f32 %v6005_v20, %v925_v36  ;;  %v2454_v8 = vadd.f32 %v2453_v54, %v2452_v2  ;;  %vm3282_vm4 = vcmp.eq.f32.partialorder %v3281_v44, 8.507059e+37  ;;  %v1730_v46 = vadd.f32 %v1729_v28, %v1728_v59 }
 0x280   :  { %v3280_v11 = vsel %vm3279_vm15, %v3943_v39, %v3276_v27  ;;  %v3637_v19 = vsel %vm3599_vm10, %v3256_v9, %v3636_v53  ;;  %v2233_v56 = vadd.f32 %v2232_v5, %v2231_v0  ;;  %v2238_v48 = vsel %vm92_vm0, %v2072_v51, 0.0  ;;  %v838_v53 = vpop.f32.mrf.mxu1  ;;  %v4102_v9 = vld [vmem:[%s7353_s0 + $0x180] sm:$0xff] }
 0x281   :  { %v3285_v34 = vsel %vm3282_vm4, %v3284_v6, %v3280_v11  ;;  %v3638_v33 = vsel %vm3601_vm2, %v3271_v45, %v3637_v19  ;;  %v1944_v18 = vrot.slane %v1943_v17, 4  ;;  %v1735_v22 = vadd.f32 %v1734_v21, %v1733_v58 }
 0x282   :  { %v3286_v55 = vmul.f32 %v3285_v34, %v2454_v8  ;;  %v6016_v15 = vpop.eup %3948  ;;  %v1464_v14 = vsub.f32 %v5916_v61, %v1316_v38  ;;  %v1100_v42 = vsel %vm92_vm0, %v6008_v43, -inf  ;;  %v1317_v35 = vsel %vm92_vm0, %v6011_v24, -inf }
 0x283   :  { %v1731_v4 = vrot.slane %v1730_v46, 1  ;;  %v2234_v41 = vrot.slane %v2233_v56, 2  ;;  %v1101_v3 = vrot.slane %v1100_v42, 4  ;;  %v1318_v23 = vrot.slane %v1317_v35, 4 }
 0x284   :  { %v3639_v25 = vsel %vm3603_vm3, %v3286_v55, %v3638_v33  ;;  %v1577_v26 = vmul.f32 1.442695, %v1464_v14  ;;  %v2239_v16 = vrot.slane %v2238_v48, 4  ;;  %v1945_v61 = vadd.f32 %v1944_v18, %v1943_v17 }
 0x285   :  { %3667 = vst.msk [vmem:[%s7357_s5 + $0x28] sm:$0xff] %vm92_vm0, %v3639_v25  ;;  %v6029_v62 = vadd.f32 %v6005_v20, %v835_v57  ;;  %v1736_v12 = vrot.slane %v1735_v22, 2  ;;  %v6031_v39 = vadd.f32 %v1731_v4, %v1730_v46  ;;  %v6033_v37 = vadd.f32 %v2234_v41, %v2233_v56 }
 0x286   :  { %3950 = vpow2.f32 %v1577_v26  ;;  %v2808_v7 = vmul.f32 %v6016_v15, %v5985_v31  ;;  %v1102_v2 = vmax.f32 %v1100_v42, %v1101_v3  ;;  %v1319_v59 = vmax.f32 %v1317_v35, %v1318_v23 }
 0x287   :  { %v2240_v29 = vadd.f32 %v2239_v16, %v2238_v48  ;;  %v1946_v1 = vrot.slane %v1945_v61, 2  ;;  %v2103_v49 = vmul.f32 %v4102_v9, %v5988_v30  ;;  %v1107_v0 = vsel %vm92_vm0, %v6029_v62, -inf }
 0x288   :  { %v1737_v52 = vadd.f32 %v1736_v12, %v1735_v22  ;;  %v1103_v63 = vrot.slane %v1102_v2, 2  ;;  %v1320_v40 = vrot.slane %v1319_v59, 2  ;;  %v1108_v50 = vrot.slane %v1107_v0, 4  ;;  %v4103_v12 = vld [vmem:[%s7353_s0 + $0x90] sm:$0xff] }
 0x289   :  { %3952 = vrcp.f32 %v6031_v39  ;;  %v6045_v54 = vadd.f32 %v6005_v20, %v928_v32  ;;  %v6048_v28 = vadd.f32 %v6005_v20, %v838_v53  ;;  %v2236_v13 = vrot.slane %v6033_v37, 1 }
 0x28a   :  { %v2809_v60 = vsub.f32 1.0, %v2808_v7  ;;  %v1104_v44 = vmax.f32 %v1102_v2, %v1103_v63  ;;  %v1321_v30 = vmax.f32 %v1319_v59, %v1320_v40  ;;  %v2816_v36 = vand.u32 2147483647, %v5985_v31 }
 0x28b   :  { %v2241_v5 = vrot.slane %v2240_v29, 2  ;;  %v1109_v10 = vmax.f32 %v1107_v0, %v1108_v50  ;;  %v1324_v51 = vsel %vm92_vm0, %v6045_v54, -inf  ;;  %v1947_v17 = vadd.f32 %v1946_v1, %v1945_v61 }
 0x28c   :  { %v6051_v58 = vpop.eup %3950  ;;  %v2455_v45 = vsel %vm92_vm0, %v2103_v49, 0.0  ;;  %v1738_v27 = vrot.slane %v1737_v52, 1  ;;  %v1105_v38 = vrot.slane %v1104_v44, 1  ;;  %v1322_v57 = vrot.slane %v1321_v30, 1 }
 0x28d   :  { %v1950_v6 = vsel %vm92_vm0, %v6051_v58, 0.0  ;;  %v1114_v8 = vsel %vm92_vm0, %v6048_v28, -inf  ;;  %v2810_v11 = vmul.f32 %v6016_v15, %v2809_v60  ;;  %vm2813_vm1 = vweird.f32 %v6016_v15 }
 0x28e   :  { %v1951_v21 = vrot.slane %v1950_v6, 4  ;;  %v1110_v46 = vrot.slane %v1109_v10, 2  ;;  %v1325_v19 = vrot.slane %v1324_v51, 4  ;;  %v2456_v34 = vrot.slane %v2455_v45, 4 }
 0x28f   :  { %v6063_v56 = vpop.eup %3952  ;;  %v1106_v55 = vmax.f32 %v1104_v44, %v1105_v38  ;;  %v1323_v48 = vmax.f32 %v1321_v30, %v1322_v57  ;;  %v6065_v18 = vadd.f32 %v1738_v27, %v1737_v52  ;;  %v1115_v42 = vrot.slane %v1114_v8, 4 }
 0x290   :  { %v1952_v33 = vadd.f32 %v1951_v21, %v1950_v6  ;;  %v1111_v22 = vmax.f32 %v1109_v10, %v1110_v46  ;;  %v1326_v14 = vmax.f32 %v1324_v51, %v1325_v19  ;;  %v1948_v35 = vrot.slane %v1947_v17, 1 }
 0x291   :  { %v1434_v4 = vsub.f32 %v6008_v43, %v1106_v55  ;;  %v1465_v41 = vsub.f32 %v6011_v24, %v1323_v48  ;;  %v2823_v26 = vmul.f32 %v6063_v56, %v6031_v39  ;;  %v1116_v16 = vmax.f32 %v1114_v8, %v1115_v42  ;;  %v4104_v42 = vld [vmem:[%s7353_s0 + $0x188] sm:$0xff] }
 0x292   :  { %v1953_v25 = vrot.slane %v1952_v33, 2  ;;  %v1112_v3 = vrot.slane %v1111_v22, 1  ;;  %v1327_v23 = vrot.slane %v1326_v14, 2  ;;  %v2242_v61 = vadd.f32 %v2241_v5, %v2240_v29 }
 0x293   :  { %v2073_v7 = vmul.f32 %v4103_v12, %v5983_v47  ;;  %v1517_v59 = vmul.f32 1.442695, %v1434_v4  ;;  %3954 = vrcp.f32 %v6065_v18  ;;  %v1579_v43 = vmul.f32 1.442695, %v1465_v41 }
 0x294   :  { %v1954_v2 = vadd.f32 %v1953_v25, %v1952_v33  ;;  %v1113_v32 = vmax.f32 %v1111_v22, %v1112_v3  ;;  %v1328_v24 = vmax.f32 %v1326_v14, %v1327_v23  ;;  %v2811_v53 = vadd.f32 %v6016_v15, %v2810_v11  ;;  %v931_v22 = vpop.f32.mrf.mxu3 }
 0x295   :  { %v6077_v1 = vadd.f32 %v1948_v35, %v1947_v17  ;;  %v2457_v9 = vadd.f32 %v2456_v34, %v2455_v45  ;;  %3956 = vpow2.f32 %v1517_v59  ;;  %v2824_v29 = vsub.f32 1.0, %v2823_v26 }
 0x296   :  { %3958 = vpow2.f32 %v1579_v43  ;;  %v1435_v49 = vsub.f32 %v6029_v62, %v1113_v32  ;;  %v1117_v0 = vrot.slane %v1116_v16, 2  ;;  %v2818_v47 = vand.u32 2147483648, %v5985_v31  ;;  %v4105_v43 = vld [vmem:[%s7353_s0 + $0x98] sm:$0xff] }
 0x297   :  { %v1955_v52 = vrot.slane %v1954_v2, 1  ;;  %vm2812_vm5 = vweird.f32 %v5985_v31  ;;  %v2243_v63 = vrot.slane %v2242_v61, 1  ;;  %v2245_v40 = vsel %vm92_vm0, %v2073_v7, 0.0 }
 0x298   :  { %v1329_v50 = vrot.slane %v1328_v24, 1  ;;  %v2237_v60 = vadd.f32 %v2236_v13, %v6033_v37  ;;  %vm6086_vm6 = vmor %vm2812_vm5, %vm2813_vm1  ;;  %v2458_v30 = vrot.slane %v2457_v9, 2  ;;  %3960 = vrcp.f32 %v6077_v1 }
 0x299   :  { %v1519_v62 = vmul.f32 1.442695, %v1435_v49  ;;  %v6091_v5 = vpop.eup %3954  ;;  %v2815_v10 = vsel %vm6086_vm6, %v6016_v15, %v2811_v53  ;;  %vm2817_vm8 = vcmp.eq.f32.partialorder %v2816_v36, 8.507059e+37  ;;  %v2825_v37 = vmul.f32 %v6063_v56, %v2824_v29  ;;  %v4106_v53 = vld [vmem:[%s7353_s0 + $0x190] sm:$0xff] }
 0x29a   :  { %v1118_v13 = vmax.f32 %v1116_v16, %v1117_v0  ;;  %v2819_v17 = vor.u32 1.1754944e-38, %v2818_v47  ;;  %v2831_v45 = vand.u32 2147483647, %v6031_v39  ;;  %v2246_v27 = vrot.slane %v2245_v40, 4 }
 0x29b   :  { %v3957_v51 = vpop.eup %3956  ;;  %v6100_v6 = vadd.f32 %v1955_v52, %v1954_v2  ;;  %v6102_v38 = vadd.f32 %v2243_v63, %v2242_v61  ;;  %vm2827_vm11 = vweird.f32 %v6031_v39  ;;  %v2833_v15 = vand.u32 2147483648, %v6031_v39 }
 0x29c   :  { %v3959_v21 = vpop.eup %3958  ;;  %v1330_v57 = vmax.f32 %v1328_v24, %v1329_v50  ;;  %v2820_v31 = vsel %vm2817_vm8, %v2819_v17, %v2815_v10  ;;  %v2459_v36 = vadd.f32 %v2458_v30, %v2457_v9  ;;  %v1740_v8 = vsel %vm92_vm0, %v3957_v51, 0.0 }
 0x29d   :  { %3962 = vpow2.f32 %v1519_v62  ;;  %v2826_v11 = vadd.f32 %v6063_v56, %v2825_v37  ;;  %vm2828_vm14 = vweird.f32 %v6063_v56  ;;  %v1957_v46 = vsel %vm92_vm0, %v3959_v21, 0.0 }
 0x29e   :  { %v1119_v19 = vrot.slane %v1118_v13, 1  ;;  %v6110_v34 = vpop.eup %3960  ;;  %vm6112_vm15 = vcmp.eq.f32.partialorder %v2831_v45, 8.507059e+37  ;;  %v2247_v55 = vadd.f32 %v2246_v27, %v2245_v40  ;;  %v2838_v48 = vmul.f32 %v6091_v5, %v6065_v18  ;;  %vm6130_vm4 = vmor %vm2827_vm11, %vm2828_vm14 }
 0x29f   :  { %3964 = vrcp.f32 %v6100_v6  ;;  %v2834_v14 = vor.u32 1.1754944e-38, %v2833_v15  ;;  %v2104_v35 = vmul.f32 %v4104_v42, %v6051_v58  ;;  %v1741_v25 = vrot.slane %v1740_v8, 4 }
 0x2a0   :  { %v1466_v4 = vsub.f32 %v6045_v54, %v1330_v57  ;;  %v6124_v41 = vmul.f32 %v2820_v31, %v2237_v60  ;;  %v2460_v3 = vrot.slane %v2459_v36, 1  ;;  %v3298_v23 = vand.u32 2147483648, %v6077_v1 }
 0x2a1   :  { %v1958_v16 = vrot.slane %v1957_v46, 4  ;;  %v2830_v58 = vsel %vm6130_vm4, %v6063_v56, %v2826_v11  ;;  %v3288_v54 = vmul.f32 %v6110_v34, %v6077_v1  ;;  %v1120_v61 = vmax.f32 %v1118_v13, %v1119_v19 }
 0x2a2   :  { %v6141_v12 = vadd.f32 %v6005_v20, %v931_v22  ;;  %v3296_v7 = vand.u32 2147483647, %v6077_v1  ;;  %v2248_v2 = vrot.slane %v2247_v55, 2  ;;  %v2839_v59 = vsub.f32 1.0, %v2838_v48  ;;  %v841_v48 = vpop.f32.mrf.mxu1 }
 0x2a3   :  { %v6143_v39 = vpop.eup %3962  ;;  %v2074_v32 = vmul.f32 %v4105_v43, %v3957_v51  ;;  %v2462_v56 = vsel %vm92_vm0, %v2104_v35, 0.0  ;;  %v1742_v24 = vadd.f32 %v1741_v25, %v1740_v8  ;;  %v2105_v9 = vmul.f32 %v4106_v53, %v3959_v21 }
 0x2a4   :  { %v1581_v29 = vmul.f32 1.442695, %v1466_v4  ;;  %v2835_v0 = vsel %vm6112_vm15, %v2834_v14, %v2830_v58  ;;  %v6157_v47 = vadd.f32 %v2460_v3, %v2459_v36  ;;  %v6159_v52 = vor.u32 1.1754944e-38, %v3298_v23 }
 0x2a5   :  { %v6153_v49 = vpop.eup %3964  ;;  %v1959_v63 = vadd.f32 %v1958_v16, %v1957_v46  ;;  %v3289_v40 = vsub.f32 1.0, %v3288_v54  ;;  %vm3293_vm1 = vweird.f32 %v6110_v34  ;;  %v1747_v50 = vsel %vm92_vm0, %v6143_v39, 0.0 }
 0x2a6   :  { %v1436_v60 = vsub.f32 %v6048_v28, %v1120_v61  ;;  %v1331_v44 = vsel %vm92_vm0, %v6141_v12, -inf  ;;  %v2249_v30 = vadd.f32 %v2248_v2, %v2247_v55  ;;  %v2840_v62 = vmul.f32 %v6091_v5, %v2839_v59 }
 0x2a7   :  { %v2463_v10 = vrot.slane %v2462_v56, 4  ;;  %v2252_v37 = vsel %vm92_vm0, %v2074_v32, 0.0  ;;  %vm3292_vm5 = vweird.f32 %v6077_v1  ;;  %v3303_v13 = vmul.f32 %v6153_v49, %v6100_v6  ;;  %v4107_v1 = vld [vmem:[%s7353_s0 + $0xa0] sm:$0xff] }
 0x2a8   :  { %v1743_v51 = vrot.slane %v1742_v24, 2  ;;  %v2469_v17 = vsel %vm92_vm0, %v2105_v9, 0.0  ;;  %3966 = vpow2.f32 %v1581_v29  ;;  %vm2842_vm6 = vweird.f32 %v6065_v18  ;;  %vm6206_vm15 = vmor %vm3292_vm5, %vm3293_vm1 }
 0x2a9   :  { %v1960_v28 = vrot.slane %v1959_v63, 2  ;;  %v1748_v45 = vrot.slane %v1747_v50, 4  ;;  %v1332_v27 = vrot.slane %v1331_v44, 4  ;;  %v3290_v21 = vmul.f32 %v6110_v34, %v3289_v40 }
 0x2aa   :  { %v2846_v15 = vand.u32 2147483647, %v6065_v18  ;;  %v2253_v57 = vrot.slane %v2252_v37, 4  ;;  %v1521_v31 = vmul.f32 1.442695, %v1436_v60  ;;  %v2841_v36 = vadd.f32 %v6091_v5, %v2840_v62 }
 0x2ab   :  { %vm2843_vm8 = vweird.f32 %v6091_v5  ;;  %v2464_v8 = vadd.f32 %v2463_v10, %v2462_v56  ;;  %v2470_v11 = vrot.slane %v2469_v17, 4  ;;  %v2250_v46 = vrot.slane %v2249_v30, 1 }
 0x2ac   :  { %v2848_v19 = vand.u32 2147483648, %v6065_v18  ;;  %v3304_v33 = vsub.f32 1.0, %v3303_v13  ;;  %v1744_v55 = vadd.f32 %v1743_v51, %v1742_v24  ;;  %v6180_v22 = vmul.f32 %v2835_v0, %v6102_v38  ;;  %vm6187_vm11 = vmor %vm2842_vm6, %vm2843_vm8 }
 0x2ad   :  { %v1961_v14 = vadd.f32 %v1960_v28, %v1959_v63  ;;  %v1749_v42 = vadd.f32 %v1748_v45, %v1747_v50  ;;  %v1333_v35 = vmax.f32 %v1331_v44, %v1332_v27  ;;  %v3291_v4 = vadd.f32 %v6110_v34, %v3290_v21 }
 0x2ae   :  { %v6182_v25 = vpop.eup %3966  ;;  %vm6191_vm14 = vcmp.eq.f32.partialorder %v2846_v15, 8.507059e+37  ;;  %v2254_v23 = vadd.f32 %v2253_v57, %v2252_v37  ;;  %3968 = vpow2.f32 %v1521_v31  ;;  %v2845_v38 = vsel %vm6187_vm11, %v6091_v5, %v2841_v36 }
 0x2af   :  { %v2465_v16 = vrot.slane %v2464_v8, 2  ;;  %v2471_v58 = vadd.f32 %v2470_v11, %v2469_v17  ;;  %v6199_v54 = vadd.f32 %v6005_v20, %v841_v48  ;;  %v2251_v18 = vadd.f32 %v2250_v46, %v2249_v30 }
 0x2b0   :  { %v2849_v61 = vor.u32 1.1754944e-38, %v2848_v19  ;;  %v3305_v2 = vmul.f32 %v6153_v49, %v3304_v33  ;;  %v1745_v59 = vrot.slane %v1744_v55, 1  ;;  %vm6212_vm4 = vcmp.eq.f32.partialorder %v3296_v7, 8.507059e+37  ;;  %v934_v19 = vpop.f32.mrf.mxu3 }
 0x2b1   :  { %v1962_v32 = vrot.slane %v1961_v14, 1  ;;  %v1750_v56 = vrot.slane %v1749_v42, 2  ;;  %v1964_v24 = vsel %vm92_vm0, %v6182_v25, 0.0  ;;  %v1334_v53 = vrot.slane %v1333_v35, 2 }
 0x2b2   :  { %v3295_v9 = vsel %vm6206_vm15, %v6110_v34, %v3291_v4  ;;  %v2850_v29 = vsel %vm6191_vm14, %v2849_v61, %v2845_v38  ;;  %v2255_v0 = vrot.slane %v2254_v23, 2  ;;  %v2075_v7 = vmul.f32 %v4107_v1, %v6143_v39 }
 0x2b3   :  { %v2466_v63 = vadd.f32 %v2465_v16, %v2464_v8  ;;  %v3313_v40 = vand.u32 2147483648, %v6100_v6  ;;  %v2472_v50 = vrot.slane %v2471_v58, 2  ;;  %v1121_v60 = vsel %vm92_vm0, %v6199_v54, -inf }
 0x2b4   :  { %v6230_v44 = vpop.eup %3968  ;;  %v3306_v34 = vadd.f32 %v6153_v49, %v3305_v2  ;;  %vm3308_vm1 = vweird.f32 %v6153_v49  ;;  %v6234_v30 = vadd.f32 %v1745_v59, %v1744_v55  ;;  %v1965_v62 = vrot.slane %v1964_v24, 4 }
 0x2b5   :  { %v6236_v10 = vadd.f32 %v1962_v32, %v1961_v14  ;;  %v1751_v37 = vadd.f32 %v1750_v56, %v1749_v42  ;;  %v1754_v39 = vsel %vm92_vm0, %v6230_v44, 0.0  ;;  %v1335_v13 = vmax.f32 %v1333_v35, %v1334_v53 }
 0x2b6   :  { %vm3307_vm5 = vweird.f32 %v6100_v6  ;;  %v3311_v51 = vand.u32 2147483647, %v6100_v6  ;;  %v2256_v17 = vadd.f32 %v2255_v0, %v2254_v23  ;;  %v2259_v28 = vsel %vm92_vm0, %v2075_v7, 0.0 }
 0x2b7   :  { %v2467_v45 = vrot.slane %v2466_v63, 1  ;;  %vm6243_vm6 = vmor %vm3307_vm5, %vm3308_vm1  ;;  %v3314_v21 = vor.u32 1.1754944e-38, %v3313_v40  ;;  %v2473_v15 = vadd.f32 %v2472_v50, %v2471_v58  ;;  %v1755_v57 = vrot.slane %v1754_v39, 4 }
 0x2b8   :  { %v3310_v31 = vsel %vm6243_vm6, %v6153_v49, %v3306_v34  ;;  %3970 = vrcp.f32 %v6234_v30  ;;  %v1966_v36 = vadd.f32 %v1965_v62, %v1964_v24  ;;  %v1122_v8 = vrot.slane %v1121_v60, 4  ;;  %v844_v24 = vpop.f32.mrf.mxu1 }
 0x2b9   :  { %3972 = vrcp.f32 %v6236_v10  ;;  %v1752_v6 = vrot.slane %v1751_v37, 1  ;;  %v2260_v11 = vrot.slane %v2259_v28, 4  ;;  %v1336_v46 = vrot.slane %v1335_v13, 1 }
 0x2ba   :  { %v3300_v33 = vsel %vm6212_vm4, %v6159_v52, %v3295_v9  ;;  %v2851_v55 = vmul.f32 %v2850_v29, %v2251_v18  ;;  %vm3312_vm8 = vcmp.eq.f32.partialorder %v3311_v51, 8.507059e+37  ;;  %v2257_v48 = vrot.slane %v2256_v17, 1 }
 0x2bb   :  { %v3612_v49 = vsel %vm3591_vm9, %v6180_v22, %v6124_v41  ;;  %v2468_v14 = vadd.f32 %v2467_v45, %v2466_v63  ;;  %v3315_v42 = vsel %vm3312_vm8, %v3314_v21, %v3310_v31  ;;  %v1756_v35 = vadd.f32 %v1755_v57, %v1754_v39  ;;  %v937_v21 = vpop.f32.mrf.mxu3 }
 0x2bc   :  { %v2474_v4 = vrot.slane %v2473_v15, 1  ;;  %v1967_v26 = vrot.slane %v1966_v36, 2  ;;  %v1123_v3 = vmax.f32 %v1121_v60, %v1122_v8  ;;  %v6259_v23 = vadd.f32 %v6005_v20, %v934_v19 }
 0x2bd   :  { %v3301_v38 = vmul.f32 %v3300_v33, %v6157_v47  ;;  %v6262_v16 = vadd.f32 %v1752_v6, %v1751_v37  ;;  %v2261_v52 = vadd.f32 %v2260_v11, %v2259_v28  ;;  %v1337_v58 = vmax.f32 %v1335_v13, %v1336_v46  ;;  %v4108_v47 = vld [vmem:[%s7353_s0 + $0x198] sm:$0xff] }
 0x2be   :  { %v6264_v18 = vpop.eup %3970  ;;  %v6267_v61 = vsel %vm3593_vm12, %v2851_v55, %v3612_v49  ;;  %v3316_v41 = vmul.f32 %v3315_v42, %v2468_v14  ;;  %v6269_v22 = vadd.f32 %v2257_v48, %v2256_v17  ;;  %v2861_v2 = vand.u32 2147483647, %v6234_v30 }
 0x2bf   :  { %v6272_v59 = vpop.eup %3972  ;;  %v2863_v43 = vand.u32 2147483648, %v6234_v30  ;;  %v2106_v5 = vmul.f32 %v4108_v47, %v6182_v25  ;;  %v1757_v32 = vrot.slane %v1756_v35, 2  ;;  %v1467_v56 = vsub.f32 %v6141_v12, %v1337_v58 }
 0x2c0   :  { %v6280_v53 = vadd.f32 %v2474_v4, %v2473_v15  ;;  %v1968_v9 = vadd.f32 %v1967_v26, %v1966_v36  ;;  %v1124_v29 = vrot.slane %v1123_v3, 2  ;;  %v1338_v0 = vsel %vm92_vm0, %v6259_v23, -inf }
 0x2c1   :  { %v2853_v1 = vmul.f32 %v6264_v18, %v6234_v30  ;;  %v2262_v7 = vrot.slane %v2261_v52, 2  ;;  %3974 = vrcp.f32 %v6262_v16  ;;  %v1583_v63 = vmul.f32 1.442695, %v1467_v56 }
 0x2c2   :  { %v3318_v25 = vmul.f32 %v6272_v59, %v6236_v10  ;;  %v1125_v40 = vmax.f32 %v1123_v3, %v1124_v29  ;;  %v1339_v12 = vrot.slane %v1338_v0, 4  ;;  %v6290_v50 = vadd.f32 %v6005_v20, %v844_v24 }
 0x2c3   :  { %v3326_v60 = vand.u32 2147483647, %v6236_v10  ;;  %v3328_v34 = vand.u32 2147483648, %v6236_v10  ;;  %v2476_v62 = vsel %vm92_vm0, %v2106_v5, 0.0  ;;  %v1758_v37 = vadd.f32 %v1757_v32, %v1756_v35 }
 0x2c4   :  { %v6296_v39 = vsel %vm3591_vm9, %v3316_v41, %v3301_v38  ;;  %v6298_v13 = vor.u32 1.1754944e-38, %v2863_v43  ;;  %v1969_v51 = vrot.slane %v1968_v9, 1  ;;  %3976 = vpow2.f32 %v1583_v63 }
 0x2c5   :  { %v2263_v17 = vadd.f32 %v2262_v7, %v2261_v52  ;;  %v1126_v28 = vrot.slane %v1125_v40, 1  ;;  %v1340_v45 = vmax.f32 %v1338_v0, %v1339_v12  ;;  %v1128_v27 = vsel %vm92_vm0, %v6290_v50, -inf }
 0x2c6   :  { %v2854_v15 = vsub.f32 1.0, %v2853_v1  ;;  %v3319_v57 = vsub.f32 1.0, %v3318_v25  ;;  %v2477_v31 = vrot.slane %v2476_v62, 4  ;;  %v1129_v36 = vrot.slane %v1128_v27, 4  ;;  %v847_v1 = vpop.f32.mrf.mxu1 }
 0x2c7   :  { %v6302_v8 = vpop.eup %3974  ;;  %v6304_v6 = vor.u32 1.1754944e-38, %v3328_v34  ;;  %v1759_v11 = vrot.slane %v1758_v37, 1  ;;  %v1127_v46 = vmax.f32 %v1125_v40, %v1126_v28  ;;  %v1341_v19 = vrot.slane %v1340_v45, 2 }
 0x2c8   :  { %vm2857_vm11 = vweird.f32 %v6234_v30  ;;  %vm2858_vm14 = vweird.f32 %v6264_v18  ;;  %v6308_v33 = vadd.f32 %v1969_v51, %v1968_v9  ;;  %v1130_v55 = vmax.f32 %v1128_v27, %v1129_v36 }
 0x2c9   :  { %v6311_v48 = vadd.f32 %v6005_v20, %v937_v21  ;;  %vm3322_vm15 = vweird.f32 %v6236_v10  ;;  %v2264_v49 = vrot.slane %v2263_v17, 1  ;;  %v2878_v14 = vand.u32 2147483648, %v6262_v16  ;;  %vm6355_vm6 = vmor %vm2857_vm11, %vm2858_vm14 }
 0x2ca   :  { %v1437_v42 = vsub.f32 %v6199_v54, %v1127_v46  ;;  %v1342_v35 = vmax.f32 %v1340_v45, %v1341_v19  ;;  %v6316_v4 = vpop.eup %3976  ;;  %v2855_v26 = vmul.f32 %v6264_v18, %v2854_v15  ;;  %v3320_v3 = vmul.f32 %v6272_v59, %v3319_v57  ;;  %v4109_v54 = vld [vmem:[%s7353_s0 + $0xa8] sm:$0xff] }
 0x2cb   :  { %v2478_v38 = vadd.f32 %v2477_v31, %v2476_v62  ;;  %v1131_v52 = vrot.slane %v1130_v55, 2  ;;  %v2868_v58 = vmul.f32 %v6302_v8, %v6262_v16  ;;  %v6322_v41 = vadd.f32 %v1759_v11, %v1758_v37 }
 0x2cc   :  { %v1523_v43 = vmul.f32 1.442695, %v1437_v42  ;;  %v1343_v47 = vrot.slane %v1342_v35, 1  ;;  %3978 = vrcp.f32 %v6308_v33  ;;  %v2076_v5 = vmul.f32 %v4109_v54, %v6230_v44 }
 0x2cd   :  { %v1132_v32 = vmax.f32 %v1130_v55, %v1131_v52  ;;  %v1345_v56 = vsel %vm92_vm0, %v6311_v48, -inf  ;;  %vm6333_vm4 = vcmp.eq.f32.partialorder %v2861_v2, 8.507059e+37  ;;  %vm6337_vm1 = vcmp.eq.f32.partialorder %v3326_v60, 8.507059e+37 }
 0x2ce   :  { %v1971_v29 = vsel %vm92_vm0, %v6316_v4, 0.0  ;;  %3980 = vpow2.f32 %v1523_v43  ;;  %v1344_v0 = vmax.f32 %v1342_v35, %v1343_v47  ;;  %v1346_v44 = vrot.slane %v1345_v56, 4 }
 0x2cf   :  { %v2856_v7 = vadd.f32 %v6264_v18, %v2855_v26  ;;  %v3321_v63 = vadd.f32 %v6272_v59, %v3320_v3  ;;  %vm3323_vm5 = vweird.f32 %v6272_v59  ;;  %v1133_v2 = vrot.slane %v1132_v32, 1 }
 0x2d0   :  { %v2869_v25 = vsub.f32 1.0, %v2868_v58  ;;  %v2479_v40 = vrot.slane %v2478_v38, 2  ;;  %3982 = vrcp.f32 %v6322_v41  ;;  %v1347_v12 = vmax.f32 %v1345_v56, %v1346_v44  ;;  %vm6372_vm8 = vmor %vm3322_vm15, %vm3323_vm5 }
 0x2d1   :  { %v2876_v60 = vand.u32 2147483647, %v6262_v16  ;;  %v1972_v34 = vrot.slane %v1971_v29, 4  ;;  %v1134_v62 = vmax.f32 %v1132_v32, %v1133_v2  ;;  %v6349_v37 = vadd.f32 %v6005_v20, %v847_v1  ;;  %v4110_v1 = vld [vmem:[%s7353_s0 + $0xb0] sm:$0xff] }
 0x2d2   :  { %v6359_v28 = vadd.f32 %v2264_v49, %v2263_v17  ;;  %v2266_v45 = vsel %vm92_vm0, %v2076_v5, 0.0  ;;  %v1468_v27 = vsub.f32 %v6259_v23, %v1344_v0  ;;  %v1348_v21 = vrot.slane %v1347_v12, 2  ;;  %v6363_v15 = vpop.eup %3978 }
 0x2d3   :  { %v2860_v57 = vsel %vm6355_vm6, %v6264_v18, %v2856_v7  ;;  %vm2873_vm11 = vweird.f32 %v6302_v8  ;;  %v6377_v17 = vor.u32 1.1754944e-38, %v2878_v14  ;;  %v1438_v23 = vsub.f32 %v6290_v50, %v1134_v62  ;;  %v940_v62 = vpop.f32.mrf.mxu3 }
 0x2d4   :  { %v3981_v31 = vpop.eup %3980  ;;  %v3325_v36 = vsel %vm6372_vm8, %v6272_v59, %v3321_v63  ;;  %v2870_v18 = vmul.f32 %v6302_v8, %v2869_v25  ;;  %vm2872_vm14 = vweird.f32 %v6262_v16  ;;  %v2480_v10 = vadd.f32 %v2479_v40, %v2478_v38 }
 0x2d5   :  { %v1349_v11 = vmax.f32 %v1347_v12, %v1348_v21  ;;  %v2267_v46 = vrot.slane %v2266_v45, 4  ;;  %v1973_v19 = vadd.f32 %v1972_v34, %v1971_v29  ;;  %v1761_v55 = vsel %vm92_vm0, %v3981_v31, 0.0 }
 0x2d6   :  { %v1135_v49 = vsel %vm92_vm0, %v6349_v37, -inf  ;;  %v6388_v14 = vpop.eup %3982  ;;  %v1762_v50 = vrot.slane %v1761_v55, 4  ;;  %v1585_v42 = vmul.f32 1.442695, %v1468_v27  ;;  %v1525_v35 = vmul.f32 1.442695, %v1438_v23 }
 0x2d7   :  { %v1350_v26 = vrot.slane %v1349_v11, 1  ;;  %v2865_v59 = vsel %vm6333_vm4, %v6298_v13, %v2860_v57  ;;  %v3330_v3 = vsel %vm6337_vm1, %v6304_v6, %v3325_v36  ;;  %v3333_v38 = vmul.f32 %v6363_v15, %v6308_v33  ;;  %vm6425_vm4 = vmor %vm2872_vm14, %vm2873_vm11  ;;  %v4111_v23 = vld [vmem:[%s7353_s0 + $0x1a0] sm:$0xff]  ;;  %v4112_v36 = vld [vmem:[%s7353_s0 + $0xb8] sm:$0xff] }
 0x2d8   :  { %v3343_v52 = vand.u32 2147483648, %v6308_v33  ;;  %v2481_v58 = vrot.slane %v2480_v10, 1  ;;  %v1763_v43 = vadd.f32 %v1762_v50, %v1761_v55  ;;  %3984 = vpow2.f32 %v1525_v35 }
 0x2d9   :  { %v1351_v47 = vmax.f32 %v1349_v11, %v1350_v26  ;;  %v2871_v54 = vadd.f32 %v6302_v8, %v2870_v18  ;;  %vm6400_vm15 = vcmp.eq.f32.partialorder %v2876_v60, 8.507059e+37  ;;  %v2883_v13 = vmul.f32 %v6388_v14, %v6322_v41 }
 0x2da   :  { %v1974_v32 = vrot.slane %v1973_v19, 2  ;;  %v1136_v6 = vrot.slane %v1135_v49, 4  ;;  %v2268_v56 = vadd.f32 %v2267_v46, %v2266_v45  ;;  %v1764_v24 = vrot.slane %v1763_v43, 2 }
 0x2db   :  { %3986 = vpow2.f32 %v1585_v42  ;;  %v1469_v9 = vsub.f32 %v6311_v48, %v1351_v47  ;;  %v6408_v29 = vmul.f32 %v2865_v59, %v6269_v22  ;;  %v3334_v0 = vsub.f32 1.0, %v3333_v38 }
 0x2dc   :  { %v3341_v44 = vand.u32 2147483647, %v6308_v33  ;;  %v2077_v7 = vmul.f32 %v4110_v1, %v3981_v31  ;;  %v6415_v63 = vmul.f32 %v3330_v3, %v6280_v53  ;;  %v6417_v2 = vadd.f32 %v2481_v58, %v2480_v10 }
 0x2dd   :  { %v6419_v25 = vor.u32 1.1754944e-38, %v3343_v52  ;;  %v1765_v40 = vadd.f32 %v1764_v24, %v1763_v43  ;;  %v2884_v48 = vsub.f32 1.0, %v2883_v13  ;;  %v1975_v12 = vadd.f32 %v1974_v32, %v1973_v19 }
 0x2de   :  { %v1587_v60 = vmul.f32 1.442695, %v1469_v9  ;;  %v1137_v34 = vmax.f32 %v1135_v49, %v1136_v6  ;;  %v3985_v53 = vpop.eup %3984  ;;  %v2875_v51 = vsel %vm6425_vm4, %v6302_v8, %v2871_v54  ;;  %vm3337_vm1 = vweird.f32 %v6308_v33 }
 0x2df   :  { %vm3338_vm5 = vweird.f32 %v6363_v15  ;;  %v2269_v45 = vrot.slane %v2268_v56, 2  ;;  %v1766_v16 = vrot.slane %v1765_v40, 1  ;;  %v3335_v27 = vmul.f32 %v6363_v15, %v3334_v0 }
 0x2e0   :  { %v2273_v21 = vsel %vm92_vm0, %v2077_v7, 0.0  ;;  %v1768_v57 = vsel %vm92_vm0, %v3985_v53, 0.0  ;;  %3988 = vpow2.f32 %v1587_v60  ;;  %v2107_v8 = vmul.f32 %v4111_v23, %v6316_v4  ;;  %vm6478_vm14 = vmor %vm3337_vm1, %vm3338_vm5 }
 0x2e1   :  { %v3987_v30 = vpop.eup %3986  ;;  %v6441_v31 = vadd.f32 %v1766_v16, %v1765_v40  ;;  %v2078_v18 = vmul.f32 %v4112_v36, %v3985_v53  ;;  %v6447_v10 = vadd.f32 %v6005_v20, %v940_v62  ;;  %v2885_v11 = vmul.f32 %v6388_v14, %v2884_v48 }
 0x2e2   :  { %v1976_v46 = vrot.slane %v1975_v12, 1  ;;  %v1769_v19 = vrot.slane %v1768_v57, 4  ;;  %v1138_v55 = vrot.slane %v1137_v34, 2  ;;  %v2880_v49 = vsel %vm6400_vm15, %v6377_v17, %v2875_v51 }
 0x2e3   :  { %v2270_v4 = vadd.f32 %v2269_v45, %v2268_v56  ;;  %v2274_v50 = vrot.slane %v2273_v21, 4  ;;  %3990 = vrcp.f32 %v6441_v31  ;;  %v3336_v42 = vadd.f32 %v6363_v15, %v3335_v27 }
 0x2e4   :  { %vm6455_vm6 = vcmp.eq.f32.partialorder %v3341_v44, 8.507059e+37  ;;  %vm2887_vm8 = vweird.f32 %v6322_v41  ;;  %v2893_v20 = vand.u32 2147483648, %v6322_v41  ;;  %v1978_v26 = vsel %vm92_vm0, %v3987_v30, 0.0 }
 0x2e5   :  { %vm2888_vm11 = vweird.f32 %v6388_v14  ;;  %v1770_v59 = vadd.f32 %v1769_v19, %v1768_v57  ;;  %v2280_v17 = vsel %vm92_vm0, %v2078_v18, 0.0  ;;  %v1352_v3 = vsel %vm92_vm0, %v6447_v10, -inf }
 0x2e6   :  { %v6466_v38 = vpop.eup %3988  ;;  %v2886_v52 = vadd.f32 %v6388_v14, %v2885_v11  ;;  %v6469_v58 = vadd.f32 %v1976_v46, %v1975_v12  ;;  %v2483_v43 = vsel %vm92_vm0, %v2107_v8, 0.0  ;;  %v1139_v47 = vmax.f32 %v1137_v34, %v1138_v55  ;;  %vm6492_vm15 = vmor %vm2887_vm8, %vm2888_vm11 }
 0x2e7   :  { %v2275_v54 = vadd.f32 %v2274_v50, %v2273_v21  ;;  %v1979_v5 = vrot.slane %v1978_v26, 4  ;;  %v1771_v13 = vrot.slane %v1770_v59, 2  ;;  %v1985_v32 = vsel %vm92_vm0, %v6466_v38, 0.0 }
 0x2e8   :  { %v2271_v56 = vrot.slane %v2270_v4, 1  ;;  %v2891_v24 = vand.u32 2147483647, %v6322_v41  ;;  %v2281_v9 = vrot.slane %v2280_v17, 4  ;;  %v1353_v0 = vrot.slane %v1352_v3, 4  ;;  %v4113_v41 = vld [vmem:[%s7353_s0 + $0x1a8] sm:$0xff] }
 0x2e9   :  { %v6483_v44 = vpop.eup %3990  ;;  %v3340_v1 = vsel %vm6478_vm14, %v6363_v15, %v3336_v42  ;;  %v2894_v7 = vor.u32 1.1754944e-38, %v2893_v20  ;;  %v2484_v40 = vrot.slane %v2483_v43, 4  ;;  %v1772_v22 = vadd.f32 %v1771_v13, %v1770_v59  ;;  %v850_v20 = vpop.f32.mrf.mxu1 }
 0x2ea   :  { %3992 = vrcp.f32 %v6469_v58  ;;  %v2898_v48 = vmul.f32 %v6483_v44, %v6441_v31  ;;  %v1986_v12 = vrot.slane %v1985_v32, 4  ;;  %v1140_v60 = vrot.slane %v1139_v47, 1 }
 0x2eb   :  { %v2890_v15 = vsel %vm6492_vm15, %v6388_v14, %v2886_v52  ;;  %v2276_v34 = vrot.slane %v2275_v54, 2  ;;  %v1980_v62 = vadd.f32 %v1979_v5, %v1978_v26  ;;  %v2108_v53 = vmul.f32 %v4113_v41, %v3987_v30 }
 0x2ec   :  { %v2899_v51 = vsub.f32 1.0, %v2898_v48  ;;  %v1773_v45 = vrot.slane %v1772_v22, 1  ;;  %v2282_v16 = vadd.f32 %v2281_v9, %v2280_v17  ;;  %v1354_v27 = vmax.f32 %v1352_v3, %v1353_v0  ;;  %v6557_v48 = vld [vmem:[%s7356_s4] ss:$0 sm:$0xff] }
 0x2ed   :  { %v2881_v21 = vmul.f32 %v2880_v49, %v6359_v28  ;;  %v3345_v57 = vsel %vm6455_vm6, %v6419_v25, %v3340_v1  ;;  %vm2892_vm4 = vcmp.eq.f32.partialorder %v2891_v24, 8.507059e+37  ;;  %v2485_v23 = vadd.f32 %v2484_v40, %v2483_v43  ;;  %v943_v24 = vpop.f32.mrf.mxu3 }
 0x2ee   :  { %v2895_v14 = vsel %vm2892_vm4, %v2894_v7, %v2890_v15  ;;  %v6509_v8 = vadd.f32 %v1773_v45, %v1772_v22  ;;  %v1987_v36 = vadd.f32 %v1986_v12, %v1985_v32  ;;  %v1141_v18 = vmax.f32 %v1139_v47, %v1140_v60 }
 0x2ef   :  { %v2272_v11 = vadd.f32 %v2271_v56, %v2270_v4  ;;  %v2277_v46 = vadd.f32 %v2276_v34, %v2275_v54  ;;  %v1981_v30 = vrot.slane %v1980_v62, 2  ;;  %v2490_v19 = vsel %vm92_vm0, %v2108_v53, 0.0 }
 0x2f0   :  { %v6512_v55 = vpop.eup %3992  ;;  %v2900_v28 = vmul.f32 %v6483_v44, %v2899_v51  ;;  %v2283_v49 = vrot.slane %v2282_v16, 2  ;;  %3994 = vrcp.f32 %v6509_v8  ;;  %v1355_v25 = vrot.slane %v1354_v27, 2 }
 0x2f1   :  { %v3614_v50 = vsel %vm3595_vm13, %v6408_v29, %v6267_v61  ;;  %v6522_v4 = vsel %vm3593_vm12, %v6415_v63, %v6296_v39  ;;  %v2896_v42 = vmul.f32 %v2895_v14, %v2272_v11  ;;  %v2486_v35 = vrot.slane %v2485_v23, 2 }
 0x2f2   :  { %v3615_v26 = vsel %vm3597_vm7, %v2881_v21, %v3614_v50  ;;  %v6526_v59 = vmul.f32 %v3345_v57, %v6417_v2  ;;  %v1988_v17 = vrot.slane %v1987_v36, 2  ;;  %v1439_v3 = vsub.f32 %v6349_v37, %v1141_v18 }
 0x2f3   :  { %v6531_v52 = vmul.f32 %v6512_v55, %v6469_v58  ;;  %v2278_v61 = vrot.slane %v2277_v46, 1  ;;  %v1982_v29 = vadd.f32 %v1981_v30, %v1980_v62  ;;  %v2491_v43 = vrot.slane %v2490_v19, 4 }
 0x2f4   :  { %v2901_v39 = vadd.f32 %v6483_v44, %v2900_v28  ;;  %vm2903_vm1 = vweird.f32 %v6483_v44  ;;  %v2284_v63 = vadd.f32 %v2283_v49, %v2282_v16  ;;  %v1356_v47 = vmax.f32 %v1354_v27, %v1355_v25  ;;  %v853_v16 = vpop.f32.mrf.mxu1 }
 0x2f5   :  { %v3616_v54 = vsel %vm3599_vm10, %v2896_v42, %v3615_v26  ;;  %v6536_v2 = vadd.f32 %v2486_v35, %v2485_v23  ;;  %vm2902_vm5 = vweird.f32 %v6441_v31  ;;  %v2908_v37 = vand.u32 2147483648, %v6441_v31 }
 0x2f6   :  { %v3995_v5 = vpop.eup %3994  ;;  %v2906_v13 = vand.u32 2147483647, %v6441_v31  ;;  %v1989_v32 = vadd.f32 %v1988_v17, %v1987_v36  ;;  %v1527_v6 = vmul.f32 1.442695, %v1439_v3  ;;  %v1357_v56 = vrot.slane %v1356_v47, 1  ;;  %vm6544_vm6 = vmor %vm2902_vm5, %vm2903_vm1 }
 0x2f7   :  { %v3349_v9 = vsub.f32 1.0, %v6531_v52  ;;  %v2279_v0 = vadd.f32 %v2278_v61, %v2277_v46  ;;  %v6548_v7 = vadd.f32 %v2491_v43, %v2490_v19  ;;  %v2913_v40 = vmul.f32 %v3995_v5, %v6509_v8 }
 0x2f8   :  { %v2905_v31 = vsel %vm6544_vm6, %v6483_v44, %v2901_v39  ;;  %v1983_v22 = vrot.slane %v1982_v29, 1  ;;  %v2285_v33 = vrot.slane %v2284_v63, 1  ;;  %v6560_v12 = vadd.f32 %v6557_v48, %v850_v20  ;;  %v4115_v20 = vld [vmem:[%s7353_s0 + $0x1b0] sm:$0xff] }
 0x2f9   :  { %v2909_v60 = vor.u32 1.1754944e-38, %v2908_v37  ;;  %v2914_v15 = vsub.f32 1.0, %v2913_v40  ;;  %v1358_v34 = vmax.f32 %v1356_v47, %v1357_v56  ;;  %v6563_v62 = vadd.f32 %v6557_v48, %v943_v24 }
 0x2fa   :  { %vm2907_vm8 = vcmp.eq.f32.partialorder %v2906_v13, 8.507059e+37  ;;  %v2923_v41 = vand.u32 2147483648, %v6509_v8  ;;  %v1990_v44 = vrot.slane %v1989_v32, 1  ;;  %3996 = vpow2.f32 %v1527_v6 }
 0x2fb   :  { %v2910_v53 = vsel %vm2907_vm8, %v2909_v60, %v2905_v31  ;;  %v2915_v51 = vmul.f32 %v3995_v5, %v2914_v15  ;;  %vm2918_vm11 = vweird.f32 %v3995_v5  ;;  %v2921_v45 = vand.u32 2147483647, %v6509_v8  ;;  %v4116_v15 = vld [vmem:[%s7353_s0 + $0x1b8] sm:$0xff] }
 0x2fc   :  { %v6567_v27 = vadd.f32 %v1983_v22, %v1982_v29  ;;  %v2286_v21 = vadd.f32 %v2285_v33, %v2284_v63  ;;  %v1470_v57 = vsub.f32 %v6447_v10, %v1358_v34  ;;  %v1142_v23 = vsel %vm92_vm0, %v6560_v12, -inf  ;;  %v946_v29 = vpop.f32.mrf.mxu3 }
 0x2fd   :  { %v2916_v14 = vadd.f32 %v3995_v5, %v2915_v51  ;;  %vm2917_vm14 = vweird.f32 %v6509_v8  ;;  %v1143_v36 = vrot.slane %v1142_v23, 4  ;;  %v1359_v18 = vsel %vm92_vm0, %v6563_v62, -inf }
 0x2fe   :  { %v2911_v11 = vmul.f32 %v2910_v53, %v2279_v0  ;;  %vm2919_vm15 = vmor %vm2917_vm14, %vm2918_vm11  ;;  %v2924_v46 = vor.u32 1.1754944e-38, %v2923_v41  ;;  %v6575_v30 = vadd.f32 %v1990_v44, %v1989_v32  ;;  %v6578_v19 = vadd.f32 %v6557_v48, %v853_v16 }
 0x2ff   :  { %v2920_v28 = vsel %vm2919_vm15, %v3995_v5, %v2916_v14  ;;  %vm2922_vm4 = vcmp.eq.f32.partialorder %v2921_v45, 8.507059e+37  ;;  %v1589_v10 = vmul.f32 1.442695, %v1470_v57  ;;  %v1144_v49 = vmax.f32 %v1142_v23, %v1143_v36  ;;  %v856_v57 = vpop.f32.mrf.mxu1 }
 0x300   :  { %v6580_v25 = vpop.eup %3996  ;;  %v2493_v8 = vrot.slane %v6548_v7, 2  ;;  %3998 = vrcp.f32 %v6567_v27  ;;  %v2925_v50 = vsel %vm2922_vm4, %v2924_v46, %v2920_v28  ;;  %v1360_v42 = vrot.slane %v1359_v18, 4 }
 0x301   :  { %v2926_v35 = vmul.f32 %v2925_v50, %v2286_v21  ;;  %v2109_v26 = vmul.f32 %v4115_v20, %v6466_v38  ;;  %4000 = vpow2.f32 %v1589_v10  ;;  %v1145_v17 = vrot.slane %v1144_v49, 2 }
 0x302   :  { %v3617_v3 = vsel %vm3601_vm2, %v2911_v11, %v3616_v54  ;;  %4002 = vrcp.f32 %v6575_v30  ;;  %v1361_v52 = vmax.f32 %v1359_v18, %v1360_v42  ;;  %v1149_v61 = vsel %vm92_vm0, %v6578_v19, -inf }
 0x303   :  { %v3618_v43 = vsel %vm3603_vm3, %v2926_v35, %v3617_v3  ;;  %v1775_v39 = vsel %vm92_vm0, %v6580_v25, 0.0  ;;  %v1146_v63 = vmax.f32 %v1144_v49, %v1145_v17  ;;  %v1150_v47 = vrot.slane %v1149_v61, 4 }
 0x304   :  { %v6598_v38 = vsel %vm3595_vm13, %v6526_v59, %v6522_v4  ;;  %v3350_v54 = vmul.f32 %v6512_v55, %v3349_v9  ;;  %3664 = vst.msk [vmem:[%s7357_s5 + $0x10] sm:$0xff] %vm92_vm0, %v3618_v43  ;;  %v1362_v37 = vrot.slane %v1361_v52, 2  ;;  %v2488_v5 = vrot.slane %v6536_v2, 1 }
 0x305   :  { %v2497_v13 = vsel %vm92_vm0, %v2109_v26, 0.0  ;;  %v1147_v32 = vrot.slane %v1146_v63, 1  ;;  %v6608_v6 = vadd.f32 %v6557_v48, %v946_v29  ;;  %v3358_v4 = vand.u32 2147483648, %v6469_v58 }
 0x306   :  { %v6610_v56 = vpop.eup %3998  ;;  %v1776_v59 = vrot.slane %v1775_v39, 4  ;;  %v1363_v24 = vmax.f32 %v1361_v52, %v1362_v37  ;;  %v1151_v9 = vmax.f32 %v1149_v61, %v1150_v47  ;;  %vm3352_vm1 = vweird.f32 %v6469_v58 }
 0x307   :  { %v4001_v0 = vpop.eup %4000  ;;  %vm3353_vm5 = vweird.f32 %v6512_v55  ;;  %v3356_v1 = vand.u32 2147483647, %v6469_v58  ;;  %v2494_v40 = vadd.f32 %v2493_v8, %v6548_v7  ;;  %v3351_v22 = vadd.f32 %v6512_v55, %v3350_v54 }
 0x308   :  { %v6617_v31 = vpop.eup %4002  ;;  %v2498_v33 = vrot.slane %v2497_v13, 4  ;;  %v1992_v60 = vsel %vm92_vm0, %v4001_v0, 0.0  ;;  %v2110_v34 = vmul.f32 %v4116_v15, %v4001_v0  ;;  %v1148_v44 = vmax.f32 %v1146_v63, %v1147_v32  ;;  %vm6632_vm6 = vmor %vm3352_vm1, %vm3353_vm5 }
 0x309   :  { %v1993_v41 = vrot.slane %v1992_v60, 4  ;;  %v1364_v53 = vrot.slane %v1363_v24, 1  ;;  %v1366_v51 = vsel %vm92_vm0, %v6608_v6, -inf  ;;  %v3359_v45 = vor.u32 1.1754944e-38, %v3358_v4 }
 0x30a   :  { %v3363_v7 = vmul.f32 %v6610_v56, %v6567_v27  ;;  %v1777_v16 = vadd.f32 %v1776_v59, %v1775_v39  ;;  %v1152_v21 = vrot.slane %v1151_v9, 2  ;;  %v2495_v14 = vrot.slane %v2494_v40, 1 }
 0x30b   :  { %v3378_v36 = vmul.f32 %v6617_v31, %v6575_v30  ;;  %v1994_v18 = vadd.f32 %v1993_v41, %v1992_v60  ;;  %v1440_v11 = vsub.f32 %v6560_v12, %v1148_v44  ;;  %v3355_v46 = vsel %vm6632_vm6, %v6512_v55, %v3351_v22 }
 0x30c   :  { %v2504_v28 = vsel %vm92_vm0, %v2110_v34, 0.0  ;;  %v1365_v10 = vmax.f32 %v1363_v24, %v1364_v53  ;;  %v1367_v49 = vrot.slane %v1366_v51, 4  ;;  %v2499_v58 = vadd.f32 %v2498_v33, %v2497_v13  ;;  %v949_v53 = vpop.f32.mrf.mxu3 }
 0x30d   :  { %v1995_v8 = vrot.slane %v1994_v18, 2  ;;  %v1529_v50 = vmul.f32 1.442695, %v1440_v11  ;;  %v6644_v42 = vadd.f32 %v6557_v48, %v856_v57  ;;  %v3364_v35 = vsub.f32 1.0, %v3363_v7 }
 0x30e   :  { %v1778_v20 = vrot.slane %v1777_v16, 2  ;;  %v1153_v26 = vmax.f32 %v1151_v9, %v1152_v21  ;;  %v1368_v17 = vmax.f32 %v1366_v51, %v1367_v49  ;;  %vm3357_vm8 = vcmp.eq.f32.partialorder %v3356_v1, 8.507059e+37 }
 0x30f   :  { %v3379_v12 = vsub.f32 1.0, %v3378_v36  ;;  %v1996_v3 = vadd.f32 %v1995_v8, %v1994_v18  ;;  %v2505_v52 = vrot.slane %v2504_v28, 4  ;;  %v2489_v55 = vadd.f32 %v2488_v5, %v6536_v2 }
 0x310   :  { %v3360_v61 = vsel %vm3357_vm8, %v3359_v45, %v3355_v46  ;;  %v1471_v29 = vsub.f32 %v6563_v62, %v1365_v10  ;;  %v1369_v43 = vrot.slane %v1368_v17, 2  ;;  %v2500_v39 = vrot.slane %v2499_v58, 2 }
 0x311   :  { %v1997_v63 = vrot.slane %v1996_v3, 1  ;;  %4004 = vpow2.f32 %v1529_v50  ;;  %v1156_v47 = vsel %vm92_vm0, %v6644_v42, -inf  ;;  %v6650_v54 = vadd.f32 %v2495_v14, %v2494_v40 }
 0x312   :  { %v3365_v37 = vmul.f32 %v6610_v56, %v3364_v35  ;;  %v1779_v13 = vadd.f32 %v1778_v20, %v1777_v16  ;;  %v1154_v32 = vrot.slane %v1153_v26, 1  ;;  %v3380_v4 = vmul.f32 %v6617_v31, %v3379_v12 }
 0x313   :  { %v6654_v59 = vadd.f32 %v1997_v63, %v1996_v3  ;;  %v2506_v2 = vadd.f32 %v2505_v52, %v2504_v28  ;;  %v1370_v5 = vmax.f32 %v1368_v17, %v1369_v43  ;;  %v6656_v62 = vmul.f32 %v3360_v61, %v2489_v55 }
 0x314   :  { %v3371_v24 = vand.u32 2147483647, %v6567_v27  ;;  %v1591_v9 = vmul.f32 1.442695, %v1471_v29  ;;  %v1157_v0 = vrot.slane %v1156_v47, 4  ;;  %vm3367_vm11 = vweird.f32 %v6567_v27 }
 0x315   :  { %v3373_v1 = vand.u32 2147483648, %v6567_v27  ;;  %v2501_v40 = vadd.f32 %v2500_v39, %v2499_v58  ;;  %4006 = vrcp.f32 %v6654_v59  ;;  %v3366_v22 = vadd.f32 %v6610_v56, %v3365_v37  ;;  %v4117_v58 = vld [vmem:[%s7353_s0 + $0xc0] sm:$0xff] }
 0x316   :  { %vm3368_vm14 = vweird.f32 %v6610_v56  ;;  %vm3383_vm15 = vweird.f32 %v6617_v31  ;;  %v1155_v33 = vmax.f32 %v1153_v26, %v1154_v32  ;;  %v3381_v15 = vadd.f32 %v6617_v31, %v3380_v4 }
 0x317   :  { %v6665_v60 = vpop.eup %4004  ;;  %v1780_v34 = vrot.slane %v1779_v13, 1  ;;  %v2507_v41 = vrot.slane %v2506_v2, 2  ;;  %v1371_v44 = vrot.slane %v1370_v5, 1  ;;  %vm6668_vm4 = vcmp.eq.f32.partialorder %v3371_v24, 8.507059e+37  ;;  %vm6675_vm1 = vmor %vm3367_vm11, %vm3368_vm14 }
 0x318   :  { %v3388_v45 = vand.u32 2147483648, %v6575_v30  ;;  %4008 = vpow2.f32 %v1591_v9  ;;  %v1158_v7 = vmax.f32 %v1156_v47, %v1157_v0  ;;  %v3374_v21 = vor.u32 1.1754944e-38, %v3373_v1 }
 0x319   :  { %v2502_v57 = vrot.slane %v2501_v40, 1  ;;  %vm3382_vm5 = vweird.f32 %v6575_v30  ;;  %v3386_v23 = vand.u32 2147483647, %v6575_v30  ;;  %v3370_v14 = vsel %vm6675_vm1, %v6610_v56, %v3366_v22 }
 0x31a   :  { %vm6686_vm6 = vmor %vm3382_vm5, %vm3383_vm15  ;;  %v1782_v27 = vsel %vm92_vm0, %v6665_v60, 0.0  ;;  %v1441_v18 = vsub.f32 %v6578_v19, %v1155_v33  ;;  %v6694_v11 = vadd.f32 %v6557_v48, %v949_v53  ;;  %v6699_v56 = vadd.f32 %v1780_v34, %v1779_v13  ;;  %v4118_v53 = vld [vmem:[%s7353_s0 + $0xc8] sm:$0xff] }
 0x31b   :  { %v4007_v46 = vpop.eup %4006  ;;  %v3385_v30 = vsel %vm6686_vm6, %v6617_v31, %v3381_v15  ;;  %v2508_v28 = vadd.f32 %v2507_v41, %v2506_v2  ;;  %v1372_v10 = vmax.f32 %v1370_v5, %v1371_v44  ;;  %v3389_v49 = vor.u32 1.1754944e-38, %v3388_v45 }
 0x31c   :  { %v2079_v8 = vmul.f32 %v4117_v58, %v6580_v25  ;;  %v3393_v19 = vmul.f32 %v4007_v46, %v6654_v59  ;;  %v1159_v50 = vrot.slane %v1158_v7, 2  ;;  %v3375_v35 = vsel %vm6668_vm4, %v3374_v21, %v3370_v14 }
 0x31d   :  { %v2503_v20 = vadd.f32 %v2502_v57, %v2501_v40  ;;  %vm3387_vm8 = vcmp.eq.f32.partialorder %v3386_v23, 8.507059e+37  ;;  %v1783_v31 = vrot.slane %v1782_v27, 4  ;;  %v1531_v3 = vmul.f32 1.442695, %v1441_v18  ;;  %v859_v40 = vpop.f32.mrf.mxu1 }
 0x31e   :  { %v4009_v26 = vpop.eup %4008  ;;  %v3390_v17 = vsel %vm3387_vm8, %v3389_v49, %v3385_v30  ;;  %v3394_v12 = vsub.f32 1.0, %v3393_v19  ;;  %v1373_v52 = vsel %vm92_vm0, %v6694_v11, -inf  ;;  %4010 = vrcp.f32 %v6699_v56 }
 0x31f   :  { %v2509_v55 = vrot.slane %v2508_v28, 1  ;;  %v3403_v25 = vand.u32 2147483648, %v6654_v59  ;;  %v1472_v61 = vsub.f32 %v6608_v6, %v1372_v10  ;;  %vm3398_vm11 = vweird.f32 %v4007_v46 }
 0x320   :  { %v3395_v29 = vmul.f32 %v4007_v46, %v3394_v12  ;;  %v3401_v43 = vand.u32 2147483647, %v6654_v59  ;;  %v1160_v39 = vmax.f32 %v1158_v7, %v1159_v50  ;;  %v2287_v63 = vsel %vm92_vm0, %v2079_v8, 0.0 }
 0x321   :  { %v1784_v47 = vadd.f32 %v1783_v31, %v1782_v27  ;;  %v1999_v37 = vsel %vm92_vm0, %v4009_v26, 0.0  ;;  %v1374_v13 = vrot.slane %v1373_v52, 4  ;;  %v3376_v32 = vmul.f32 %v3375_v35, %v6650_v54  ;;  %v4119_v27 = vld [vmem:[%s7353_s0 + $0x1c0] sm:$0xff] }
 0x322   :  { %v3396_v4 = vadd.f32 %v4007_v46, %v3395_v29  ;;  %vm3397_vm14 = vweird.f32 %v6654_v59  ;;  %4012 = vpow2.f32 %v1531_v3  ;;  %v3391_v2 = vmul.f32 %v3390_v17, %v2503_v20 }
 0x323   :  { %v2510_v5 = vadd.f32 %v2509_v55, %v2508_v28  ;;  %vm3399_vm15 = vmor %vm3397_vm14, %vm3398_vm11  ;;  %v3404_v6 = vor.u32 1.1754944e-38, %v3403_v25  ;;  %v1593_v24 = vmul.f32 1.442695, %v1472_v61  ;;  %vm3402_vm4 = vcmp.eq.f32.partialorder %v3401_v43, 8.507059e+37 }
 0x324   :  { %v3400_v9 = vsel %vm3399_vm15, %v4007_v46, %v3396_v4  ;;  %v2000_v0 = vrot.slane %v1999_v37, 4  ;;  %v1161_v1 = vrot.slane %v1160_v39, 1  ;;  %v6718_v22 = vpop.eup %4010  ;;  %v3643_v54 = vsel %vm3597_vm7, %v6656_v62, %v6598_v38  ;;  %v4120_v4 = vld [vmem:[%s7353_s0 + $0xd0] sm:$0xff] }
 0x325   :  { %v3405_v33 = vsel %vm3402_vm4, %v3404_v6, %v3400_v9  ;;  %v1785_v15 = vrot.slane %v1784_v47, 2  ;;  %v1375_v59 = vmax.f32 %v1373_v52, %v1374_v13  ;;  %v3644_v34 = vsel %vm3599_vm10, %v3376_v32, %v3643_v54 }
 0x326   :  { %v2288_v41 = vrot.slane %v2287_v63, 4  ;;  %v3406_v44 = vmul.f32 %v3405_v33, %v2510_v5  ;;  %v2080_v51 = vmul.f32 %v4118_v53, %v6665_v60  ;;  %v3645_v45 = vsel %vm3601_vm2, %v3391_v2, %v3644_v34  ;;  %v952_v5 = vpop.f32.mrf.mxu3 }
 0x327   :  { %4014 = vpow2.f32 %v1593_v24  ;;  %v6730_v7 = vadd.f32 %v6557_v48, %v859_v40  ;;  %v2001_v16 = vadd.f32 %v2000_v0, %v1999_v37  ;;  %v1162_v21 = vmax.f32 %v1160_v39, %v1161_v1 }
 0x328   :  { %v4013_v38 = vpop.eup %4012  ;;  %v3646_v62 = vsel %vm3603_vm3, %v3406_v44, %v3645_v45  ;;  %v2928_v57 = vmul.f32 %v6718_v22, %v6699_v56  ;;  %v1786_v60 = vadd.f32 %v1785_v15, %v1784_v47  ;;  %v1376_v23 = vrot.slane %v1375_v59, 2 }
 0x329   :  { %3668 = vst.msk [vmem:[%s7357_s5 + $0x30] sm:$0xff] %vm92_vm0, %v3646_v62  ;;  %v2289_v14 = vadd.f32 %v2288_v41, %v2287_v63  ;;  %v2294_v36 = vsel %vm92_vm0, %v2080_v51, 0.0  ;;  %v2111_v18 = vmul.f32 %v4119_v27, %v4009_v26  ;;  %v1789_v46 = vsel %vm92_vm0, %v4013_v38, 0.0 }
 0x32a   :  { %v1442_v30 = vsub.f32 %v6644_v42, %v1162_v21  ;;  %v1163_v28 = vsel %vm92_vm0, %v6730_v7, -inf  ;;  %v2002_v10 = vrot.slane %v2001_v16, 2  ;;  %v2929_v58 = vsub.f32 1.0, %v2928_v57  ;;  %v862_v57 = vpop.f32.mrf.mxu1 }
 0x32b   :  { %v1787_v8 = vrot.slane %v1786_v60, 1  ;;  %v1377_v19 = vmax.f32 %v1375_v59, %v1376_v23  ;;  %v2295_v50 = vrot.slane %v2294_v36, 4  ;;  %v1790_v35 = vrot.slane %v1789_v46, 4 }
 0x32c   :  { %v1164_v20 = vrot.slane %v1163_v28, 4  ;;  %v2290_v31 = vrot.slane %v2289_v14, 2  ;;  %v2511_v17 = vsel %vm92_vm0, %v2111_v18, 0.0  ;;  %v1533_v26 = vmul.f32 1.442695, %v1442_v30 }
 0x32d   :  { %v6747_v49 = vpop.eup %4014  ;;  %v2003_v12 = vadd.f32 %v2002_v10, %v2001_v16  ;;  %v2930_v3 = vmul.f32 %v6718_v22, %v2929_v58  ;;  %v6753_v52 = vadd.f32 %v1787_v8, %v1786_v60  ;;  %v1378_v55 = vrot.slane %v1377_v19, 1 }
 0x32e   :  { %v2006_v42 = vsel %vm92_vm0, %v6747_v49, 0.0  ;;  %4016 = vpow2.f32 %v1533_v26  ;;  %v2296_v25 = vadd.f32 %v2295_v50, %v2294_v36  ;;  %v2512_v61 = vrot.slane %v2511_v17, 4 }
 0x32f   :  { %v1791_v29 = vadd.f32 %v1790_v35, %v1789_v46  ;;  %v1165_v43 = vmax.f32 %v1163_v28, %v1164_v20  ;;  %v2291_v39 = vadd.f32 %v2290_v31, %v2289_v14  ;;  %v2007_v63 = vrot.slane %v2006_v42, 4 }
 0x330   :  { %v1379_v47 = vmax.f32 %v1377_v19, %v1378_v55  ;;  %v2936_v37 = vand.u32 2147483647, %v6699_v56  ;;  %v2938_v13 = vand.u32 2147483648, %v6699_v56  ;;  %v2004_v32 = vrot.slane %v2003_v12, 1 }
 0x331   :  { %v2081_v2 = vmul.f32 %v4120_v4, %v4013_v38  ;;  %v2931_v6 = vadd.f32 %v6718_v22, %v2930_v3  ;;  %vm2933_vm1 = vweird.f32 %v6718_v22  ;;  %4018 = vrcp.f32 %v6753_v52 }
 0x332   :  { %v1473_v24 = vsub.f32 %v6694_v11, %v1379_v47  ;;  %v2297_v9 = vrot.slane %v2296_v25, 2  ;;  %v2513_v0 = vadd.f32 %v2512_v61, %v2511_v17  ;;  %v1792_v1 = vrot.slane %v1791_v29, 2  ;;  %v955_v17 = vpop.f32.mrf.mxu3 }
 0x333   :  { %v1166_v40 = vrot.slane %v1165_v43, 2  ;;  %vm2932_vm5 = vweird.f32 %v6699_v56  ;;  %v2008_v33 = vadd.f32 %v2007_v63, %v2006_v42  ;;  %v6768_v15 = vadd.f32 %v6557_v48, %v952_v5 }
 0x334   :  { %v6764_v54 = vpop.eup %4016  ;;  %v2292_v59 = vrot.slane %v2291_v39, 1  ;;  %vm6770_vm6 = vmor %vm2932_vm5, %vm2933_vm1  ;;  %vm6774_vm8 = vcmp.eq.f32.partialorder %v2936_v37, 8.507059e+37  ;;  %v6778_v11 = vadd.f32 %v2004_v32, %v2003_v12  ;;  %v2301_v44 = vsel %vm92_vm0, %v2081_v2, 0.0 }
 0x335   :  { %v2935_v56 = vsel %vm6770_vm6, %v6718_v22, %v2931_v6  ;;  %v2939_v53 = vor.u32 1.1754944e-38, %v2938_v13  ;;  %v1796_v51 = vsel %vm92_vm0, %v6764_v54, 0.0  ;;  %v1595_v45 = vmul.f32 1.442695, %v1473_v24 }
 0x336   :  { %v2298_v38 = vadd.f32 %v2297_v9, %v2296_v25  ;;  %v2514_v62 = vrot.slane %v2513_v0, 2  ;;  %v1793_v16 = vadd.f32 %v1792_v1, %v1791_v29  ;;  %v1167_v21 = vmax.f32 %v1165_v43, %v1166_v40  ;;  %v4121_v1 = vld [vmem:[%s7353_s0 + $0x1c8] sm:$0xff] }
 0x337   :  { %v6786_v60 = vpop.eup %4018  ;;  %v2302_v23 = vrot.slane %v2301_v44, 4  ;;  %v2009_v14 = vrot.slane %v2008_v33, 2  ;;  %4020 = vpow2.f32 %v1595_v45  ;;  %v1380_v36 = vsel %vm92_vm0, %v6768_v15, -inf }
 0x338   :  { %4022 = vrcp.f32 %v6778_v11  ;;  %v1797_v22 = vrot.slane %v1796_v51, 4  ;;  %v1168_v27 = vrot.slane %v1167_v21, 1  ;;  %v1381_v18 = vrot.slane %v1380_v36, 4 }
 0x339   :  { %v2293_v46 = vadd.f32 %v2292_v59, %v2291_v39  ;;  %v2940_v30 = vsel %vm6774_vm8, %v2939_v53, %v2935_v56  ;;  %v6794_v28 = vadd.f32 %v6557_v48, %v862_v57  ;;  %v2299_v10 = vrot.slane %v2298_v38, 1 }
 0x33a   :  { %v2943_v58 = vmul.f32 %v6786_v60, %v6753_v52  ;;  %v2515_v8 = vadd.f32 %v2514_v62, %v2513_v0  ;;  %v1794_v19 = vrot.slane %v1793_v16, 1  ;;  %v2010_v50 = vadd.f32 %v2009_v14, %v2008_v33 }
 0x33b   :  { %v1169_v35 = vmax.f32 %v1167_v21, %v1168_v27  ;;  %v1382_v20 = vmax.f32 %v1380_v36, %v1381_v18  ;;  %v1170_v31 = vsel %vm92_vm0, %v6794_v28, -inf  ;;  %v6800_v26 = vmul.f32 %v2940_v30, %v2293_v46 }
 0x33c   :  { %v2303_v12 = vadd.f32 %v2302_v23, %v2301_v44  ;;  %v1798_v42 = vadd.f32 %v1797_v22, %v1796_v51  ;;  %v2953_v55 = vand.u32 2147483648, %v6753_v52  ;;  %v1171_v29 = vrot.slane %v1170_v31, 4  ;;  %v865_v44 = vpop.f32.mrf.mxu1 }
 0x33d   :  { %v6802_v3 = vpop.eup %4020  ;;  %v1443_v25 = vsub.f32 %v6730_v7, %v1169_v35  ;;  %v1383_v61 = vrot.slane %v1382_v20, 2  ;;  %v6808_v39 = vadd.f32 %v2299_v10, %v2298_v38  ;;  %v2944_v63 = vsub.f32 1.0, %v2943_v58 }
 0x33e   :  { %v6806_v43 = vpop.eup %4022  ;;  %v6810_v47 = vadd.f32 %v1794_v19, %v1793_v16  ;;  %v6813_v37 = vadd.f32 %v6557_v48, %v955_v17  ;;  %v2516_v13 = vrot.slane %v2515_v8, 1  ;;  %v2011_v32 = vrot.slane %v2010_v50, 1 }
 0x33f   :  { %v2013_v4 = vsel %vm92_vm0, %v6802_v3, 0.0  ;;  %v1535_v2 = vmul.f32 1.442695, %v1443_v25  ;;  %vm2947_vm11 = vweird.f32 %v6753_v52  ;;  %v2951_v7 = vand.u32 2147483647, %v6753_v52 }
 0x340   :  { %v2304_v5 = vrot.slane %v2303_v12, 2  ;;  %v1799_v6 = vrot.slane %v1798_v42, 2  ;;  %v1384_v24 = vmax.f32 %v1382_v20, %v1383_v61  ;;  %v2954_v9 = vor.u32 1.1754944e-38, %v2953_v55 }
 0x341   :  { %v3408_v0 = vmul.f32 %v6806_v43, %v6778_v11  ;;  %v2112_v40 = vmul.f32 %v4121_v1, %v6747_v49  ;;  %v1172_v33 = vmax.f32 %v1170_v31, %v1171_v29  ;;  %v2945_v59 = vmul.f32 %v6786_v60, %v2944_v63  ;;  %v4122_v31 = vld [vmem:[%s7353_s0 + $0xd8] sm:$0xff]  ;;  %v4123_v1 = vld [vmem:[%s7353_s0 + $0x1d0] sm:$0xff] }
 0x342   :  { %4024 = vrcp.f32 %v6810_v47  ;;  %v2014_v34 = vrot.slane %v2013_v4, 4  ;;  %v1387_v41 = vsel %vm92_vm0, %v6813_v37, -inf  ;;  %v6829_v56 = vadd.f32 %v2516_v13, %v2515_v8 }
 0x343   :  { %v3418_v53 = vand.u32 2147483648, %v6778_v11  ;;  %v6832_v51 = vadd.f32 %v2011_v32, %v2010_v50  ;;  %4026 = vpow2.f32 %v1535_v2  ;;  %vm2948_vm14 = vweird.f32 %v6786_v60 }
 0x344   :  { %vm6835_vm15 = vcmp.eq.f32.partialorder %v2951_v7, 8.507059e+37  ;;  %v6839_v45 = vadd.f32 %v2304_v5, %v2303_v12  ;;  %v1800_v38 = vadd.f32 %v1799_v6, %v1798_v42  ;;  %v1385_v62 = vrot.slane %v1384_v24, 1  ;;  %vm6859_vm4 = vmor %vm2947_vm11, %vm2948_vm14 }
 0x345   :  { %v2518_v16 = vsel %vm92_vm0, %v2112_v40, 0.0  ;;  %v1173_v21 = vrot.slane %v1172_v33, 2  ;;  %v1388_v57 = vrot.slane %v1387_v41, 4  ;;  %v6843_v23 = vadd.f32 %v6557_v48, %v865_v44 }
 0x346   :  { %v2946_v14 = vadd.f32 %v6786_v60, %v2945_v59  ;;  %v3409_v36 = vsub.f32 1.0, %v3408_v0  ;;  %v2015_v22 = vadd.f32 %v2014_v34, %v2013_v4  ;;  %v1386_v27 = vmax.f32 %v1384_v24, %v1385_v62 }
 0x347   :  { %v3416_v18 = vand.u32 2147483647, %v6778_v11  ;;  %4028 = vrcp.f32 %v6832_v51  ;;  %v1174_v46 = vmax.f32 %v1172_v33, %v1173_v21  ;;  %v1389_v30 = vmax.f32 %v1387_v41, %v1388_v57 }
 0x348   :  { %v6848_v10 = vpop.eup %4024  ;;  %v6850_v58 = vor.u32 1.1754944e-38, %v3418_v53  ;;  %v2306_v8 = vrot.slane %v6839_v45, 1  ;;  %v2519_v19 = vrot.slane %v2518_v16, 4  ;;  %v1801_v50 = vrot.slane %v1800_v38, 1 }
 0x349   :  { %v6853_v35 = vpop.eup %4026  ;;  %v2082_v17 = vmul.f32 %v4122_v31, %v6764_v54  ;;  %v1474_v12 = vsub.f32 %v6768_v15, %v1386_v27  ;;  %v1175_v42 = vrot.slane %v1174_v46, 1  ;;  %v1177_v55 = vsel %vm92_vm0, %v6843_v23, -inf }
 0x34a   :  { %v2950_v52 = vsel %vm6859_vm4, %v6786_v60, %v2946_v14  ;;  %v3410_v25 = vmul.f32 %v6806_v43, %v3409_v36  ;;  %vm3413_vm1 = vweird.f32 %v6806_v43  ;;  %v2016_v61 = vrot.slane %v2015_v22, 2 }
 0x34b   :  { %vm3412_vm5 = vweird.f32 %v6778_v11  ;;  %v2958_v54 = vmul.f32 %v6848_v10, %v6810_v47  ;;  %v1597_v29 = vmul.f32 1.442695, %v1474_v12  ;;  %v1176_v15 = vmax.f32 %v1174_v46, %v1175_v42 }
 0x34c   :  { %v1390_v63 = vrot.slane %v1389_v30, 2  ;;  %v2966_v13 = vand.u32 2147483647, %v6810_v47  ;;  %v6879_v32 = vadd.f32 %v1801_v50, %v1800_v38  ;;  %v1803_v60 = vsel %vm92_vm0, %v6853_v35, 0.0  ;;  %vm6917_vm11 = vmor %vm3412_vm5, %vm3413_vm1 }
 0x34d   :  { %v1178_v4 = vrot.slane %v1177_v55, 4  ;;  %v6883_v2 = vpop.eup %4028  ;;  %v2955_v7 = vsel %vm6835_vm15, %v2954_v9, %v2950_v52  ;;  %v2968_v5 = vand.u32 2147483648, %v6810_v47  ;;  %v2520_v6 = vadd.f32 %v2519_v19, %v2518_v16 }
 0x34e   :  { %v2308_v24 = vsel %vm92_vm0, %v2082_v17, 0.0  ;;  %v2017_v0 = vadd.f32 %v2016_v61, %v2015_v22  ;;  %v2113_v40 = vmul.f32 %v4123_v1, %v6802_v3  ;;  %4030 = vpow2.f32 %v1597_v29  ;;  %v958_v3 = vpop.f32.mrf.mxu3 }
 0x34f   :  { %v1444_v33 = vsub.f32 %v6794_v28, %v1176_v15  ;;  %v3411_v59 = vadd.f32 %v6806_v43, %v3410_v25  ;;  %vm6895_vm6 = vcmp.eq.f32.partialorder %v3416_v18, 8.507059e+37  ;;  %v2959_v9 = vsub.f32 1.0, %v2958_v54 }
 0x350   :  { %v1804_v41 = vrot.slane %v1803_v60, 4  ;;  %v1391_v44 = vmax.f32 %v1389_v30, %v1390_v63  ;;  %v3423_v53 = vmul.f32 %v6883_v2, %v6832_v51  ;;  %4032 = vrcp.f32 %v6879_v32 }
 0x351   :  { %v1537_v49 = vmul.f32 1.442695, %v1444_v33  ;;  %v1179_v38 = vmax.f32 %v1177_v55, %v1178_v4  ;;  %v2956_v62 = vmul.f32 %v2955_v7, %v6808_v39  ;;  %v2521_v28 = vrot.slane %v2520_v6, 2 }
 0x352   :  { %v2309_v16 = vrot.slane %v2308_v24, 4  ;;  %v1392_v21 = vrot.slane %v1391_v44, 1  ;;  %vm2962_vm8 = vweird.f32 %v6810_v47  ;;  %v2018_v57 = vrot.slane %v2017_v0, 1  ;;  %v4124_v47 = vld [vmem:[%s7353_s0 + $0xe0] sm:$0xff] }
 0x353   :  { %v2525_v14 = vsel %vm92_vm0, %v2113_v40, 0.0  ;;  %4034 = vpow2.f32 %v1537_v49  ;;  %v1180_v36 = vrot.slane %v1179_v38, 2  ;;  %v6906_v22 = vadd.f32 %v2306_v8, %v6839_v45 }
 0x354   :  { %v1805_v27 = vadd.f32 %v1804_v41, %v1803_v60  ;;  %v1393_v18 = vmax.f32 %v1391_v44, %v1392_v21  ;;  %v6909_v46 = vadd.f32 %v6557_v48, %v958_v3  ;;  %v6911_v30 = vpop.eup %4030  ;;  %v2960_v19 = vmul.f32 %v6848_v10, %v2959_v9 }
 0x355   :  { %v2969_v50 = vor.u32 1.1754944e-38, %v2968_v5  ;;  %v3424_v45 = vsub.f32 1.0, %v3423_v53  ;;  %v1181_v8 = vmax.f32 %v1179_v38, %v1180_v36  ;;  %v3415_v20 = vsel %vm6917_vm11, %v6806_v43, %v3411_v59 }
 0x356   :  { %vm2963_vm14 = vweird.f32 %v6848_v10  ;;  %v2522_v31 = vadd.f32 %v2521_v28, %v2520_v6  ;;  %v2526_v17 = vrot.slane %v2525_v14, 4  ;;  %v6926_v12 = vpop.eup %4032  ;;  %v6930_v11 = vsel %vm3591_vm9, %v2956_v62, %v6800_v26 }
 0x357   :  { %vm6932_vm15 = vcmp.eq.f32.partialorder %v2966_v13, 8.507059e+37  ;;  %v2310_v55 = vadd.f32 %v2309_v16, %v2308_v24  ;;  %v6936_v52 = vadd.f32 %v2018_v57, %v2017_v0  ;;  %v2020_v43 = vsel %vm92_vm0, %v6911_v30, 0.0  ;;  %vm6959_vm4 = vmor %vm2962_vm8, %vm2963_vm14 }
 0x358   :  { %v1806_v25 = vrot.slane %v1805_v27, 2  ;;  %v1475_v61 = vsub.f32 %v6813_v37, %v1393_v18  ;;  %v1182_v54 = vrot.slane %v1181_v8, 1  ;;  %v1394_v29 = vsel %vm92_vm0, %v6909_v46, -inf }
 0x359   :  { %v6943_v15 = vpop.eup %4034  ;;  %v3420_v26 = vsel %vm6895_vm6, %v6850_v58, %v3415_v20  ;;  %v2961_v63 = vadd.f32 %v6848_v10, %v2960_v19  ;;  %v3425_v13 = vmul.f32 %v6883_v2, %v3424_v45  ;;  %v3431_v60 = vand.u32 2147483647, %v6832_v51 }
 0x35a   :  { %v2523_v4 = vrot.slane %v2522_v31, 1  ;;  %v2973_v37 = vmul.f32 %v6926_v12, %v6879_v32  ;;  %v2527_v7 = vadd.f32 %v2526_v17, %v2525_v14  ;;  %v2021_v5 = vrot.slane %v2020_v43, 4 }
 0x35b   :  { %v3433_v6 = vand.u32 2147483648, %v6832_v51  ;;  %v2311_v24 = vrot.slane %v2310_v55, 2  ;;  %4036 = vrcp.f32 %v6936_v52  ;;  %v1395_v0 = vrot.slane %v1394_v29, 4 }
 0x35c   :  { %v1807_v1 = vadd.f32 %v1806_v25, %v1805_v27  ;;  %v1810_v40 = vsel %vm92_vm0, %v6943_v15, 0.0  ;;  %v1599_v33 = vmul.f32 1.442695, %v1475_v61  ;;  %v1183_v59 = vmax.f32 %v1181_v8, %v1182_v54  ;;  %v868_v25 = vpop.f32.mrf.mxu1 }
 0x35d   :  { %v2965_v34 = vsel %vm6959_vm4, %v6848_v10, %v2961_v63  ;;  %v3426_v9 = vadd.f32 %v6883_v2, %v3425_v13  ;;  %vm3428_vm1 = vweird.f32 %v6883_v2  ;;  %v2083_v41 = vmul.f32 %v4124_v47, %v6853_v35 }
 0x35e   :  { %v2974_v44 = vsub.f32 1.0, %v2973_v37  ;;  %v2528_v53 = vrot.slane %v2527_v7, 2  ;;  %v2022_v49 = vadd.f32 %v2021_v5, %v2020_v43  ;;  %4038 = vpow2.f32 %v1599_v33  ;;  %v4125_v37 = vld [vmem:[%s7353_s0 + $0x1d8] sm:$0xff] }
 0x35f   :  { %v6975_v38 = vmul.f32 %v3420_v26, %v6829_v56  ;;  %vm3427_vm5 = vweird.f32 %v6832_v51  ;;  %v1811_v10 = vrot.slane %v1810_v40, 4  ;;  %v1396_v3 = vmax.f32 %v1394_v29, %v1395_v0 }
 0x360   :  { %v2970_v62 = vsel %vm6932_vm15, %v2969_v50, %v2965_v34  ;;  %v2312_v28 = vadd.f32 %v2311_v24, %v2310_v55  ;;  %v1808_v16 = vrot.slane %v1807_v1, 1  ;;  %v1445_v21 = vsub.f32 %v6843_v23, %v1183_v59  ;;  %vm6985_vm6 = vmor %vm3427_vm5, %vm3428_vm1 }
 0x361   :  { %v6981_v57 = vpop.eup %4036  ;;  %v2524_v35 = vadd.f32 %v2523_v4, %v2522_v31  ;;  %vm6989_vm8 = vcmp.eq.f32.partialorder %v3431_v60, 8.507059e+37  ;;  %v3434_v51 = vor.u32 1.1754944e-38, %v3433_v6  ;;  %v2315_v36 = vsel %vm92_vm0, %v2083_v41, 0.0  ;;  %v961_v60 = vpop.f32.mrf.mxu3 }
 0x362   :  { %v3430_v23 = vsel %vm6985_vm6, %v6883_v2, %v3426_v9  ;;  %v2975_v27 = vmul.f32 %v6926_v12, %v2974_v44  ;;  %v2529_v18 = vadd.f32 %v2528_v53, %v2527_v7  ;;  %v2023_v39 = vrot.slane %v2022_v49, 2 }
 0x363   :  { %v2971_v19 = vmul.f32 %v2970_v62, %v6906_v22  ;;  %v1812_v50 = vadd.f32 %v1811_v10, %v1810_v40  ;;  %v1539_v45 = vmul.f32 1.442695, %v1445_v21  ;;  %v1397_v8 = vrot.slane %v1396_v3, 2 }
 0x364   :  { %v6999_v20 = vpop.eup %4038  ;;  %v2313_v31 = vrot.slane %v2312_v28, 1  ;;  %vm2977_vm11 = vweird.f32 %v6879_v32  ;;  %v7002_v17 = vadd.f32 %v1808_v16, %v1807_v1  ;;  %v2316_v42 = vrot.slane %v2315_v36, 4 }
 0x365   :  { %v3435_v2 = vsel %vm6989_vm8, %v3434_v51, %v3430_v23  ;;  %v2981_v55 = vand.u32 2147483647, %v6879_v32  ;;  %v2983_v43 = vand.u32 2147483648, %v6879_v32  ;;  %v3438_v22 = vmul.f32 %v6981_v57, %v6936_v52 }
 0x366   :  { %v2976_v61 = vadd.f32 %v6926_v12, %v2975_v27  ;;  %vm2978_vm14 = vweird.f32 %v6926_v12  ;;  %v2530_v54 = vrot.slane %v2529_v18, 1  ;;  %v2024_v29 = vadd.f32 %v2023_v39, %v2022_v49 }
 0x367   :  { %v1813_v26 = vrot.slane %v1812_v50, 2  ;;  %v2027_v63 = vsel %vm92_vm0, %v6999_v20, 0.0  ;;  %4040 = vpow2.f32 %v1539_v45  ;;  %v1398_v13 = vmax.f32 %v1396_v3, %v1397_v8  ;;  %vm7028_vm15 = vmor %vm2977_vm11, %vm2978_vm14  ;;  %v4126_v3 = vld [vmem:[%s7353_s0 + $0xe8] sm:$0xff] }
 0x368   :  { %v2317_v4 = vadd.f32 %v2316_v42, %v2315_v36  ;;  %4042 = vrcp.f32 %v7002_v17  ;;  %v2114_v7 = vmul.f32 %v4125_v37, %v6911_v30  ;;  %v7020_v5 = vadd.f32 %v6557_v48, %v868_v25 }
 0x369   :  { %v3620_v6 = vsel %vm3593_vm12, %v2971_v19, %v6930_v11  ;;  %v2314_v24 = vadd.f32 %v2313_v31, %v2312_v28  ;;  %vm7032_vm4 = vcmp.eq.f32.partialorder %v2981_v55, 8.507059e+37  ;;  %v3439_v30 = vsub.f32 1.0, %v3438_v22  ;;  %v964_v8 = vpop.f32.mrf.mxu3  ;;  %v4127_v22 = vld [vmem:[%s7356_s4] ss:$0 sm:$0xff] }
 0x36a   :  { %v2980_v48 = vsel %vm7028_vm15, %v6926_v12, %v2976_v61  ;;  %v2025_v1 = vrot.slane %v2024_v29, 1  ;;  %v2028_v11 = vrot.slane %v2027_v63, 4  ;;  %v1399_v40 = vrot.slane %v1398_v13, 1 }
 0x36b   :  { %v7039_v33 = vmul.f32 %v3435_v2, %v2524_v35  ;;  %v2984_v59 = vor.u32 1.1754944e-38, %v2983_v43  ;;  %v7041_v32 = vadd.f32 %v2530_v54, %v2529_v18  ;;  %v1814_v34 = vadd.f32 %v1813_v26, %v1812_v50 }
 0x36c   :  { %vm3442_vm1 = vweird.f32 %v6936_v52  ;;  %v2318_v9 = vrot.slane %v2317_v4, 2  ;;  %v2532_v47 = vsel %vm92_vm0, %v2114_v7, 0.0  ;;  %v1400_v41 = vmax.f32 %v1398_v13, %v1399_v40 }
 0x36d   :  { %v1184_v44 = vsel %vm92_vm0, %v7020_v5, -inf  ;;  %v7047_v53 = vpop.eup %4040  ;;  %v2985_v12 = vsel %vm7032_vm4, %v2984_v59, %v2980_v48  ;;  %v3440_v49 = vmul.f32 %v6981_v57, %v3439_v30  ;;  %v3446_v10 = vand.u32 2147483647, %v6936_v52 }
 0x36e   :  { %v2084_v62 = vmul.f32 %v4126_v3, %v6943_v15  ;;  %v7057_v28 = vpop.eup %4042  ;;  %v7059_v16 = vadd.f32 %v2025_v1, %v2024_v29  ;;  %v2029_v21 = vadd.f32 %v2028_v11, %v2027_v63  ;;  %v1817_v35 = vsel %vm92_vm0, %v7047_v53, 0.0 }
 0x36f   :  { %v1185_v14 = vrot.slane %v1184_v44, 4  ;;  %v3448_v56 = vand.u32 2147483648, %v6936_v52  ;;  %v2533_v51 = vrot.slane %v2532_v47, 4  ;;  %v1815_v36 = vrot.slane %v1814_v34, 1  ;;  %v4128_v52 = vld [vmem:[%s7353_s0 + $0x1e0] sm:$0xff] }
 0x370   :  { %v1818_v23 = vrot.slane %v1817_v35, 4  ;;  %v2986_v27 = vmul.f32 %v2985_v12, %v2314_v24  ;;  %vm3443_vm5 = vweird.f32 %v6981_v57  ;;  %v2319_v18 = vadd.f32 %v2318_v9, %v2317_v4 }
 0x371   :  { %v1476_v15 = vsub.f32 %v6909_v46, %v1400_v41  ;;  %v3441_v39 = vadd.f32 %v6981_v57, %v3440_v49  ;;  %v2988_v19 = vmul.f32 %v7057_v28, %v7002_v17  ;;  %v2322_v50 = vsel %vm92_vm0, %v2084_v62, 0.0  ;;  %vm7091_vm8 = vmor %vm3442_vm1, %vm3443_vm5 }
 0x372   :  { %v1819_v45 = vadd.f32 %v1818_v23, %v1817_v35  ;;  %4044 = vrcp.f32 %v7059_v16  ;;  %v2030_v31 = vrot.slane %v2029_v21, 2  ;;  %v1186_v2 = vmax.f32 %v1184_v44, %v1185_v14 }
 0x373   :  { %v1601_v42 = vmul.f32 1.442695, %v1476_v15  ;;  %vm7071_vm6 = vcmp.eq.f32.partialorder %v3446_v10, 8.507059e+37  ;;  %v2534_v43 = vadd.f32 %v2533_v51, %v2532_v47  ;;  %v7075_v46 = vadd.f32 %v1815_v36, %v1814_v34 }
 0x374   :  { %v7080_v25 = vadd.f32 %v4127_v22, %v961_v60  ;;  %v7083_v61 = vsel %vm3595_vm13, %v2986_v27, %v3620_v6  ;;  %v3449_v54 = vor.u32 1.1754944e-38, %v3448_v56  ;;  %v2323_v29 = vrot.slane %v2322_v50, 4 }
 0x375   :  { %v7085_v26 = vadd.f32 %v4127_v22, %v964_v8  ;;  %v2320_v13 = vrot.slane %v2319_v18, 1  ;;  %v2989_v4 = vsub.f32 1.0, %v2988_v19  ;;  %v1820_v37 = vrot.slane %v1819_v45, 2 }
 0x376   :  { %4046 = vpow2.f32 %v1601_v42  ;;  %v3445_v60 = vsel %vm7091_vm8, %v6981_v57, %v3441_v39  ;;  %v2996_v7 = vand.u32 2147483647, %v7002_v17  ;;  %v2031_v6 = vadd.f32 %v2030_v31, %v2029_v21 }
 0x377   :  { %v1187_v24 = vrot.slane %v1186_v2, 2  ;;  %vm2992_vm11 = vweird.f32 %v7002_v17  ;;  %v2535_v0 = vrot.slane %v2534_v43, 2  ;;  %4048 = vrcp.f32 %v7075_v46 }
 0x378   :  { %v2115_v58 = vmul.f32 %v4128_v52, %v6999_v20  ;;  %v1401_v30 = vsel %vm92_vm0, %v7080_v25, -inf  ;;  %v7107_v48 = vpop.eup %4044  ;;  %v2324_v57 = vadd.f32 %v2323_v29, %v2322_v50  ;;  %v1408_v40 = vsel %vm92_vm0, %v7085_v26, -inf }
 0x379   :  { %v1188_v1 = vmax.f32 %v1186_v2, %v1187_v24  ;;  %v1402_v11 = vrot.slane %v1401_v30, 4  ;;  %v2990_v59 = vmul.f32 %v7057_v28, %v2989_v4  ;;  %v2998_v34 = vand.u32 2147483648, %v7002_v17 }
 0x37a   :  { %v1821_v9 = vadd.f32 %v1820_v37, %v1819_v45  ;;  %v1409_v47 = vrot.slane %v1408_v40, 4  ;;  %v3450_v20 = vsel %vm7071_vm6, %v3449_v54, %v3445_v60  ;;  %v7115_v41 = vadd.f32 %v2320_v13, %v2319_v18 }
 0x37b   :  { %v2032_v44 = vrot.slane %v2031_v6, 1  ;;  %v1189_v12 = vrot.slane %v1188_v1, 1  ;;  %v2536_v10 = vadd.f32 %v2535_v0, %v2534_v43  ;;  %v3453_v3 = vmul.f32 %v7107_v48, %v7059_v16 }
 0x37c   :  { %v7117_v49 = vpop.eup %4046  ;;  %v2539_v62 = vsel %vm92_vm0, %v2115_v58, 0.0  ;;  %v1403_v21 = vmax.f32 %v1401_v30, %v1402_v11  ;;  %v2325_v35 = vrot.slane %v2324_v57, 2  ;;  %v1410_v51 = vmax.f32 %v1408_v40, %v1409_v47 }
 0x37d   :  { %v2034_v14 = vsel %vm92_vm0, %v7117_v49, 0.0  ;;  %v1190_v56 = vmax.f32 %v1188_v1, %v1189_v12  ;;  %v7124_v36 = vpop.eup %4048  ;;  %v2991_v23 = vadd.f32 %v7057_v28, %v2990_v59  ;;  %vm2993_vm14 = vweird.f32 %v7057_v28 }
 0x37e   :  { %vm7128_vm15 = vcmp.eq.f32.partialorder %v2996_v7, 8.507059e+37  ;;  %v2999_v18 = vor.u32 1.1754944e-38, %v2998_v34  ;;  %v1822_v15 = vrot.slane %v1821_v9, 1  ;;  %v7133_v39 = vmul.f32 %v3450_v20, %v7041_v32  ;;  %vm7140_vm4 = vmor %vm2992_vm11, %vm2993_vm14  ;;  %v4129_v7 = vld [vmem:[%s7353_s0 + $0xf0] sm:$0xff] }
 0x37f   :  { %v7135_v19 = vadd.f32 %v2032_v44, %v2031_v6  ;;  %v2540_v50 = vrot.slane %v2539_v62, 4  ;;  %v2035_v45 = vrot.slane %v2034_v14, 4  ;;  %v2537_v8 = vrot.slane %v2536_v10, 1 }
 0x380   :  { %v3454_v31 = vsub.f32 1.0, %v3453_v3  ;;  %v1446_v42 = vsub.f32 %v7020_v5, %v1190_v56  ;;  %v1404_v2 = vrot.slane %v1403_v21, 2  ;;  %v2326_v43 = vadd.f32 %v2325_v35, %v2324_v57 }
 0x381   :  { %v3003_v32 = vmul.f32 %v7124_v36, %v7075_v46  ;;  %v2036_v22 = vadd.f32 %v2035_v45, %v2034_v14  ;;  %v1411_v54 = vrot.slane %v1410_v51, 2  ;;  %v2995_v29 = vsel %vm7140_vm4, %v7057_v28, %v2991_v23 }
 0x382   :  { %v7149_v63 = vadd.f32 %v1822_v15, %v1821_v9  ;;  %v1541_v5 = vmul.f32 1.442695, %v1446_v42  ;;  %v1405_v13 = vmax.f32 %v1403_v21, %v1404_v2  ;;  %v2541_v4 = vadd.f32 %v2540_v50, %v2539_v62 }
 0x383   :  { %4050 = vrcp.f32 %v7135_v19  ;;  %v2037_v17 = vrot.slane %v2036_v22, 2  ;;  %v1412_v37 = vmax.f32 %v1410_v51, %v1411_v54  ;;  %v3455_v60 = vmul.f32 %v7107_v48, %v3454_v31 }
 0x384   :  { %v2085_v6 = vmul.f32 %v4129_v7, %v7047_v53  ;;  %4052 = vpow2.f32 %v1541_v5  ;;  %v1406_v24 = vrot.slane %v1405_v13, 1  ;;  %v3461_v28 = vand.u32 2147483647, %v7059_v16  ;;  %v4131_v7 = vld [vmem:[%s7353_s0 + $0x1e8] sm:$0xff] }
 0x385   :  { %v3463_v0 = vand.u32 2147483648, %v7059_v16  ;;  %v2327_v52 = vrot.slane %v2326_v43, 1  ;;  %v3004_v58 = vsub.f32 1.0, %v3003_v32  ;;  %4054 = vrcp.f32 %v7149_v63 }
 0x386   :  { %v2038_v30 = vadd.f32 %v2037_v17, %v2036_v22  ;;  %v1407_v57 = vmax.f32 %v1405_v13, %v1406_v24  ;;  %v1413_v1 = vrot.slane %v1412_v37, 1  ;;  %v3000_v11 = vsel %vm7128_vm15, %v2999_v18, %v2995_v29 }
 0x387   :  { %vm3457_vm1 = vweird.f32 %v7059_v16  ;;  %vm3458_vm5 = vweird.f32 %v7107_v48  ;;  %v2542_v53 = vrot.slane %v2541_v4, 2  ;;  %v3456_v40 = vadd.f32 %v7107_v48, %v3455_v60  ;;  %v4130_v16 = vld [vmem:[%s7353_s0 + $0xf8] sm:$0xff] }
 0x388   :  { %v2329_v59 = vsel %vm92_vm0, %v2085_v6, 0.0  ;;  %v1477_v34 = vsub.f32 %v7080_v25, %v1407_v57  ;;  %v1414_v9 = vmax.f32 %v1412_v37, %v1413_v1  ;;  %v2538_v20 = vadd.f32 %v2537_v8, %v2536_v10  ;;  %vm7182_vm8 = vmor %vm3457_vm1, %vm3458_vm5 }
 0x389   :  { %v7167_v47 = vpop.eup %4050  ;;  %vm7169_vm6 = vcmp.eq.f32.partialorder %v3461_v28, 8.507059e+37  ;;  %v3464_v12 = vor.u32 1.1754944e-38, %v3463_v0  ;;  %v7173_v3 = vadd.f32 %v2327_v52, %v2326_v43  ;;  %v3005_v21 = vmul.f32 %v7124_v36, %v3004_v58 }
 0x38a   :  { %v4053_v62 = vpop.eup %4052  ;;  %v2039_v35 = vrot.slane %v2038_v30, 1  ;;  %v1603_v14 = vmul.f32 1.442695, %v1477_v34  ;;  %v1478_v56 = vsub.f32 %v7085_v26, %v1414_v9  ;;  %v3001_v25 = vmul.f32 %v3000_v11, %v7115_v41  ;;  %v4132_v9 = vld [vmem:[%s7353_s0 + $0x1f0] sm:$0xff] }
 0x38b   :  { %v3011_v51 = vand.u32 2147483647, %v7075_v46  ;;  %v2543_v23 = vadd.f32 %v2542_v53, %v2541_v4  ;;  %v2330_v27 = vrot.slane %v2329_v59, 4  ;;  %v7187_v18 = vpop.eup %4054  ;;  %v3460_v26 = vsel %vm7182_vm8, %v7107_v48, %v3456_v40 }
 0x38c   :  { %v1824_v41 = vsel %vm92_vm0, %v4053_v62, 0.0  ;;  %v2086_v15 = vmul.f32 %v4130_v16, %v4053_v62  ;;  %4056 = vpow2.f32 %v1603_v14  ;;  %v3013_v50 = vand.u32 2147483648, %v7075_v46 }
 0x38d   :  { %v3468_v45 = vmul.f32 %v7167_v47, %v7135_v19  ;;  %v1825_v8 = vrot.slane %v1824_v41, 4  ;;  %v1605_v31 = vmul.f32 1.442695, %v1478_v56  ;;  %v3006_v42 = vadd.f32 %v7124_v36, %v3005_v21 }
 0x38e   :  { %vm3007_vm11 = vweird.f32 %v7075_v46  ;;  %vm3008_vm14 = vweird.f32 %v7124_v36  ;;  %v7202_v48 = vadd.f32 %v2039_v35, %v2038_v30  ;;  %v3465_v2 = vsel %vm7169_vm6, %v3464_v12, %v3460_v26  ;;  %v4133_v26 = vld [vmem:[%s7353_s0 + $0x1f8] sm:$0xff] }
 0x38f   :  { %v3018_v55 = vmul.f32 %v7187_v18, %v7149_v63  ;;  %v1826_v43 = vadd.f32 %v1825_v8, %v1824_v41  ;;  %4058 = vpow2.f32 %v1605_v31  ;;  %v7210_v32 = vsel %vm3597_vm7, %v3001_v25, %v7083_v61  ;;  %vm7213_vm15 = vmor %vm3007_vm11, %vm3008_vm14 }
 0x390   :  { %v2544_v22 = vrot.slane %v2543_v23, 1  ;;  %v2331_v54 = vadd.f32 %v2330_v27, %v2329_v59  ;;  %v2336_v46 = vsel %vm92_vm0, %v2086_v15, 0.0  ;;  %vm7217_vm4 = vcmp.eq.f32.partialorder %v3011_v51, 8.507059e+37 }
 0x391   :  { %v3014_v13 = vor.u32 1.1754944e-38, %v3013_v50  ;;  %v3469_v4 = vsub.f32 1.0, %v3468_v45  ;;  %v1827_v17 = vrot.slane %v1826_v43, 2  ;;  %v7221_v60 = vmul.f32 %v3465_v2, %v2538_v20 }
 0x392   :  { %v4057_v37 = vpop.eup %4056  ;;  %v3010_v61 = vsel %vm7213_vm15, %v7124_v36, %v3006_v42  ;;  %v2116_v6 = vmul.f32 %v4131_v7, %v7117_v49  ;;  %4060 = vrcp.f32 %v7202_v48  ;;  %v3019_v24 = vsub.f32 1.0, %v3018_v55 }
 0x393   :  { %v1828_v28 = vadd.f32 %v1827_v17, %v1826_v43  ;;  %v2337_v0 = vrot.slane %v2336_v46, 4  ;;  %v2041_v52 = vsel %vm92_vm0, %v4057_v37, 0.0  ;;  %v7232_v58 = vadd.f32 %v2544_v22, %v2543_v23 }
 0x394   :  { %vm3472_vm1 = vweird.f32 %v7135_v19  ;;  %v3478_v30 = vand.u32 2147483648, %v7135_v19  ;;  %v2332_v36 = vrot.slane %v2331_v54, 2  ;;  %v2042_v57 = vrot.slane %v2041_v52, 4 }
 0x395   :  { %v4059_v1 = vpop.eup %4058  ;;  %v3015_v11 = vsel %vm7217_vm4, %v3014_v13, %v3010_v61  ;;  %v3470_v49 = vmul.f32 %v7167_v47, %v3469_v4  ;;  %v3476_v53 = vand.u32 2147483647, %v7135_v19  ;;  %v1829_v40 = vrot.slane %v1828_v28, 1 }
 0x396   :  { %v2546_v59 = vsel %vm92_vm0, %v2116_v6, 0.0  ;;  %v2043_v34 = vadd.f32 %v2042_v57, %v2041_v52  ;;  %v2117_v20 = vmul.f32 %v4132_v9, %v4057_v37  ;;  %v2048_v44 = vsel %vm92_vm0, %v4059_v1, 0.0 }
 0x397   :  { %v3020_v12 = vmul.f32 %v7187_v18, %v3019_v24  ;;  %v7246_v62 = vadd.f32 %v1829_v40, %v1828_v28  ;;  %v2338_v21 = vadd.f32 %v2337_v0, %v2336_v46  ;;  %v2049_v35 = vrot.slane %v2048_v44, 4 }
 0x398   :  { %v7248_v14 = vpop.eup %4060  ;;  %v3016_v56 = vmul.f32 %v3015_v11, %v7173_v3  ;;  %v3479_v25 = vor.u32 1.1754944e-38, %v3478_v30  ;;  %v2333_v10 = vadd.f32 %v2332_v36, %v2331_v54  ;;  %v2044_v51 = vrot.slane %v2043_v34, 2 }
 0x399   :  { %vm3473_vm5 = vweird.f32 %v7167_v47  ;;  %vm7252_vm6 = vcmp.eq.f32.partialorder %v3476_v53, 8.507059e+37  ;;  %v2547_v27 = vrot.slane %v2546_v59, 4  ;;  %4062 = vrcp.f32 %v7246_v62 }
 0x39a   :  { %v2118_v41 = vmul.f32 %v4133_v26, %v4059_v1  ;;  %v3471_v16 = vadd.f32 %v7167_v47, %v3470_v49  ;;  %vm3023_vm8 = vweird.f32 %v7187_v18  ;;  %v2045_v3 = vadd.f32 %v2044_v51, %v2043_v34  ;;  %vm7273_vm14 = vmor %vm3472_vm1, %vm3473_vm5 }
 0x39b   :  { %v2553_v15 = vsel %vm92_vm0, %v2117_v20, 0.0  ;;  %v3021_v50 = vadd.f32 %v7187_v18, %v3020_v12  ;;  %v3483_v45 = vmul.f32 %v7248_v14, %v7202_v48  ;;  %v2339_v8 = vrot.slane %v2338_v21, 2 }
 0x39c   :  { %v2050_v31 = vadd.f32 %v2049_v35, %v2048_v44  ;;  %vm3022_vm11 = vweird.f32 %v7149_v63  ;;  %v3026_v42 = vand.u32 2147483647, %v7149_v63  ;;  %v3028_v2 = vand.u32 2147483648, %v7149_v63 }
 0x39d   :  { %v2046_v55 = vrot.slane %v2045_v3, 1  ;;  %v2548_v22 = vadd.f32 %v2547_v27, %v2546_v59  ;;  %v2554_v54 = vrot.slane %v2553_v15, 4  ;;  %v2560_v29 = vsel %vm92_vm0, %v2118_v41, 0.0  ;;  %vm7285_vm15 = vmor %vm3022_vm11, %vm3023_vm8 }
 0x39e   :  { %v2051_v46 = vrot.slane %v2050_v31, 2  ;;  %v3623_v5 = vsel %vm3599_vm10, %v3016_v56, %v7210_v32  ;;  %v3475_v63 = vsel %vm7273_vm14, %v7167_v47, %v3471_v16  ;;  %v2334_v13 = vrot.slane %v2333_v10, 1 }
 0x39f   :  { %v7289_v4 = vadd.f32 %v2046_v55, %v2045_v3  ;;  %v4063_v17 = vpop.eup %4062  ;;  %v3025_v37 = vsel %vm7285_vm15, %v7187_v18, %v3021_v50  ;;  %v3484_v61 = vsub.f32 1.0, %v3483_v45  ;;  %v2340_v32 = vadd.f32 %v2339_v8, %v2338_v21 }
 0x3a0   :  { %v2052_v7 = vadd.f32 %v2051_v46, %v2050_v31  ;;  %v3029_v6 = vor.u32 1.1754944e-38, %v3028_v2  ;;  %v3033_v47 = vmul.f32 %v4063_v17, %v7246_v62  ;;  %v2561_v24 = vrot.slane %v2560_v29, 4 }
 0x3a1   :  { %4064 = vrcp.f32 %v7289_v4  ;;  %vm3027_vm4 = vcmp.eq.f32.partialorder %v3026_v42, 8.507059e+37  ;;  %v2549_v28 = vrot.slane %v2548_v22, 2  ;;  %v2555_v0 = vadd.f32 %v2554_v54, %v2553_v15 }
 0x3a2   :  { %v2053_v52 = vrot.slane %v2052_v7, 1  ;;  %v7298_v30 = vsel %vm7252_vm6, %v3479_v25, %v3475_v63  ;;  %v2335_v36 = vadd.f32 %v2334_v13, %v2333_v10  ;;  %v3030_v57 = vsel %vm3027_vm4, %v3029_v6, %v3025_v37 }
 0x3a3   :  { %v3034_v18 = vsub.f32 1.0, %v3033_v47  ;;  %v3485_v1 = vmul.f32 %v7248_v14, %v3484_v61  ;;  %v2341_v11 = vrot.slane %v2340_v32, 1  ;;  %v3043_v49 = vand.u32 2147483648, %v7246_v62 }
 0x3a4   :  { %v7302_v53 = vadd.f32 %v2053_v52, %v2052_v7  ;;  %vm3038_vm1 = vweird.f32 %v4063_v17  ;;  %v3041_v59 = vand.u32 2147483647, %v7246_v62  ;;  %v2562_v34 = vadd.f32 %v2561_v24, %v2560_v29 }
 0x3a5   :  { %v3035_v40 = vmul.f32 %v4063_v17, %v3034_v18  ;;  %v2550_v9 = vadd.f32 %v2549_v28, %v2548_v22  ;;  %vm3487_vm5 = vweird.f32 %v7202_v48  ;;  %v2556_v20 = vrot.slane %v2555_v0, 2 }
 0x3a6   :  { %4066 = vrcp.f32 %v7302_v53  ;;  %v3031_v12 = vmul.f32 %v3030_v57, %v2335_v36  ;;  %v3493_v21 = vand.u32 2147483648, %v7202_v48  ;;  %vm3037_vm6 = vweird.f32 %v7246_v62 }
 0x3a7   :  { %v4065_v44 = vpop.eup %4064  ;;  %v3036_v35 = vadd.f32 %v4063_v17, %v3035_v40  ;;  %v3486_v56 = vadd.f32 %v7248_v14, %v3485_v1  ;;  %vm3488_vm8 = vweird.f32 %v7248_v14  ;;  %vm3039_vm11 = vmor %vm3037_vm6, %vm3038_vm1  ;;  %v3044_v25 = vor.u32 1.1754944e-38, %v3043_v49 }
 0x3a8   :  { %v3498_v10 = vmul.f32 %v4065_v44, %v7289_v4  ;;  %v2342_v51 = vadd.f32 %v2341_v11, %v2340_v32  ;;  %vm3042_vm14 = vcmp.eq.f32.partialorder %v3041_v59, 8.507059e+37  ;;  %v2563_v27 = vrot.slane %v2562_v34, 2  ;;  %vm7316_vm15 = vmor %vm3487_vm5, %vm3488_vm8 }
 0x3a9   :  { %v3040_v23 = vsel %vm3039_vm11, %v4063_v17, %v3036_v35  ;;  %v3491_v26 = vand.u32 2147483647, %v7202_v48  ;;  %v2557_v16 = vadd.f32 %v2556_v20, %v2555_v0  ;;  %v3624_v15 = vsel %vm3601_vm2, %v3031_v12, %v3623_v5 }
 0x3aa   :  { %v3045_v41 = vsel %vm3042_vm14, %v3044_v25, %v3040_v23  ;;  %v3499_v3 = vsub.f32 1.0, %v3498_v10  ;;  %v2551_v62 = vrot.slane %v2550_v9, 1  ;;  %v3508_v8 = vand.u32 2147483648, %v7289_v4 }
 0x3ab   :  { %v3046_v45 = vmul.f32 %v3045_v41, %v2342_v51  ;;  %v3490_v42 = vsel %vm7316_vm15, %v7248_v14, %v3486_v56  ;;  %vm3503_vm4 = vweird.f32 %v4065_v44  ;;  %v3506_v55 = vand.u32 2147483647, %v7289_v4 }
 0x3ac   :  { %v4067_v31 = vpop.eup %4066  ;;  %v3500_v2 = vmul.f32 %v4065_v44, %v3499_v3  ;;  %v3494_v43 = vor.u32 1.1754944e-38, %v3493_v21  ;;  %v2564_v48 = vadd.f32 %v2563_v27, %v2562_v34  ;;  %vm3492_vm1 = vcmp.eq.f32.partialorder %v3491_v26, 8.507059e+37 }
 0x3ad   :  { %v3625_v22 = vsel %vm3603_vm3, %v3046_v45, %v3624_v15  ;;  %v3513_v54 = vmul.f32 %v4067_v31, %v7302_v53  ;;  %v2558_v46 = vrot.slane %v2557_v16, 1  ;;  %vm3502_vm5 = vweird.f32 %v7289_v4 }
 0x3ae   :  { %3665 = vst.msk [vmem:[%s7357_s5 + $0x18] sm:$0xff] %vm92_vm0, %v3625_v22  ;;  %v3501_v29 = vadd.f32 %v4065_v44, %v3500_v2  ;;  %v2552_v14 = vadd.f32 %v2551_v62, %v2550_v9  ;;  %v3495_v5 = vsel %vm3492_vm1, %v3494_v43, %v3490_v42  ;;  %vm3504_vm6 = vmor %vm3502_vm5, %vm3503_vm4  ;;  %v3509_v63 = vor.u32 1.1754944e-38, %v3508_v8 }
 0x3af   :  { %v3514_v13 = vsub.f32 1.0, %v3513_v54  ;;  %vm3507_vm8 = vcmp.eq.f32.partialorder %v3506_v55, 8.507059e+37  ;;  %v3521_v17 = vand.u32 2147483647, %v7302_v53  ;;  %v3523_v37 = vand.u32 2147483648, %v7302_v53 }
 0x3b0   :  { %v3505_v19 = vsel %vm3504_vm6, %v4065_v44, %v3501_v29  ;;  %v2565_v32 = vrot.slane %v2564_v48, 1  ;;  %vm3518_vm11 = vweird.f32 %v4067_v31  ;;  %v3481_v6 = vmul.f32 %v7298_v30, %v7232_v58 }
 0x3b1   :  { %v3510_v61 = vsel %vm3507_vm8, %v3509_v63, %v3505_v19  ;;  %v3515_v7 = vmul.f32 %v4067_v31, %v3514_v13  ;;  %v2559_v47 = vadd.f32 %v2558_v46, %v2557_v16  ;;  %v3647_v4 = vsel %vm3591_vm9, %v7039_v33, %v6975_v38 }
 0x3b2   :  { %v3496_v24 = vmul.f32 %v3495_v5, %v2552_v14  ;;  %vm3517_vm14 = vweird.f32 %v7302_v53  ;;  %v3648_v0 = vsel %vm3593_vm12, %v7133_v39, %v3647_v4  ;;  %v3524_v36 = vor.u32 1.1754944e-38, %v3523_v37 }
 0x3b3   :  { %v3516_v28 = vadd.f32 %v4067_v31, %v3515_v7  ;;  %v3511_v52 = vmul.f32 %v3510_v61, %v2559_v47  ;;  %vm3519_vm15 = vmor %vm3517_vm14, %vm3518_vm11  ;;  %v3649_v57 = vsel %vm3595_vm13, %v7221_v60, %v3648_v0  ;;  %v2566_v18 = vadd.f32 %v2565_v32, %v2564_v48 }
 0x3b4   :  { %vm3522_vm4 = vcmp.eq.f32.partialorder %v3521_v17, 8.507059e+37  ;;  %v3650_v30 = vsel %vm3597_vm7, %v3481_v6, %v3649_v57 }
 0x3b5   :  { %v3520_v58 = vsel %vm3519_vm15, %v4067_v31, %v3516_v28  ;;  %v3651_v38 = vsel %vm3599_vm10, %v3496_v24, %v3650_v30 }
 0x3b6   :  { %v3525_v1 = vsel %vm3522_vm4, %v3524_v36, %v3520_v58  ;;  %v3652_v11 = vsel %vm3601_vm2, %v3511_v52, %v3651_v38 }
 0x3b7   :  { %v3526_v33 = vmul.f32 %v3525_v1, %v2566_v18 }
 0x3b9   :  { %v3653_v49 = vsel %vm3603_vm3, %v3526_v33, %v3652_v11 }
 0x3ba   :  { %3669 = vst.msk [vmem:[%s7357_s5 + $0x38] sm:$0xff] %vm92_vm0, %v3653_v49 }

</bundles_post_ra>
